<compile_context>
chip_gen: v7x
topology: tpu7x:2x2x1
jax: 0.10.0
libtpu: 0.0.40
codegen_flags: <defaults>
</compile_context>

<pallas_src>
import math

import jax
import jax.numpy as jnp
from jax.experimental import pallas as pl
from jax.experimental.pallas import tpu as pltpu

# ----------------------------- configuration --------------------------------
D_KIN, D_PID = 8, 8
USE_PID = True
D_INPUT = D_KIN + D_PID if USE_PID else D_KIN   # 16
D_MODEL = 32
D_FF = 64
D_OUTPUT = 16
HEADS = 4
D_HEAD = D_MODEL // HEADS                       # 8
N_LAYERS = 2
N_POOL_LAYERS = 1
SEQ = 8
N_SEEDS = 2
BATCH = 2
ROWS = BATCH * SEQ                              # merged batch*seq rows = 16
NEG_INF = -1e9
SLAB_W = 128                                    # lane width of parameter slabs


# --------------------------- in-kernel building blocks -----------------------
def _linear(x, w, b, act=None):
    y = jnp.dot(x, w, preferred_element_type=jnp.float32) + b
    if act == "leaky_relu":
        y = jnp.where(y > 0, y, 0.01 * y)        # nn.LeakyReLU default slope
    elif act == "relu":
        y = jnp.maximum(y, 0.0)
    return y


def _layernorm(x, g, b):
    mu = jnp.mean(x, axis=-1, keepdims=True)
    xc = x - mu
    var = jnp.mean(xc * xc, axis=-1, keepdims=True)
    return xc * jax.lax.rsqrt(var + 1e-5) * g + b


def _attn_heads(q_all, k_all, v_all, bias):
    """q/k/v_all: (L, D_MODEL) with heads packed along lanes; bias: (L, L)."""
    scale = 1.0 / math.sqrt(D_HEAD)
    outs = []
    for h in range(HEADS):                       # static unroll, 2-D dots only
        sl = slice(h * D_HEAD, (h + 1) * D_HEAD)
        q, k, v = q_all[:, sl], k_all[:, sl], v_all[:, sl]
        s = jax.lax.dot_general(q, k, (((1,), (1,)), ((), ())),
                                preferred_element_type=jnp.float32) * scale + bias
        s = s - jnp.max(s, axis=-1, keepdims=True)
        e = jnp.exp(s)
        attn = e * pl.reciprocal(jnp.sum(e, axis=-1, keepdims=True), approx=True)
        outs.append(jnp.dot(attn, v, preferred_element_type=jnp.float32))
    return jnp.concatenate(outs, axis=-1)        # (L, D_MODEL)


def _mha(x_q, x_kv, wqkv, bqkv, wo, bo, bias, cross):
    """Fused multi-head attention.  wqkv: (E, 3E) = [Wq|Wk|Wv], bqkv: (1, 3E)."""
    E = D_MODEL
    if not cross:
        qkv = jnp.dot(x_q, wqkv, preferred_element_type=jnp.float32) + bqkv
        q_all, k_all, v_all = qkv[:, :E], qkv[:, E:2 * E], qkv[:, 2 * E:]
    else:
        q_all = jnp.dot(x_q, wqkv[:, :E], preferred_element_type=jnp.float32) + bqkv[:, :E]
        kv = jnp.dot(x_kv, wqkv[:, E:], preferred_element_type=jnp.float32) + bqkv[:, E:]
        k_all, v_all = kv[:, :E], kv[:, E:]
    o = _attn_heads(q_all, k_all, v_all, bias)
    return jnp.dot(o, wo, preferred_element_type=jnp.float32) + bo


def _make_kernel(w_idx, v_idx):
    """w_idx / v_idx: static dicts name -> (row_offset, n_rows, n_cols)."""

    def kernel(x_ref, enc_bias_ref, pool_bias_ref, z_init_ref, w_ref, v_ref, out_ref):
        def W(name):
            r0, nr, nc = w_idx[name]
            return w_ref[r0:r0 + nr, 0:nc]       # static slice of VMEM slab

        def V(name):
            r0, nr, nc = v_idx[name]
            return v_ref[r0:r0 + nr, 0:nc]

        enc_bias = enc_bias_ref[...]             # (ROWS, ROWS) block-diag + key-pad bias
        pool_bias = pool_bias_ref[...]           # (ROWS, ROWS) block-diag seed-key bias

        # ff_input: Linear -> LeakyReLU -> Dropout(0) -> Linear
        h = _linear(x_ref[...], W("ff_in_w1"), V("ff_in_b1"), act="leaky_relu")
        h = _linear(h, W("ff_in_w2"), V("ff_in_b2"))

        # encoder layers: self-attn + FFN, post-norm
        for i in range(N_LAYERS):
            p = f"enc{i}."
            a = _mha(h, h, W(p + "wqkv"), V(p + "bqkv"),
                     W(p + "wo"), V(p + "bo"), enc_bias, cross=False)
            h = _layernorm(h + a, V(p + "ln1_g"), V(p + "ln1_b"))
            f = _linear(h, W(p + "ffw1"), V(p + "ffb1"), act="relu")
            f = _linear(f, W(p + "ffw2"), V(p + "ffb2"))
            h = _layernorm(h + f, V(p + "ln3_g"), V(p + "ln3_b"))

        # pooling layers: self-attn (seed tokens) + cross-attn to h + FFN
        z = z_init_ref[...]                      # (ROWS, D_MODEL), seed rows per batch
        for j in range(N_POOL_LAYERS):
            p = f"pool{j}."
            a = _mha(z, z, W(p + "self_wqkv"), V(p + "self_bqkv"),
                     W(p + "self_wo"), V(p + "self_bo"), pool_bias, cross=False)
            z = _layernorm(z + a, V(p + "ln1_g"), V(p + "ln1_b"))
            a = _mha(z, h, W(p + "src_wqkv"), V(p + "src_bqkv"),
                     W(p + "src_wo"), V(p + "src_bo"), enc_bias, cross=True)
            z = _layernorm(z + a, V(p + "ln2_g"), V(p + "ln2_b"))
            f = _linear(z, W(p + "ffw1"), V(p + "ffb1"), act="relu")
            f = _linear(f, W(p + "ffw2"), V(p + "ffb2"))
            z = _layernorm(z + f, V(p + "ln3_g"), V(p + "ln3_b"))

        # packed mu/logvar heads: cols 0:16 = ff_mu(z), cols 16:32 = ff_var(z)
        out_ref[...] = _linear(z, W("w_out"), V("b_out"))

    return kernel


# --------------------------- parameter slab packing --------------------------
class _SlabPacker:
    def __init__(self, width=SLAB_W):
        self.width = width
        self.pieces = []
        self.offset = 0
        self.index = {}

    def add(self, name, arr):
        arr = jnp.asarray(arr, jnp.float32)
        if arr.ndim == 1:
            arr = arr[None, :]
        r, c = arr.shape
        self.index[name] = (self.offset, r, c)
        self.pieces.append(jnp.pad(arr, ((0, 0), (0, self.width - c))))
        self.offset += r

    def finalize(self):
        slab = jnp.concatenate(self.pieces, axis=0)
        pad = (-slab.shape[0]) % 8
        if pad:
            slab = jnp.pad(slab, ((0, pad), (0, 0)))
        return slab, self.index


def _pack_mha(wp, vp, prefix, p):
    wqkv = jnp.concatenate([p["wq"], p["wk"], p["wv"]], axis=1)   # (E, 3E)
    bqkv = jnp.concatenate([p["bq"], p["bk"], p["bv"]])           # (3E,)
    wp.add(prefix + "wqkv", wqkv)
    wp.add(prefix + "wo", p["wo"])
    vp.add(prefix + "bqkv", bqkv)
    vp.add(prefix + "bo", p["bo"])


def pack_params(params):
    """Pack all parameters into two (rows,128) f32 slabs + static index dicts."""
    wp, vp = _SlabPacker(), _SlabPacker()
    wp.add("ff_in_w1", params["ff_in_w1"]); vp.add("ff_in_b1", params["ff_in_b1"])
    wp.add("ff_in_w2", params["ff_in_w2"]); vp.add("ff_in_b2", params["ff_in_b2"])
    for i, p in enumerate(params["encoder_layers"]):
        pfx = f"enc{i}."
        _pack_mha(wp, vp, pfx, p["self"])
        wp.add(pfx + "ffw1", p["ff_w1"]); wp.add(pfx + "ffw2", p["ff_w2"])
        vp.add(pfx + "ln1_g", p["ln1_g"]); vp.add(pfx + "ln1_b", p["ln1_b"])
        vp.add(pfx + "ffb1", p["ff_b1"]); vp.add(pfx + "ffb2", p["ff_b2"])
        vp.add(pfx + "ln3_g", p["ln3_g"]); vp.add(pfx + "ln3_b", p["ln3_b"])
    for j, p in enumerate(params["pooling_layers"]):
        pfx = f"pool{j}."
        _pack_mha(wp, vp, pfx + "self_", p["self"])
        _pack_mha(wp, vp, pfx + "src_", p["src"])
        wp.add(pfx + "ffw1", p["ff_w1"]); wp.add(pfx + "ffw2", p["ff_w2"])
        vp.add(pfx + "ln1_g", p["ln1_g"]); vp.add(pfx + "ln1_b", p["ln1_b"])
        vp.add(pfx + "ln2_g", p["ln2_g"]); vp.add(pfx + "ln2_b", p["ln2_b"])
        vp.add(pfx + "ffb1", p["ff_b1"]); vp.add(pfx + "ffb2", p["ff_b2"])
        vp.add(pfx + "ln3_g", p["ln3_g"]); vp.add(pfx + "ln3_b", p["ln3_b"])
    # packed output heads: [W_mu | W_var] and [b_mu | b_var]
    wp.add("w_out", jnp.concatenate([params["ff_mu_w"], params["ff_var_w"]], axis=1))
    vp.add("b_out", jnp.concatenate([params["ff_mu_b"], params["ff_var_b"]]))

    w_slab, w_idx = wp.finalize()
    v_slab, v_idx = vp.finalize()
    emb = params["embeddings"][:, 0, :]          # (N_SEEDS, D_MODEL)
    return w_slab, v_slab, emb, w_idx, v_idx


# ------------------------------ forward wrapper --------------------------------
def make_encoder_forward(w_idx, v_idx):
    kernel = _make_kernel(w_idx, v_idx)

    def forward(w_slab, v_slab, emb, x, mask):
        """x: (SEQ, BATCH, d_input) seq-first; mask: (BATCH, SEQ), True = valid."""
        S, B, R = SEQ, BATCH, ROWS
        x_flat = jnp.transpose(x, (1, 0, 2)).reshape(R, D_INPUT).astype(jnp.float32)

        # Block-diagonal additive biases so both batches run as one 16-row slab.
        batch_id = jnp.repeat(jnp.arange(B), S)                      # (R,)
        same_batch = batch_id[:, None] == batch_id[None, :]          # (R, R)
        key_bias = jnp.where(mask.reshape(R), 0.0, NEG_INF)          # key padding
        enc_bias = jnp.where(same_batch, key_bias[None, :], NEG_INF).astype(jnp.float32)

        seed_key = (jnp.arange(R) % S) < N_SEEDS                     # seed rows only
        seed_bias = jnp.where(seed_key, 0.0, NEG_INF)
        pool_bias = jnp.where(same_batch, seed_bias[None, :], NEG_INF).astype(jnp.float32)

        z_init = jnp.zeros((R, D_MODEL), jnp.float32)
        for b in range(B):
            z_init = z_init.at[b * S:b * S + N_SEEDS].set(emb)

        def vmem():
            return pl.BlockSpec(memory_space=pltpu.MemorySpace.VMEM)

        out = pl.pallas_call(
            kernel,
            out_shape=jax.ShapeDtypeStruct((R, 2 * D_OUTPUT), jnp.float32),
            in_specs=[vmem() for _ in range(6)],
            out_specs=vmem(),
        )(x_flat, enc_bias, pool_bias, z_init, w_slab, v_slab)

        out3 = out.reshape(B, S, 2 * D_OUTPUT)
        mu = out3[:, 0, :D_OUTPUT]               # seed token 0 per batch -> ff_mu
        logvar = out3[:, 1, D_OUTPUT:]           # seed token 1 per batch -> ff_var
        return mu, logvar

    return forward


# ------------------------------ parameter init --------------------------------
def _dense(key, din, dout, scale=0.05):
    kw, kb = jax.random.split(key)
    w = scale * jax.random.normal(kw, (din, dout), jnp.float32)
    b = scale * jax.random.normal(kb, (dout,), jnp.float32)
    return w, b


def _mha_params(key, d_model, d_source):
    ks = jax.random.split(key, 4)
    wq, bq = _dense(ks[0], d_model, d_model)
    wk, bk = _dense(ks[1], d_source, d_model)
    wv, bv = _dense(ks[2], d_source, d_model)
    wo, bo = _dense(ks[3], d_model, d_model)
    return dict(wq=wq, bq=bq, wk=wk, bk=bk, wv=wv, bv=bv, wo=wo, bo=bo)


def _layer_params(key, d_model, d_ff, d_source=None, src_attn=False):
    ks = jax.random.split(key, 4)
    p = {}
    p["self"] = _mha_params(ks[0], d_model, d_model)
    p["ln1_g"] = jnp.ones((d_model,), jnp.float32)
    p["ln1_b"] = jnp.zeros((d_model,), jnp.float32)
    if src_attn:
        p["src"] = _mha_params(ks[1], d_model, d_source)
        p["ln2_g"] = jnp.ones((d_model,), jnp.float32)
        p["ln2_b"] = jnp.zeros((d_model,), jnp.float32)
    p["ff_w1"], p["ff_b1"] = _dense(ks[2], d_model, d_ff)
    p["ff_w2"], p["ff_b2"] = _dense(ks[3], d_ff, d_model)
    p["ln3_g"] = jnp.ones((d_model,), jnp.float32)
    p["ln3_b"] = jnp.zeros((d_model,), jnp.float32)
    return p


def init_params(key):
    ks = jax.random.split(key, 8 + N_LAYERS + N_POOL_LAYERS)
    params = {}
    params["ff_in_w1"], params["ff_in_b1"] = _dense(ks[0], D_INPUT, D_FF)
    params["ff_in_w2"], params["ff_in_b2"] = _dense(ks[1], D_FF, D_MODEL)
    params["ff_mu_w"], params["ff_mu_b"] = _dense(ks[2], D_MODEL, D_OUTPUT)
    params["ff_var_w"], params["ff_var_b"] = _dense(ks[3], D_MODEL, D_OUTPUT)
    params["embeddings"] = jax.random.normal(ks[4], (2, 1, D_MODEL), jnp.float32)
    params["encoder_layers"] = [
        _layer_params(ks[5 + i], D_MODEL, D_FF) for i in range(N_LAYERS)
    ]
    params["pooling_layers"] = [
        _layer_params(ks[5 + N_LAYERS + i], D_MODEL, D_FF,
                      d_source=D_MODEL, src_attn=True)
        for i in range(N_POOL_LAYERS)
    ]
    return params


# ----------------------------------- main -------------------------------------
if __name__ == "__main__":
    key = jax.random.PRNGKey(0)
    k_param, k_x = jax.random.split(key)

    params = init_params(k_param)
    w_slab, v_slab, emb, w_idx, v_idx = pack_params(params)   # pack once, off the hot path

    # x: (S, B, d_input); mask: (B, S) with True = valid token
    x = jax.random.normal(k_x, (SEQ, BATCH, D_INPUT), jnp.float32)
    lengths = jnp.array([6, SEQ], dtype=jnp.int32)
    mask = jnp.arange(SEQ)[None, :] < lengths[:, None]        # (B, S) bool

    fwd = jax.jit(make_encoder_forward(w_idx, v_idx))
    mu, logvar = fwd(w_slab, v_slab, emb, x, mask)
    jax.block_until_ready((mu, logvar))

    assert mu.shape == (BATCH, D_OUTPUT)
    assert logvar.shape == (BATCH, D_OUTPUT)
    assert bool(jnp.all(jnp.isfinite(mu))) and bool(jnp.all(jnp.isfinite(logvar)))
    print("KERNEL_OK")
</pallas_src>

<mosaic_0001>
module attributes {stable_mosaic.version = 11 : i64} {
  func.func @kernel(%arg0: memref<16x16xf32, #tpu.memory_space<vmem>>, %arg1: memref<16x16xf32, #tpu.memory_space<vmem>>, %arg2: memref<16x16xf32, #tpu.memory_space<vmem>>, %arg3: memref<16x32xf32, #tpu.memory_space<vmem>>, %arg4: memref<656x128xf32, #tpu.memory_space<vmem>>, %arg5: memref<32x128xf32, #tpu.memory_space<vmem>>, %arg6: memref<16x32xf32, #tpu.memory_space<vmem>>) attributes {dimension_semantics = [], scalar_prefetch = 0 : i64, scratch_operands = 0 : i64, tpu.core_type = #tpu.core_type<tc>} {
    %c0 = arith.constant 0 : index
    %c0_0 = arith.constant 0 : index
    %0 = vector.load %arg1[%c0, %c0_0] : memref<16x16xf32, #tpu.memory_space<vmem>>, vector<16x16xf32>
    %c0_1 = arith.constant 0 : index
    %c0_2 = arith.constant 0 : index
    %1 = vector.load %arg2[%c0_1, %c0_2] : memref<16x16xf32, #tpu.memory_space<vmem>>, vector<16x16xf32>
    %c0_3 = arith.constant 0 : index
    %c0_4 = arith.constant 0 : index
    %2 = vector.load %arg0[%c0_3, %c0_4] : memref<16x16xf32, #tpu.memory_space<vmem>>, vector<16x16xf32>
    %c0_5 = arith.constant 0 : index
    %c0_6 = arith.constant 0 : index
    %3 = vector.load %arg4[%c0_5, %c0_6] : memref<656x128xf32, #tpu.memory_space<vmem>>, vector<16x64xf32>
    %c0_7 = arith.constant 0 : index
    %c0_8 = arith.constant 0 : index
    %4 = vector.load %arg5[%c0_7, %c0_8] : memref<32x128xf32, #tpu.memory_space<vmem>>, vector<1x64xf32>
    %cst = arith.constant dense<0.000000e+00> : vector<16x64xf32>
    %5 = tpu.matmul %2, %3, %cst {dimension_numbers = #tpu.dot_dimension_numbers<[1], [0], [0], [1], [0, 0, 1, 1], [], []>} : vector<16x16xf32>, vector<16x64xf32>, vector<16x64xf32> -> vector<16x64xf32>
    %6 = vector.broadcast %4 : vector<1x64xf32> to vector<16x64xf32>
    %7 = arith.addf %5, %6 : vector<16x64xf32>
    %cst_9 = arith.constant 0.000000e+00 : f32
    %8 = vector.broadcast %cst_9 : f32 to vector<16x64xf32>
    %9 = arith.cmpf ogt, %7, %8 : vector<16x64xf32>
    %cst_10 = arith.constant 0.00999999977 : f32
    %10 = vector.broadcast %cst_10 : f32 to vector<16x64xf32>
    %11 = arith.mulf %10, %7 : vector<16x64xf32>
    %12 = arith.select %9, %7, %11 : vector<16x64xi1>, vector<16x64xf32>
    %c16 = arith.constant 16 : index
    %c0_11 = arith.constant 0 : index
    %13 = vector.load %arg4[%c16, %c0_11] : memref<656x128xf32, #tpu.memory_space<vmem>>, vector<64x32xf32>
    %c1 = arith.constant 1 : index
    %c0_12 = arith.constant 0 : index
    %14 = vector.load %arg5[%c1, %c0_12] : memref<32x128xf32, #tpu.memory_space<vmem>>, vector<1x32xf32>
    %cst_13 = arith.constant dense<0.000000e+00> : vector<16x32xf32>
    %15 = tpu.matmul %12, %13, %cst_13 {dimension_numbers = #tpu.dot_dimension_numbers<[1], [0], [0], [1], [0, 0, 1, 1], [], []>} : vector<16x64xf32>, vector<64x32xf32>, vector<16x32xf32> -> vector<16x32xf32>
    %16 = vector.broadcast %14 : vector<1x32xf32> to vector<16x32xf32>
    %17 = arith.addf %15, %16 : vector<16x32xf32>
    %c80 = arith.constant 80 : index
    %c0_14 = arith.constant 0 : index
    %18 = vector.load %arg4[%c80, %c0_14] : memref<656x128xf32, #tpu.memory_space<vmem>>, vector<32x96xf32>
    %c2 = arith.constant 2 : index
    %c0_15 = arith.constant 0 : index
    %19 = vector.load %arg5[%c2, %c0_15] : memref<32x128xf32, #tpu.memory_space<vmem>>, vector<1x96xf32>
    %c112 = arith.constant 112 : index
    %c0_16 = arith.constant 0 : index
    %20 = vector.load %arg4[%c112, %c0_16] : memref<656x128xf32, #tpu.memory_space<vmem>>, vector<32x32xf32>
    %c3 = arith.constant 3 : index
    %c0_17 = arith.constant 0 : index
    %21 = vector.load %arg5[%c3, %c0_17] : memref<32x128xf32, #tpu.memory_space<vmem>>, vector<1x32xf32>
    %cst_18 = arith.constant dense<0.000000e+00> : vector<16x96xf32>
    %22 = tpu.matmul %17, %18, %cst_18 {dimension_numbers = #tpu.dot_dimension_numbers<[1], [0], [0], [1], [0, 0, 1, 1], [], []>} : vector<16x32xf32>, vector<32x96xf32>, vector<16x96xf32> -> vector<16x96xf32>
    %23 = vector.broadcast %19 : vector<1x96xf32> to vector<16x96xf32>
    %24 = arith.addf %22, %23 : vector<16x96xf32>
    %25 = vector.extract_strided_slice %24 {offsets = [0, 0], sizes = [16, 32], strides = [1, 1]} : vector<16x96xf32> to vector<16x32xf32>
    %26 = vector.extract_strided_slice %24 {offsets = [0, 32], sizes = [16, 32], strides = [1, 1]} : vector<16x96xf32> to vector<16x32xf32>
    %27 = vector.extract_strided_slice %24 {offsets = [0, 64], sizes = [16, 32], strides = [1, 1]} : vector<16x96xf32> to vector<16x32xf32>
    %28 = vector.extract_strided_slice %25 {offsets = [0, 0], sizes = [16, 8], strides = [1, 1]} : vector<16x32xf32> to vector<16x8xf32>
    %29 = vector.extract_strided_slice %26 {offsets = [0, 0], sizes = [16, 8], strides = [1, 1]} : vector<16x32xf32> to vector<16x8xf32>
    %30 = vector.extract_strided_slice %27 {offsets = [0, 0], sizes = [16, 8], strides = [1, 1]} : vector<16x32xf32> to vector<16x8xf32>
    %cst_19 = arith.constant dense<0.000000e+00> : vector<16x16xf32>
    %31 = tpu.matmul %28, %29, %cst_19 {dimension_numbers = #tpu.dot_dimension_numbers<[1], [1], [0], [0], [0, 0, 1, 0], [], []>} : vector<16x8xf32>, vector<16x8xf32>, vector<16x16xf32> -> vector<16x16xf32>
    %cst_20 = arith.constant 0.353553385 : f32
    %32 = vector.broadcast %cst_20 : f32 to vector<16x16xf32>
    %33 = arith.mulf %31, %32 : vector<16x16xf32>
    %34 = arith.addf %33, %0 : vector<16x16xf32>
    %cst_21 = arith.constant dense<0xFF800000> : vector<16xf32>
    %35 = vector.multi_reduction <maximumf>, %34, %cst_21 [1] : vector<16x16xf32> to vector<16xf32>
    %36 = vector.shape_cast %35 : vector<16xf32> to vector<16x1xf32>
    %37 = vector.broadcast %36 : vector<16x1xf32> to vector<16x16xf32>
    %38 = arith.subf %34, %37 : vector<16x16xf32>
    %39 = math.exp %38 : vector<16x16xf32>
    %cst_22 = arith.constant dense<0.000000e+00> : vector<16xf32>
    %40 = vector.multi_reduction <add>, %39, %cst_22 [1] : vector<16x16xf32> to vector<16xf32>
    %41 = vector.shape_cast %40 : vector<16xf32> to vector<16x1xf32>
    %42 = tpu.reciprocal %41 {approx = true} : vector<16x1xf32> -> vector<16x1xf32>
    %43 = vector.broadcast %42 : vector<16x1xf32> to vector<16x16xf32>
    %44 = arith.mulf %39, %43 : vector<16x16xf32>
    %cst_23 = arith.constant dense<0.000000e+00> : vector<16x8xf32>
    %45 = tpu.matmul %44, %30, %cst_23 {dimension_numbers = #tpu.dot_dimension_numbers<[1], [0], [0], [1], [0, 0, 1, 1], [], []>} : vector<16x16xf32>, vector<16x8xf32>, vector<16x8xf32> -> vector<16x8xf32>
    %46 = vector.extract_strided_slice %25 {offsets = [0, 8], sizes = [16, 8], strides = [1, 1]} : vector<16x32xf32> to vector<16x8xf32>
    %47 = vector.extract_strided_slice %26 {offsets = [0, 8], sizes = [16, 8], strides = [1, 1]} : vector<16x32xf32> to vector<16x8xf32>
    %48 = vector.extract_strided_slice %27 {offsets = [0, 8], sizes = [16, 8], strides = [1, 1]} : vector<16x32xf32> to vector<16x8xf32>
    %cst_24 = arith.constant dense<0.000000e+00> : vector<16x16xf32>
    %49 = tpu.matmul %46, %47, %cst_24 {dimension_numbers = #tpu.dot_dimension_numbers<[1], [1], [0], [0], [0, 0, 1, 0], [], []>} : vector<16x8xf32>, vector<16x8xf32>, vector<16x16xf32> -> vector<16x16xf32>
    %cst_25 = arith.constant 0.353553385 : f32
    %50 = vector.broadcast %cst_25 : f32 to vector<16x16xf32>
    %51 = arith.mulf %49, %50 : vector<16x16xf32>
    %52 = arith.addf %51, %0 : vector<16x16xf32>
    %cst_26 = arith.constant dense<0xFF800000> : vector<16xf32>
    %53 = vector.multi_reduction <maximumf>, %52, %cst_26 [1] : vector<16x16xf32> to vector<16xf32>
    %54 = vector.shape_cast %53 : vector<16xf32> to vector<16x1xf32>
    %55 = vector.broadcast %54 : vector<16x1xf32> to vector<16x16xf32>
    %56 = arith.subf %52, %55 : vector<16x16xf32>
    %57 = math.exp %56 : vector<16x16xf32>
    %cst_27 = arith.constant dense<0.000000e+00> : vector<16xf32>
    %58 = vector.multi_reduction <add>, %57, %cst_27 [1] : vector<16x16xf32> to vector<16xf32>
    %59 = vector.shape_cast %58 : vector<16xf32> to vector<16x1xf32>
    %60 = tpu.reciprocal %59 {approx = true} : vector<16x1xf32> -> vector<16x1xf32>
    %61 = vector.broadcast %60 : vector<16x1xf32> to vector<16x16xf32>
    %62 = arith.mulf %57, %61 : vector<16x16xf32>
    %cst_28 = arith.constant dense<0.000000e+00> : vector<16x8xf32>
    %63 = tpu.matmul %62, %48, %cst_28 {dimension_numbers = #tpu.dot_dimension_numbers<[1], [0], [0], [1], [0, 0, 1, 1], [], []>} : vector<16x16xf32>, vector<16x8xf32>, vector<16x8xf32> -> vector<16x8xf32>
    %64 = vector.extract_strided_slice %25 {offsets = [0, 16], sizes = [16, 8], strides = [1, 1]} : vector<16x32xf32> to vector<16x8xf32>
    %65 = vector.extract_strided_slice %26 {offsets = [0, 16], sizes = [16, 8], strides = [1, 1]} : vector<16x32xf32> to vector<16x8xf32>
    %66 = vector.extract_strided_slice %27 {offsets = [0, 16], sizes = [16, 8], strides = [1, 1]} : vector<16x32xf32> to vector<16x8xf32>
    %cst_29 = arith.constant dense<0.000000e+00> : vector<16x16xf32>
    %67 = tpu.matmul %64, %65, %cst_29 {dimension_numbers = #tpu.dot_dimension_numbers<[1], [1], [0], [0], [0, 0, 1, 0], [], []>} : vector<16x8xf32>, vector<16x8xf32>, vector<16x16xf32> -> vector<16x16xf32>
    %cst_30 = arith.constant 0.353553385 : f32
    %68 = vector.broadcast %cst_30 : f32 to vector<16x16xf32>
    %69 = arith.mulf %67, %68 : vector<16x16xf32>
    %70 = arith.addf %69, %0 : vector<16x16xf32>
    %cst_31 = arith.constant dense<0xFF800000> : vector<16xf32>
    %71 = vector.multi_reduction <maximumf>, %70, %cst_31 [1] : vector<16x16xf32> to vector<16xf32>
    %72 = vector.shape_cast %71 : vector<16xf32> to vector<16x1xf32>
    %73 = vector.broadcast %72 : vector<16x1xf32> to vector<16x16xf32>
    %74 = arith.subf %70, %73 : vector<16x16xf32>
    %75 = math.exp %74 : vector<16x16xf32>
    %cst_32 = arith.constant dense<0.000000e+00> : vector<16xf32>
    %76 = vector.multi_reduction <add>, %75, %cst_32 [1] : vector<16x16xf32> to vector<16xf32>
    %77 = vector.shape_cast %76 : vector<16xf32> to vector<16x1xf32>
    %78 = tpu.reciprocal %77 {approx = true} : vector<16x1xf32> -> vector<16x1xf32>
    %79 = vector.broadcast %78 : vector<16x1xf32> to vector<16x16xf32>
    %80 = arith.mulf %75, %79 : vector<16x16xf32>
    %cst_33 = arith.constant dense<0.000000e+00> : vector<16x8xf32>
    %81 = tpu.matmul %80, %66, %cst_33 {dimension_numbers = #tpu.dot_dimension_numbers<[1], [0], [0], [1], [0, 0, 1, 1], [], []>} : vector<16x16xf32>, vector<16x8xf32>, vector<16x8xf32> -> vector<16x8xf32>
    %82 = vector.extract_strided_slice %25 {offsets = [0, 24], sizes = [16, 8], strides = [1, 1]} : vector<16x32xf32> to vector<16x8xf32>
    %83 = vector.extract_strided_slice %26 {offsets = [0, 24], sizes = [16, 8], strides = [1, 1]} : vector<16x32xf32> to vector<16x8xf32>
    %84 = vector.extract_strided_slice %27 {offsets = [0, 24], sizes = [16, 8], strides = [1, 1]} : vector<16x32xf32> to vector<16x8xf32>
    %cst_34 = arith.constant dense<0.000000e+00> : vector<16x16xf32>
    %85 = tpu.matmul %82, %83, %cst_34 {dimension_numbers = #tpu.dot_dimension_numbers<[1], [1], [0], [0], [0, 0, 1, 0], [], []>} : vector<16x8xf32>, vector<16x8xf32>, vector<16x16xf32> -> vector<16x16xf32>
    %cst_35 = arith.constant 0.353553385 : f32
    %86 = vector.broadcast %cst_35 : f32 to vector<16x16xf32>
    %87 = arith.mulf %85, %86 : vector<16x16xf32>
    %88 = arith.addf %87, %0 : vector<16x16xf32>
    %cst_36 = arith.constant dense<0xFF800000> : vector<16xf32>
    %89 = vector.multi_reduction <maximumf>, %88, %cst_36 [1] : vector<16x16xf32> to vector<16xf32>
    %90 = vector.shape_cast %89 : vector<16xf32> to vector<16x1xf32>
    %91 = vector.broadcast %90 : vector<16x1xf32> to vector<16x16xf32>
    %92 = arith.subf %88, %91 : vector<16x16xf32>
    %93 = math.exp %92 : vector<16x16xf32>
    %cst_37 = arith.constant dense<0.000000e+00> : vector<16xf32>
    %94 = vector.multi_reduction <add>, %93, %cst_37 [1] : vector<16x16xf32> to vector<16xf32>
    %95 = vector.shape_cast %94 : vector<16xf32> to vector<16x1xf32>
    %96 = tpu.reciprocal %95 {approx = true} : vector<16x1xf32> -> vector<16x1xf32>
    %97 = vector.broadcast %96 : vector<16x1xf32> to vector<16x16xf32>
    %98 = arith.mulf %93, %97 : vector<16x16xf32>
    %cst_38 = arith.constant dense<0.000000e+00> : vector<16x8xf32>
    %99 = tpu.matmul %98, %84, %cst_38 {dimension_numbers = #tpu.dot_dimension_numbers<[1], [0], [0], [1], [0, 0, 1, 1], [], []>} : vector<16x16xf32>, vector<16x8xf32>, vector<16x8xf32> -> vector<16x8xf32>
    %100 = tpu.concatenate %45, %63, %81, %99 in 1 : vector<16x8xf32>, vector<16x8xf32>, vector<16x8xf32>, vector<16x8xf32> -> vector<16x32xf32>
    %cst_39 = arith.constant dense<0.000000e+00> : vector<16x32xf32>
    %101 = tpu.matmul %100, %20, %cst_39 {dimension_numbers = #tpu.dot_dimension_numbers<[1], [0], [0], [1], [0, 0, 1, 1], [], []>} : vector<16x32xf32>, vector<32x32xf32>, vector<16x32xf32> -> vector<16x32xf32>
    %102 = vector.broadcast %21 : vector<1x32xf32> to vector<16x32xf32>
    %103 = arith.addf %101, %102 : vector<16x32xf32>
    %104 = arith.addf %17, %103 : vector<16x32xf32>
    %c4 = arith.constant 4 : index
    %c0_40 = arith.constant 0 : index
    %105 = vector.load %arg5[%c4, %c0_40] : memref<32x128xf32, #tpu.memory_space<vmem>>, vector<1x32xf32>
    %c5 = arith.constant 5 : index
    %c0_41 = arith.constant 0 : index
    %106 = vector.load %arg5[%c5, %c0_41] : memref<32x128xf32, #tpu.memory_space<vmem>>, vector<1x32xf32>
    %cst_42 = arith.constant dense<0.000000e+00> : vector<16xf32>
    %107 = vector.multi_reduction <add>, %104, %cst_42 [1] : vector<16x32xf32> to vector<16xf32>
    %108 = vector.shape_cast %107 : vector<16xf32> to vector<16x1xf32>
    %cst_43 = arith.constant 3.200000e+01 : f32
    %109 = vector.broadcast %cst_43 : f32 to vector<16x1xf32>
    %110 = arith.divf %108, %109 : vector<16x1xf32>
    %111 = vector.broadcast %110 : vector<16x1xf32> to vector<16x32xf32>
    %112 = arith.subf %104, %111 : vector<16x32xf32>
    %113 = arith.mulf %112, %112 : vector<16x32xf32>
    %cst_44 = arith.constant dense<0.000000e+00> : vector<16xf32>
    %114 = vector.multi_reduction <add>, %113, %cst_44 [1] : vector<16x32xf32> to vector<16xf32>
    %115 = vector.shape_cast %114 : vector<16xf32> to vector<16x1xf32>
    %cst_45 = arith.constant 3.200000e+01 : f32
    %116 = vector.broadcast %cst_45 : f32 to vector<16x1xf32>
    %117 = arith.divf %115, %116 : vector<16x1xf32>
    %cst_46 = arith.constant 9.99999974E-6 : f32
    %118 = vector.broadcast %cst_46 : f32 to vector<16x1xf32>
    %119 = arith.addf %117, %118 : vector<16x1xf32>
    %120 = math.rsqrt %119 : vector<16x1xf32>
    %121 = vector.broadcast %120 : vector<16x1xf32> to vector<16x32xf32>
    %122 = arith.mulf %112, %121 : vector<16x32xf32>
    %123 = vector.broadcast %105 : vector<1x32xf32> to vector<16x32xf32>
    %124 = arith.mulf %122, %123 : vector<16x32xf32>
    %125 = vector.broadcast %106 : vector<1x32xf32> to vector<16x32xf32>
    %126 = arith.addf %124, %125 : vector<16x32xf32>
    %c144 = arith.constant 144 : index
    %c0_47 = arith.constant 0 : index
    %127 = vector.load %arg4[%c144, %c0_47] : memref<656x128xf32, #tpu.memory_space<vmem>>, vector<32x64xf32>
    %c6 = arith.constant 6 : index
    %c0_48 = arith.constant 0 : index
    %128 = vector.load %arg5[%c6, %c0_48] : memref<32x128xf32, #tpu.memory_space<vmem>>, vector<1x64xf32>
    %cst_49 = arith.constant dense<0.000000e+00> : vector<16x64xf32>
    %129 = tpu.matmul %126, %127, %cst_49 {dimension_numbers = #tpu.dot_dimension_numbers<[1], [0], [0], [1], [0, 0, 1, 1], [], []>} : vector<16x32xf32>, vector<32x64xf32>, vector<16x64xf32> -> vector<16x64xf32>
    %130 = vector.broadcast %128 : vector<1x64xf32> to vector<16x64xf32>
    %131 = arith.addf %129, %130 : vector<16x64xf32>
    %cst_50 = arith.constant 0.000000e+00 : f32
    %132 = vector.broadcast %cst_50 : f32 to vector<16x64xf32>
    %133 = arith.maximumf %131, %132 : vector<16x64xf32>
    %c176 = arith.constant 176 : index
    %c0_51 = arith.constant 0 : index
    %134 = vector.load %arg4[%c176, %c0_51] : memref<656x128xf32, #tpu.memory_space<vmem>>, vector<64x32xf32>
    %c7 = arith.constant 7 : index
    %c0_52 = arith.constant 0 : index
    %135 = vector.load %arg5[%c7, %c0_52] : memref<32x128xf32, #tpu.memory_space<vmem>>, vector<1x32xf32>
    %cst_53 = arith.constant dense<0.000000e+00> : vector<16x32xf32>
    %136 = tpu.matmul %133, %134, %cst_53 {dimension_numbers = #tpu.dot_dimension_numbers<[1], [0], [0], [1], [0, 0, 1, 1], [], []>} : vector<16x64xf32>, vector<64x32xf32>, vector<16x32xf32> -> vector<16x32xf32>
    %137 = vector.broadcast %135 : vector<1x32xf32> to vector<16x32xf32>
    %138 = arith.addf %136, %137 : vector<16x32xf32>
    %139 = arith.addf %126, %138 : vector<16x32xf32>
    %c8 = arith.constant 8 : index
    %c0_54 = arith.constant 0 : index
    %140 = vector.load %arg5[%c8, %c0_54] : memref<32x128xf32, #tpu.memory_space<vmem>>, vector<1x32xf32>
    %c9 = arith.constant 9 : index
    %c0_55 = arith.constant 0 : index
    %141 = vector.load %arg5[%c9, %c0_55] : memref<32x128xf32, #tpu.memory_space<vmem>>, vector<1x32xf32>
    %cst_56 = arith.constant dense<0.000000e+00> : vector<16xf32>
    %142 = vector.multi_reduction <add>, %139, %cst_56 [1] : vector<16x32xf32> to vector<16xf32>
    %143 = vector.shape_cast %142 : vector<16xf32> to vector<16x1xf32>
    %cst_57 = arith.constant 3.200000e+01 : f32
    %144 = vector.broadcast %cst_57 : f32 to vector<16x1xf32>
    %145 = arith.divf %143, %144 : vector<16x1xf32>
    %146 = vector.broadcast %145 : vector<16x1xf32> to vector<16x32xf32>
    %147 = arith.subf %139, %146 : vector<16x32xf32>
    %148 = arith.mulf %147, %147 : vector<16x32xf32>
    %cst_58 = arith.constant dense<0.000000e+00> : vector<16xf32>
    %149 = vector.multi_reduction <add>, %148, %cst_58 [1] : vector<16x32xf32> to vector<16xf32>
    %150 = vector.shape_cast %149 : vector<16xf32> to vector<16x1xf32>
    %cst_59 = arith.constant 3.200000e+01 : f32
    %151 = vector.broadcast %cst_59 : f32 to vector<16x1xf32>
    %152 = arith.divf %150, %151 : vector<16x1xf32>
    %cst_60 = arith.constant 9.99999974E-6 : f32
    %153 = vector.broadcast %cst_60 : f32 to vector<16x1xf32>
    %154 = arith.addf %152, %153 : vector<16x1xf32>
    %155 = math.rsqrt %154 : vector<16x1xf32>
    %156 = vector.broadcast %155 : vector<16x1xf32> to vector<16x32xf32>
    %157 = arith.mulf %147, %156 : vector<16x32xf32>
    %158 = vector.broadcast %140 : vector<1x32xf32> to vector<16x32xf32>
    %159 = arith.mulf %157, %158 : vector<16x32xf32>
    %160 = vector.broadcast %141 : vector<1x32xf32> to vector<16x32xf32>
    %161 = arith.addf %159, %160 : vector<16x32xf32>
    %c240 = arith.constant 240 : index
    %c0_61 = arith.constant 0 : index
    %162 = vector.load %arg4[%c240, %c0_61] : memref<656x128xf32, #tpu.memory_space<vmem>>, vector<32x96xf32>
    %c10 = arith.constant 10 : index
    %c0_62 = arith.constant 0 : index
    %163 = vector.load %arg5[%c10, %c0_62] : memref<32x128xf32, #tpu.memory_space<vmem>>, vector<1x96xf32>
    %c272 = arith.constant 272 : index
    %c0_63 = arith.constant 0 : index
    %164 = vector.load %arg4[%c272, %c0_63] : memref<656x128xf32, #tpu.memory_space<vmem>>, vector<32x32xf32>
    %c11 = arith.constant 11 : index
    %c0_64 = arith.constant 0 : index
    %165 = vector.load %arg5[%c11, %c0_64] : memref<32x128xf32, #tpu.memory_space<vmem>>, vector<1x32xf32>
    %cst_65 = arith.constant dense<0.000000e+00> : vector<16x96xf32>
    %166 = tpu.matmul %161, %162, %cst_65 {dimension_numbers = #tpu.dot_dimension_numbers<[1], [0], [0], [1], [0, 0, 1, 1], [], []>} : vector<16x32xf32>, vector<32x96xf32>, vector<16x96xf32> -> vector<16x96xf32>
    %167 = vector.broadcast %163 : vector<1x96xf32> to vector<16x96xf32>
    %168 = arith.addf %166, %167 : vector<16x96xf32>
    %169 = vector.extract_strided_slice %168 {offsets = [0, 0], sizes = [16, 32], strides = [1, 1]} : vector<16x96xf32> to vector<16x32xf32>
    %170 = vector.extract_strided_slice %168 {offsets = [0, 32], sizes = [16, 32], strides = [1, 1]} : vector<16x96xf32> to vector<16x32xf32>
    %171 = vector.extract_strided_slice %168 {offsets = [0, 64], sizes = [16, 32], strides = [1, 1]} : vector<16x96xf32> to vector<16x32xf32>
    %172 = vector.extract_strided_slice %169 {offsets = [0, 0], sizes = [16, 8], strides = [1, 1]} : vector<16x32xf32> to vector<16x8xf32>
    %173 = vector.extract_strided_slice %170 {offsets = [0, 0], sizes = [16, 8], strides = [1, 1]} : vector<16x32xf32> to vector<16x8xf32>
    %174 = vector.extract_strided_slice %171 {offsets = [0, 0], sizes = [16, 8], strides = [1, 1]} : vector<16x32xf32> to vector<16x8xf32>
    %cst_66 = arith.constant dense<0.000000e+00> : vector<16x16xf32>
    %175 = tpu.matmul %172, %173, %cst_66 {dimension_numbers = #tpu.dot_dimension_numbers<[1], [1], [0], [0], [0, 0, 1, 0], [], []>} : vector<16x8xf32>, vector<16x8xf32>, vector<16x16xf32> -> vector<16x16xf32>
    %cst_67 = arith.constant 0.353553385 : f32
    %176 = vector.broadcast %cst_67 : f32 to vector<16x16xf32>
    %177 = arith.mulf %175, %176 : vector<16x16xf32>
    %178 = arith.addf %177, %0 : vector<16x16xf32>
    %cst_68 = arith.constant dense<0xFF800000> : vector<16xf32>
    %179 = vector.multi_reduction <maximumf>, %178, %cst_68 [1] : vector<16x16xf32> to vector<16xf32>
    %180 = vector.shape_cast %179 : vector<16xf32> to vector<16x1xf32>
    %181 = vector.broadcast %180 : vector<16x1xf32> to vector<16x16xf32>
    %182 = arith.subf %178, %181 : vector<16x16xf32>
    %183 = math.exp %182 : vector<16x16xf32>
    %cst_69 = arith.constant dense<0.000000e+00> : vector<16xf32>
    %184 = vector.multi_reduction <add>, %183, %cst_69 [1] : vector<16x16xf32> to vector<16xf32>
    %185 = vector.shape_cast %184 : vector<16xf32> to vector<16x1xf32>
    %186 = tpu.reciprocal %185 {approx = true} : vector<16x1xf32> -> vector<16x1xf32>
    %187 = vector.broadcast %186 : vector<16x1xf32> to vector<16x16xf32>
    %188 = arith.mulf %183, %187 : vector<16x16xf32>
    %cst_70 = arith.constant dense<0.000000e+00> : vector<16x8xf32>
    %189 = tpu.matmul %188, %174, %cst_70 {dimension_numbers = #tpu.dot_dimension_numbers<[1], [0], [0], [1], [0, 0, 1, 1], [], []>} : vector<16x16xf32>, vector<16x8xf32>, vector<16x8xf32> -> vector<16x8xf32>
    %190 = vector.extract_strided_slice %169 {offsets = [0, 8], sizes = [16, 8], strides = [1, 1]} : vector<16x32xf32> to vector<16x8xf32>
    %191 = vector.extract_strided_slice %170 {offsets = [0, 8], sizes = [16, 8], strides = [1, 1]} : vector<16x32xf32> to vector<16x8xf32>
    %192 = vector.extract_strided_slice %171 {offsets = [0, 8], sizes = [16, 8], strides = [1, 1]} : vector<16x32xf32> to vector<16x8xf32>
    %cst_71 = arith.constant dense<0.000000e+00> : vector<16x16xf32>
    %193 = tpu.matmul %190, %191, %cst_71 {dimension_numbers = #tpu.dot_dimension_numbers<[1], [1], [0], [0], [0, 0, 1, 0], [], []>} : vector<16x8xf32>, vector<16x8xf32>, vector<16x16xf32> -> vector<16x16xf32>
    %cst_72 = arith.constant 0.353553385 : f32
    %194 = vector.broadcast %cst_72 : f32 to vector<16x16xf32>
    %195 = arith.mulf %193, %194 : vector<16x16xf32>
    %196 = arith.addf %195, %0 : vector<16x16xf32>
    %cst_73 = arith.constant dense<0xFF800000> : vector<16xf32>
    %197 = vector.multi_reduction <maximumf>, %196, %cst_73 [1] : vector<16x16xf32> to vector<16xf32>
    %198 = vector.shape_cast %197 : vector<16xf32> to vector<16x1xf32>
    %199 = vector.broadcast %198 : vector<16x1xf32> to vector<16x16xf32>
    %200 = arith.subf %196, %199 : vector<16x16xf32>
    %201 = math.exp %200 : vector<16x16xf32>
    %cst_74 = arith.constant dense<0.000000e+00> : vector<16xf32>
    %202 = vector.multi_reduction <add>, %201, %cst_74 [1] : vector<16x16xf32> to vector<16xf32>
    %203 = vector.shape_cast %202 : vector<16xf32> to vector<16x1xf32>
    %204 = tpu.reciprocal %203 {approx = true} : vector<16x1xf32> -> vector<16x1xf32>
    %205 = vector.broadcast %204 : vector<16x1xf32> to vector<16x16xf32>
    %206 = arith.mulf %201, %205 : vector<16x16xf32>
    %cst_75 = arith.constant dense<0.000000e+00> : vector<16x8xf32>
    %207 = tpu.matmul %206, %192, %cst_75 {dimension_numbers = #tpu.dot_dimension_numbers<[1], [0], [0], [1], [0, 0, 1, 1], [], []>} : vector<16x16xf32>, vector<16x8xf32>, vector<16x8xf32> -> vector<16x8xf32>
    %208 = vector.extract_strided_slice %169 {offsets = [0, 16], sizes = [16, 8], strides = [1, 1]} : vector<16x32xf32> to vector<16x8xf32>
    %209 = vector.extract_strided_slice %170 {offsets = [0, 16], sizes = [16, 8], strides = [1, 1]} : vector<16x32xf32> to vector<16x8xf32>
    %210 = vector.extract_strided_slice %171 {offsets = [0, 16], sizes = [16, 8], strides = [1, 1]} : vector<16x32xf32> to vector<16x8xf32>
    %cst_76 = arith.constant dense<0.000000e+00> : vector<16x16xf32>
    %211 = tpu.matmul %208, %209, %cst_76 {dimension_numbers = #tpu.dot_dimension_numbers<[1], [1], [0], [0], [0, 0, 1, 0], [], []>} : vector<16x8xf32>, vector<16x8xf32>, vector<16x16xf32> -> vector<16x16xf32>
    %cst_77 = arith.constant 0.353553385 : f32
    %212 = vector.broadcast %cst_77 : f32 to vector<16x16xf32>
    %213 = arith.mulf %211, %212 : vector<16x16xf32>
    %214 = arith.addf %213, %0 : vector<16x16xf32>
    %cst_78 = arith.constant dense<0xFF800000> : vector<16xf32>
    %215 = vector.multi_reduction <maximumf>, %214, %cst_78 [1] : vector<16x16xf32> to vector<16xf32>
    %216 = vector.shape_cast %215 : vector<16xf32> to vector<16x1xf32>
    %217 = vector.broadcast %216 : vector<16x1xf32> to vector<16x16xf32>
    %218 = arith.subf %214, %217 : vector<16x16xf32>
    %219 = math.exp %218 : vector<16x16xf32>
    %cst_79 = arith.constant dense<0.000000e+00> : vector<16xf32>
    %220 = vector.multi_reduction <add>, %219, %cst_79 [1] : vector<16x16xf32> to vector<16xf32>
    %221 = vector.shape_cast %220 : vector<16xf32> to vector<16x1xf32>
    %222 = tpu.reciprocal %221 {approx = true} : vector<16x1xf32> -> vector<16x1xf32>
    %223 = vector.broadcast %222 : vector<16x1xf32> to vector<16x16xf32>
    %224 = arith.mulf %219, %223 : vector<16x16xf32>
    %cst_80 = arith.constant dense<0.000000e+00> : vector<16x8xf32>
    %225 = tpu.matmul %224, %210, %cst_80 {dimension_numbers = #tpu.dot_dimension_numbers<[1], [0], [0], [1], [0, 0, 1, 1], [], []>} : vector<16x16xf32>, vector<16x8xf32>, vector<16x8xf32> -> vector<16x8xf32>
    %226 = vector.extract_strided_slice %169 {offsets = [0, 24], sizes = [16, 8], strides = [1, 1]} : vector<16x32xf32> to vector<16x8xf32>
    %227 = vector.extract_strided_slice %170 {offsets = [0, 24], sizes = [16, 8], strides = [1, 1]} : vector<16x32xf32> to vector<16x8xf32>
    %228 = vector.extract_strided_slice %171 {offsets = [0, 24], sizes = [16, 8], strides = [1, 1]} : vector<16x32xf32> to vector<16x8xf32>
    %cst_81 = arith.constant dense<0.000000e+00> : vector<16x16xf32>
    %229 = tpu.matmul %226, %227, %cst_81 {dimension_numbers = #tpu.dot_dimension_numbers<[1], [1], [0], [0], [0, 0, 1, 0], [], []>} : vector<16x8xf32>, vector<16x8xf32>, vector<16x16xf32> -> vector<16x16xf32>
    %cst_82 = arith.constant 0.353553385 : f32
    %230 = vector.broadcast %cst_82 : f32 to vector<16x16xf32>
    %231 = arith.mulf %229, %230 : vector<16x16xf32>
    %232 = arith.addf %231, %0 : vector<16x16xf32>
    %cst_83 = arith.constant dense<0xFF800000> : vector<16xf32>
    %233 = vector.multi_reduction <maximumf>, %232, %cst_83 [1] : vector<16x16xf32> to vector<16xf32>
    %234 = vector.shape_cast %233 : vector<16xf32> to vector<16x1xf32>
    %235 = vector.broadcast %234 : vector<16x1xf32> to vector<16x16xf32>
    %236 = arith.subf %232, %235 : vector<16x16xf32>
    %237 = math.exp %236 : vector<16x16xf32>
    %cst_84 = arith.constant dense<0.000000e+00> : vector<16xf32>
    %238 = vector.multi_reduction <add>, %237, %cst_84 [1] : vector<16x16xf32> to vector<16xf32>
    %239 = vector.shape_cast %238 : vector<16xf32> to vector<16x1xf32>
    %240 = tpu.reciprocal %239 {approx = true} : vector<16x1xf32> -> vector<16x1xf32>
    %241 = vector.broadcast %240 : vector<16x1xf32> to vector<16x16xf32>
    %242 = arith.mulf %237, %241 : vector<16x16xf32>
    %cst_85 = arith.constant dense<0.000000e+00> : vector<16x8xf32>
    %243 = tpu.matmul %242, %228, %cst_85 {dimension_numbers = #tpu.dot_dimension_numbers<[1], [0], [0], [1], [0, 0, 1, 1], [], []>} : vector<16x16xf32>, vector<16x8xf32>, vector<16x8xf32> -> vector<16x8xf32>
    %244 = tpu.concatenate %189, %207, %225, %243 in 1 : vector<16x8xf32>, vector<16x8xf32>, vector<16x8xf32>, vector<16x8xf32> -> vector<16x32xf32>
    %cst_86 = arith.constant dense<0.000000e+00> : vector<16x32xf32>
    %245 = tpu.matmul %244, %164, %cst_86 {dimension_numbers = #tpu.dot_dimension_numbers<[1], [0], [0], [1], [0, 0, 1, 1], [], []>} : vector<16x32xf32>, vector<32x32xf32>, vector<16x32xf32> -> vector<16x32xf32>
    %246 = vector.broadcast %165 : vector<1x32xf32> to vector<16x32xf32>
    %247 = arith.addf %245, %246 : vector<16x32xf32>
    %248 = arith.addf %161, %247 : vector<16x32xf32>
    %c12 = arith.constant 12 : index
    %c0_87 = arith.constant 0 : index
    %249 = vector.load %arg5[%c12, %c0_87] : memref<32x128xf32, #tpu.memory_space<vmem>>, vector<1x32xf32>
    %c13 = arith.constant 13 : index
    %c0_88 = arith.constant 0 : index
    %250 = vector.load %arg5[%c13, %c0_88] : memref<32x128xf32, #tpu.memory_space<vmem>>, vector<1x32xf32>
    %cst_89 = arith.constant dense<0.000000e+00> : vector<16xf32>
    %251 = vector.multi_reduction <add>, %248, %cst_89 [1] : vector<16x32xf32> to vector<16xf32>
    %252 = vector.shape_cast %251 : vector<16xf32> to vector<16x1xf32>
    %cst_90 = arith.constant 3.200000e+01 : f32
    %253 = vector.broadcast %cst_90 : f32 to vector<16x1xf32>
    %254 = arith.divf %252, %253 : vector<16x1xf32>
    %255 = vector.broadcast %254 : vector<16x1xf32> to vector<16x32xf32>
    %256 = arith.subf %248, %255 : vector<16x32xf32>
    %257 = arith.mulf %256, %256 : vector<16x32xf32>
    %cst_91 = arith.constant dense<0.000000e+00> : vector<16xf32>
    %258 = vector.multi_reduction <add>, %257, %cst_91 [1] : vector<16x32xf32> to vector<16xf32>
    %259 = vector.shape_cast %258 : vector<16xf32> to vector<16x1xf32>
    %cst_92 = arith.constant 3.200000e+01 : f32
    %260 = vector.broadcast %cst_92 : f32 to vector<16x1xf32>
    %261 = arith.divf %259, %260 : vector<16x1xf32>
    %cst_93 = arith.constant 9.99999974E-6 : f32
    %262 = vector.broadcast %cst_93 : f32 to vector<16x1xf32>
    %263 = arith.addf %261, %262 : vector<16x1xf32>
    %264 = math.rsqrt %263 : vector<16x1xf32>
    %265 = vector.broadcast %264 : vector<16x1xf32> to vector<16x32xf32>
    %266 = arith.mulf %256, %265 : vector<16x32xf32>
    %267 = vector.broadcast %249 : vector<1x32xf32> to vector<16x32xf32>
    %268 = arith.mulf %266, %267 : vector<16x32xf32>
    %269 = vector.broadcast %250 : vector<1x32xf32> to vector<16x32xf32>
    %270 = arith.addf %268, %269 : vector<16x32xf32>
    %c304 = arith.constant 304 : index
    %c0_94 = arith.constant 0 : index
    %271 = vector.load %arg4[%c304, %c0_94] : memref<656x128xf32, #tpu.memory_space<vmem>>, vector<32x64xf32>
    %c14 = arith.constant 14 : index
    %c0_95 = arith.constant 0 : index
    %272 = vector.load %arg5[%c14, %c0_95] : memref<32x128xf32, #tpu.memory_space<vmem>>, vector<1x64xf32>
    %cst_96 = arith.constant dense<0.000000e+00> : vector<16x64xf32>
    %273 = tpu.matmul %270, %271, %cst_96 {dimension_numbers = #tpu.dot_dimension_numbers<[1], [0], [0], [1], [0, 0, 1, 1], [], []>} : vector<16x32xf32>, vector<32x64xf32>, vector<16x64xf32> -> vector<16x64xf32>
    %274 = vector.broadcast %272 : vector<1x64xf32> to vector<16x64xf32>
    %275 = arith.addf %273, %274 : vector<16x64xf32>
    %cst_97 = arith.constant 0.000000e+00 : f32
    %276 = vector.broadcast %cst_97 : f32 to vector<16x64xf32>
    %277 = arith.maximumf %275, %276 : vector<16x64xf32>
    %c336 = arith.constant 336 : index
    %c0_98 = arith.constant 0 : index
    %278 = vector.load %arg4[%c336, %c0_98] : memref<656x128xf32, #tpu.memory_space<vmem>>, vector<64x32xf32>
    %c15 = arith.constant 15 : index
    %c0_99 = arith.constant 0 : index
    %279 = vector.load %arg5[%c15, %c0_99] : memref<32x128xf32, #tpu.memory_space<vmem>>, vector<1x32xf32>
    %cst_100 = arith.constant dense<0.000000e+00> : vector<16x32xf32>
    %280 = tpu.matmul %277, %278, %cst_100 {dimension_numbers = #tpu.dot_dimension_numbers<[1], [0], [0], [1], [0, 0, 1, 1], [], []>} : vector<16x64xf32>, vector<64x32xf32>, vector<16x32xf32> -> vector<16x32xf32>
    %281 = vector.broadcast %279 : vector<1x32xf32> to vector<16x32xf32>
    %282 = arith.addf %280, %281 : vector<16x32xf32>
    %283 = arith.addf %270, %282 : vector<16x32xf32>
    %c16_101 = arith.constant 16 : index
    %c0_102 = arith.constant 0 : index
    %284 = vector.load %arg5[%c16_101, %c0_102] : memref<32x128xf32, #tpu.memory_space<vmem>>, vector<1x32xf32>
    %c17 = arith.constant 17 : index
    %c0_103 = arith.constant 0 : index
    %285 = vector.load %arg5[%c17, %c0_103] : memref<32x128xf32, #tpu.memory_space<vmem>>, vector<1x32xf32>
    %cst_104 = arith.constant dense<0.000000e+00> : vector<16xf32>
    %286 = vector.multi_reduction <add>, %283, %cst_104 [1] : vector<16x32xf32> to vector<16xf32>
    %287 = vector.shape_cast %286 : vector<16xf32> to vector<16x1xf32>
    %cst_105 = arith.constant 3.200000e+01 : f32
    %288 = vector.broadcast %cst_105 : f32 to vector<16x1xf32>
    %289 = arith.divf %287, %288 : vector<16x1xf32>
    %290 = vector.broadcast %289 : vector<16x1xf32> to vector<16x32xf32>
    %291 = arith.subf %283, %290 : vector<16x32xf32>
    %292 = arith.mulf %291, %291 : vector<16x32xf32>
    %cst_106 = arith.constant dense<0.000000e+00> : vector<16xf32>
    %293 = vector.multi_reduction <add>, %292, %cst_106 [1] : vector<16x32xf32> to vector<16xf32>
    %294 = vector.shape_cast %293 : vector<16xf32> to vector<16x1xf32>
    %cst_107 = arith.constant 3.200000e+01 : f32
    %295 = vector.broadcast %cst_107 : f32 to vector<16x1xf32>
    %296 = arith.divf %294, %295 : vector<16x1xf32>
    %cst_108 = arith.constant 9.99999974E-6 : f32
    %297 = vector.broadcast %cst_108 : f32 to vector<16x1xf32>
    %298 = arith.addf %296, %297 : vector<16x1xf32>
    %299 = math.rsqrt %298 : vector<16x1xf32>
    %300 = vector.broadcast %299 : vector<16x1xf32> to vector<16x32xf32>
    %301 = arith.mulf %291, %300 : vector<16x32xf32>
    %302 = vector.broadcast %284 : vector<1x32xf32> to vector<16x32xf32>
    %303 = arith.mulf %301, %302 : vector<16x32xf32>
    %304 = vector.broadcast %285 : vector<1x32xf32> to vector<16x32xf32>
    %305 = arith.addf %303, %304 : vector<16x32xf32>
    %c0_109 = arith.constant 0 : index
    %c0_110 = arith.constant 0 : index
    %306 = vector.load %arg3[%c0_109, %c0_110] : memref<16x32xf32, #tpu.memory_space<vmem>>, vector<16x32xf32>
    %c400 = arith.constant 400 : index
    %c0_111 = arith.constant 0 : index
    %307 = vector.load %arg4[%c400, %c0_111] : memref<656x128xf32, #tpu.memory_space<vmem>>, vector<32x96xf32>
    %c18 = arith.constant 18 : index
    %c0_112 = arith.constant 0 : index
    %308 = vector.load %arg5[%c18, %c0_112] : memref<32x128xf32, #tpu.memory_space<vmem>>, vector<1x96xf32>
    %c432 = arith.constant 432 : index
    %c0_113 = arith.constant 0 : index
    %309 = vector.load %arg4[%c432, %c0_113] : memref<656x128xf32, #tpu.memory_space<vmem>>, vector<32x32xf32>
    %c19 = arith.constant 19 : index
    %c0_114 = arith.constant 0 : index
    %310 = vector.load %arg5[%c19, %c0_114] : memref<32x128xf32, #tpu.memory_space<vmem>>, vector<1x32xf32>
    %cst_115 = arith.constant dense<0.000000e+00> : vector<16x96xf32>
    %311 = tpu.matmul %306, %307, %cst_115 {dimension_numbers = #tpu.dot_dimension_numbers<[1], [0], [0], [1], [0, 0, 1, 1], [], []>} : vector<16x32xf32>, vector<32x96xf32>, vector<16x96xf32> -> vector<16x96xf32>
    %312 = vector.broadcast %308 : vector<1x96xf32> to vector<16x96xf32>
    %313 = arith.addf %311, %312 : vector<16x96xf32>
    %314 = vector.extract_strided_slice %313 {offsets = [0, 0], sizes = [16, 32], strides = [1, 1]} : vector<16x96xf32> to vector<16x32xf32>
    %315 = vector.extract_strided_slice %313 {offsets = [0, 32], sizes = [16, 32], strides = [1, 1]} : vector<16x96xf32> to vector<16x32xf32>
    %316 = vector.extract_strided_slice %313 {offsets = [0, 64], sizes = [16, 32], strides = [1, 1]} : vector<16x96xf32> to vector<16x32xf32>
    %317 = vector.extract_strided_slice %314 {offsets = [0, 0], sizes = [16, 8], strides = [1, 1]} : vector<16x32xf32> to vector<16x8xf32>
    %318 = vector.extract_strided_slice %315 {offsets = [0, 0], sizes = [16, 8], strides = [1, 1]} : vector<16x32xf32> to vector<16x8xf32>
    %319 = vector.extract_strided_slice %316 {offsets = [0, 0], sizes = [16, 8], strides = [1, 1]} : vector<16x32xf32> to vector<16x8xf32>
    %cst_116 = arith.constant dense<0.000000e+00> : vector<16x16xf32>
    %320 = tpu.matmul %317, %318, %cst_116 {dimension_numbers = #tpu.dot_dimension_numbers<[1], [1], [0], [0], [0, 0, 1, 0], [], []>} : vector<16x8xf32>, vector<16x8xf32>, vector<16x16xf32> -> vector<16x16xf32>
    %cst_117 = arith.constant 0.353553385 : f32
    %321 = vector.broadcast %cst_117 : f32 to vector<16x16xf32>
    %322 = arith.mulf %320, %321 : vector<16x16xf32>
    %323 = arith.addf %322, %1 : vector<16x16xf32>
    %cst_118 = arith.constant dense<0xFF800000> : vector<16xf32>
    %324 = vector.multi_reduction <maximumf>, %323, %cst_118 [1] : vector<16x16xf32> to vector<16xf32>
    %325 = vector.shape_cast %324 : vector<16xf32> to vector<16x1xf32>
    %326 = vector.broadcast %325 : vector<16x1xf32> to vector<16x16xf32>
    %327 = arith.subf %323, %326 : vector<16x16xf32>
    %328 = math.exp %327 : vector<16x16xf32>
    %cst_119 = arith.constant dense<0.000000e+00> : vector<16xf32>
    %329 = vector.multi_reduction <add>, %328, %cst_119 [1] : vector<16x16xf32> to vector<16xf32>
    %330 = vector.shape_cast %329 : vector<16xf32> to vector<16x1xf32>
    %331 = tpu.reciprocal %330 {approx = true} : vector<16x1xf32> -> vector<16x1xf32>
    %332 = vector.broadcast %331 : vector<16x1xf32> to vector<16x16xf32>
    %333 = arith.mulf %328, %332 : vector<16x16xf32>
    %cst_120 = arith.constant dense<0.000000e+00> : vector<16x8xf32>
    %334 = tpu.matmul %333, %319, %cst_120 {dimension_numbers = #tpu.dot_dimension_numbers<[1], [0], [0], [1], [0, 0, 1, 1], [], []>} : vector<16x16xf32>, vector<16x8xf32>, vector<16x8xf32> -> vector<16x8xf32>
    %335 = vector.extract_strided_slice %314 {offsets = [0, 8], sizes = [16, 8], strides = [1, 1]} : vector<16x32xf32> to vector<16x8xf32>
    %336 = vector.extract_strided_slice %315 {offsets = [0, 8], sizes = [16, 8], strides = [1, 1]} : vector<16x32xf32> to vector<16x8xf32>
    %337 = vector.extract_strided_slice %316 {offsets = [0, 8], sizes = [16, 8], strides = [1, 1]} : vector<16x32xf32> to vector<16x8xf32>
    %cst_121 = arith.constant dense<0.000000e+00> : vector<16x16xf32>
    %338 = tpu.matmul %335, %336, %cst_121 {dimension_numbers = #tpu.dot_dimension_numbers<[1], [1], [0], [0], [0, 0, 1, 0], [], []>} : vector<16x8xf32>, vector<16x8xf32>, vector<16x16xf32> -> vector<16x16xf32>
    %cst_122 = arith.constant 0.353553385 : f32
    %339 = vector.broadcast %cst_122 : f32 to vector<16x16xf32>
    %340 = arith.mulf %338, %339 : vector<16x16xf32>
    %341 = arith.addf %340, %1 : vector<16x16xf32>
    %cst_123 = arith.constant dense<0xFF800000> : vector<16xf32>
    %342 = vector.multi_reduction <maximumf>, %341, %cst_123 [1] : vector<16x16xf32> to vector<16xf32>
    %343 = vector.shape_cast %342 : vector<16xf32> to vector<16x1xf32>
    %344 = vector.broadcast %343 : vector<16x1xf32> to vector<16x16xf32>
    %345 = arith.subf %341, %344 : vector<16x16xf32>
    %346 = math.exp %345 : vector<16x16xf32>
    %cst_124 = arith.constant dense<0.000000e+00> : vector<16xf32>
    %347 = vector.multi_reduction <add>, %346, %cst_124 [1] : vector<16x16xf32> to vector<16xf32>
    %348 = vector.shape_cast %347 : vector<16xf32> to vector<16x1xf32>
    %349 = tpu.reciprocal %348 {approx = true} : vector<16x1xf32> -> vector<16x1xf32>
    %350 = vector.broadcast %349 : vector<16x1xf32> to vector<16x16xf32>
    %351 = arith.mulf %346, %350 : vector<16x16xf32>
    %cst_125 = arith.constant dense<0.000000e+00> : vector<16x8xf32>
    %352 = tpu.matmul %351, %337, %cst_125 {dimension_numbers = #tpu.dot_dimension_numbers<[1], [0], [0], [1], [0, 0, 1, 1], [], []>} : vector<16x16xf32>, vector<16x8xf32>, vector<16x8xf32> -> vector<16x8xf32>
    %353 = vector.extract_strided_slice %314 {offsets = [0, 16], sizes = [16, 8], strides = [1, 1]} : vector<16x32xf32> to vector<16x8xf32>
    %354 = vector.extract_strided_slice %315 {offsets = [0, 16], sizes = [16, 8], strides = [1, 1]} : vector<16x32xf32> to vector<16x8xf32>
    %355 = vector.extract_strided_slice %316 {offsets = [0, 16], sizes = [16, 8], strides = [1, 1]} : vector<16x32xf32> to vector<16x8xf32>
    %cst_126 = arith.constant dense<0.000000e+00> : vector<16x16xf32>
    %356 = tpu.matmul %353, %354, %cst_126 {dimension_numbers = #tpu.dot_dimension_numbers<[1], [1], [0], [0], [0, 0, 1, 0], [], []>} : vector<16x8xf32>, vector<16x8xf32>, vector<16x16xf32> -> vector<16x16xf32>
    %cst_127 = arith.constant 0.353553385 : f32
    %357 = vector.broadcast %cst_127 : f32 to vector<16x16xf32>
    %358 = arith.mulf %356, %357 : vector<16x16xf32>
    %359 = arith.addf %358, %1 : vector<16x16xf32>
    %cst_128 = arith.constant dense<0xFF800000> : vector<16xf32>
    %360 = vector.multi_reduction <maximumf>, %359, %cst_128 [1] : vector<16x16xf32> to vector<16xf32>
    %361 = vector.shape_cast %360 : vector<16xf32> to vector<16x1xf32>
    %362 = vector.broadcast %361 : vector<16x1xf32> to vector<16x16xf32>
    %363 = arith.subf %359, %362 : vector<16x16xf32>
    %364 = math.exp %363 : vector<16x16xf32>
    %cst_129 = arith.constant dense<0.000000e+00> : vector<16xf32>
    %365 = vector.multi_reduction <add>, %364, %cst_129 [1] : vector<16x16xf32> to vector<16xf32>
    %366 = vector.shape_cast %365 : vector<16xf32> to vector<16x1xf32>
    %367 = tpu.reciprocal %366 {approx = true} : vector<16x1xf32> -> vector<16x1xf32>
    %368 = vector.broadcast %367 : vector<16x1xf32> to vector<16x16xf32>
    %369 = arith.mulf %364, %368 : vector<16x16xf32>
    %cst_130 = arith.constant dense<0.000000e+00> : vector<16x8xf32>
    %370 = tpu.matmul %369, %355, %cst_130 {dimension_numbers = #tpu.dot_dimension_numbers<[1], [0], [0], [1], [0, 0, 1, 1], [], []>} : vector<16x16xf32>, vector<16x8xf32>, vector<16x8xf32> -> vector<16x8xf32>
    %371 = vector.extract_strided_slice %314 {offsets = [0, 24], sizes = [16, 8], strides = [1, 1]} : vector<16x32xf32> to vector<16x8xf32>
    %372 = vector.extract_strided_slice %315 {offsets = [0, 24], sizes = [16, 8], strides = [1, 1]} : vector<16x32xf32> to vector<16x8xf32>
    %373 = vector.extract_strided_slice %316 {offsets = [0, 24], sizes = [16, 8], strides = [1, 1]} : vector<16x32xf32> to vector<16x8xf32>
    %cst_131 = arith.constant dense<0.000000e+00> : vector<16x16xf32>
    %374 = tpu.matmul %371, %372, %cst_131 {dimension_numbers = #tpu.dot_dimension_numbers<[1], [1], [0], [0], [0, 0, 1, 0], [], []>} : vector<16x8xf32>, vector<16x8xf32>, vector<16x16xf32> -> vector<16x16xf32>
    %cst_132 = arith.constant 0.353553385 : f32
    %375 = vector.broadcast %cst_132 : f32 to vector<16x16xf32>
    %376 = arith.mulf %374, %375 : vector<16x16xf32>
    %377 = arith.addf %376, %1 : vector<16x16xf32>
    %cst_133 = arith.constant dense<0xFF800000> : vector<16xf32>
    %378 = vector.multi_reduction <maximumf>, %377, %cst_133 [1] : vector<16x16xf32> to vector<16xf32>
    %379 = vector.shape_cast %378 : vector<16xf32> to vector<16x1xf32>
    %380 = vector.broadcast %379 : vector<16x1xf32> to vector<16x16xf32>
    %381 = arith.subf %377, %380 : vector<16x16xf32>
    %382 = math.exp %381 : vector<16x16xf32>
    %cst_134 = arith.constant dense<0.000000e+00> : vector<16xf32>
    %383 = vector.multi_reduction <add>, %382, %cst_134 [1] : vector<16x16xf32> to vector<16xf32>
    %384 = vector.shape_cast %383 : vector<16xf32> to vector<16x1xf32>
    %385 = tpu.reciprocal %384 {approx = true} : vector<16x1xf32> -> vector<16x1xf32>
    %386 = vector.broadcast %385 : vector<16x1xf32> to vector<16x16xf32>
    %387 = arith.mulf %382, %386 : vector<16x16xf32>
    %cst_135 = arith.constant dense<0.000000e+00> : vector<16x8xf32>
    %388 = tpu.matmul %387, %373, %cst_135 {dimension_numbers = #tpu.dot_dimension_numbers<[1], [0], [0], [1], [0, 0, 1, 1], [], []>} : vector<16x16xf32>, vector<16x8xf32>, vector<16x8xf32> -> vector<16x8xf32>
    %389 = tpu.concatenate %334, %352, %370, %388 in 1 : vector<16x8xf32>, vector<16x8xf32>, vector<16x8xf32>, vector<16x8xf32> -> vector<16x32xf32>
    %cst_136 = arith.constant dense<0.000000e+00> : vector<16x32xf32>
    %390 = tpu.matmul %389, %309, %cst_136 {dimension_numbers = #tpu.dot_dimension_numbers<[1], [0], [0], [1], [0, 0, 1, 1], [], []>} : vector<16x32xf32>, vector<32x32xf32>, vector<16x32xf32> -> vector<16x32xf32>
    %391 = vector.broadcast %310 : vector<1x32xf32> to vector<16x32xf32>
    %392 = arith.addf %390, %391 : vector<16x32xf32>
    %393 = arith.addf %306, %392 : vector<16x32xf32>
    %c22 = arith.constant 22 : index
    %c0_137 = arith.constant 0 : index
    %394 = vector.load %arg5[%c22, %c0_137] : memref<32x128xf32, #tpu.memory_space<vmem>>, vector<1x32xf32>
    %c23 = arith.constant 23 : index
    %c0_138 = arith.constant 0 : index
    %395 = vector.load %arg5[%c23, %c0_138] : memref<32x128xf32, #tpu.memory_space<vmem>>, vector<1x32xf32>
    %cst_139 = arith.constant dense<0.000000e+00> : vector<16xf32>
    %396 = vector.multi_reduction <add>, %393, %cst_139 [1] : vector<16x32xf32> to vector<16xf32>
    %397 = vector.shape_cast %396 : vector<16xf32> to vector<16x1xf32>
    %cst_140 = arith.constant 3.200000e+01 : f32
    %398 = vector.broadcast %cst_140 : f32 to vector<16x1xf32>
    %399 = arith.divf %397, %398 : vector<16x1xf32>
    %400 = vector.broadcast %399 : vector<16x1xf32> to vector<16x32xf32>
    %401 = arith.subf %393, %400 : vector<16x32xf32>
    %402 = arith.mulf %401, %401 : vector<16x32xf32>
    %cst_141 = arith.constant dense<0.000000e+00> : vector<16xf32>
    %403 = vector.multi_reduction <add>, %402, %cst_141 [1] : vector<16x32xf32> to vector<16xf32>
    %404 = vector.shape_cast %403 : vector<16xf32> to vector<16x1xf32>
    %cst_142 = arith.constant 3.200000e+01 : f32
    %405 = vector.broadcast %cst_142 : f32 to vector<16x1xf32>
    %406 = arith.divf %404, %405 : vector<16x1xf32>
    %cst_143 = arith.constant 9.99999974E-6 : f32
    %407 = vector.broadcast %cst_143 : f32 to vector<16x1xf32>
    %408 = arith.addf %406, %407 : vector<16x1xf32>
    %409 = math.rsqrt %408 : vector<16x1xf32>
    %410 = vector.broadcast %409 : vector<16x1xf32> to vector<16x32xf32>
    %411 = arith.mulf %401, %410 : vector<16x32xf32>
    %412 = vector.broadcast %394 : vector<1x32xf32> to vector<16x32xf32>
    %413 = arith.mulf %411, %412 : vector<16x32xf32>
    %414 = vector.broadcast %395 : vector<1x32xf32> to vector<16x32xf32>
    %415 = arith.addf %413, %414 : vector<16x32xf32>
    %c464 = arith.constant 464 : index
    %c0_144 = arith.constant 0 : index
    %416 = vector.load %arg4[%c464, %c0_144] : memref<656x128xf32, #tpu.memory_space<vmem>>, vector<32x96xf32>
    %c20 = arith.constant 20 : index
    %c0_145 = arith.constant 0 : index
    %417 = vector.load %arg5[%c20, %c0_145] : memref<32x128xf32, #tpu.memory_space<vmem>>, vector<1x96xf32>
    %c496 = arith.constant 496 : index
    %c0_146 = arith.constant 0 : index
    %418 = vector.load %arg4[%c496, %c0_146] : memref<656x128xf32, #tpu.memory_space<vmem>>, vector<32x32xf32>
    %c21 = arith.constant 21 : index
    %c0_147 = arith.constant 0 : index
    %419 = vector.load %arg5[%c21, %c0_147] : memref<32x128xf32, #tpu.memory_space<vmem>>, vector<1x32xf32>
    %420 = vector.extract_strided_slice %416 {offsets = [0, 0], sizes = [32, 32], strides = [1, 1]} : vector<32x96xf32> to vector<32x32xf32>
    %cst_148 = arith.constant dense<0.000000e+00> : vector<16x32xf32>
    %421 = tpu.matmul %415, %420, %cst_148 {dimension_numbers = #tpu.dot_dimension_numbers<[1], [0], [0], [1], [0, 0, 1, 1], [], []>} : vector<16x32xf32>, vector<32x32xf32>, vector<16x32xf32> -> vector<16x32xf32>
    %422 = vector.extract_strided_slice %417 {offsets = [0, 0], sizes = [1, 32], strides = [1, 1]} : vector<1x96xf32> to vector<1x32xf32>
    %423 = vector.broadcast %422 : vector<1x32xf32> to vector<16x32xf32>
    %424 = arith.addf %421, %423 : vector<16x32xf32>
    %425 = vector.extract_strided_slice %416 {offsets = [0, 32], sizes = [32, 64], strides = [1, 1]} : vector<32x96xf32> to vector<32x64xf32>
    %cst_149 = arith.constant dense<0.000000e+00> : vector<16x64xf32>
    %426 = tpu.matmul %305, %425, %cst_149 {dimension_numbers = #tpu.dot_dimension_numbers<[1], [0], [0], [1], [0, 0, 1, 1], [], []>} : vector<16x32xf32>, vector<32x64xf32>, vector<16x64xf32> -> vector<16x64xf32>
    %427 = vector.extract_strided_slice %417 {offsets = [0, 32], sizes = [1, 64], strides = [1, 1]} : vector<1x96xf32> to vector<1x64xf32>
    %428 = vector.broadcast %427 : vector<1x64xf32> to vector<16x64xf32>
    %429 = arith.addf %426, %428 : vector<16x64xf32>
    %430 = vector.extract_strided_slice %429 {offsets = [0, 0], sizes = [16, 32], strides = [1, 1]} : vector<16x64xf32> to vector<16x32xf32>
    %431 = vector.extract_strided_slice %429 {offsets = [0, 32], sizes = [16, 32], strides = [1, 1]} : vector<16x64xf32> to vector<16x32xf32>
    %432 = vector.extract_strided_slice %424 {offsets = [0, 0], sizes = [16, 8], strides = [1, 1]} : vector<16x32xf32> to vector<16x8xf32>
    %433 = vector.extract_strided_slice %430 {offsets = [0, 0], sizes = [16, 8], strides = [1, 1]} : vector<16x32xf32> to vector<16x8xf32>
    %434 = vector.extract_strided_slice %431 {offsets = [0, 0], sizes = [16, 8], strides = [1, 1]} : vector<16x32xf32> to vector<16x8xf32>
    %cst_150 = arith.constant dense<0.000000e+00> : vector<16x16xf32>
    %435 = tpu.matmul %432, %433, %cst_150 {dimension_numbers = #tpu.dot_dimension_numbers<[1], [1], [0], [0], [0, 0, 1, 0], [], []>} : vector<16x8xf32>, vector<16x8xf32>, vector<16x16xf32> -> vector<16x16xf32>
    %cst_151 = arith.constant 0.353553385 : f32
    %436 = vector.broadcast %cst_151 : f32 to vector<16x16xf32>
    %437 = arith.mulf %435, %436 : vector<16x16xf32>
    %438 = arith.addf %437, %0 : vector<16x16xf32>
    %cst_152 = arith.constant dense<0xFF800000> : vector<16xf32>
    %439 = vector.multi_reduction <maximumf>, %438, %cst_152 [1] : vector<16x16xf32> to vector<16xf32>
    %440 = vector.shape_cast %439 : vector<16xf32> to vector<16x1xf32>
    %441 = vector.broadcast %440 : vector<16x1xf32> to vector<16x16xf32>
    %442 = arith.subf %438, %441 : vector<16x16xf32>
    %443 = math.exp %442 : vector<16x16xf32>
    %cst_153 = arith.constant dense<0.000000e+00> : vector<16xf32>
    %444 = vector.multi_reduction <add>, %443, %cst_153 [1] : vector<16x16xf32> to vector<16xf32>
    %445 = vector.shape_cast %444 : vector<16xf32> to vector<16x1xf32>
    %446 = tpu.reciprocal %445 {approx = true} : vector<16x1xf32> -> vector<16x1xf32>
    %447 = vector.broadcast %446 : vector<16x1xf32> to vector<16x16xf32>
    %448 = arith.mulf %443, %447 : vector<16x16xf32>
    %cst_154 = arith.constant dense<0.000000e+00> : vector<16x8xf32>
    %449 = tpu.matmul %448, %434, %cst_154 {dimension_numbers = #tpu.dot_dimension_numbers<[1], [0], [0], [1], [0, 0, 1, 1], [], []>} : vector<16x16xf32>, vector<16x8xf32>, vector<16x8xf32> -> vector<16x8xf32>
    %450 = vector.extract_strided_slice %424 {offsets = [0, 8], sizes = [16, 8], strides = [1, 1]} : vector<16x32xf32> to vector<16x8xf32>
    %451 = vector.extract_strided_slice %430 {offsets = [0, 8], sizes = [16, 8], strides = [1, 1]} : vector<16x32xf32> to vector<16x8xf32>
    %452 = vector.extract_strided_slice %431 {offsets = [0, 8], sizes = [16, 8], strides = [1, 1]} : vector<16x32xf32> to vector<16x8xf32>
    %cst_155 = arith.constant dense<0.000000e+00> : vector<16x16xf32>
    %453 = tpu.matmul %450, %451, %cst_155 {dimension_numbers = #tpu.dot_dimension_numbers<[1], [1], [0], [0], [0, 0, 1, 0], [], []>} : vector<16x8xf32>, vector<16x8xf32>, vector<16x16xf32> -> vector<16x16xf32>
    %cst_156 = arith.constant 0.353553385 : f32
    %454 = vector.broadcast %cst_156 : f32 to vector<16x16xf32>
    %455 = arith.mulf %453, %454 : vector<16x16xf32>
    %456 = arith.addf %455, %0 : vector<16x16xf32>
    %cst_157 = arith.constant dense<0xFF800000> : vector<16xf32>
    %457 = vector.multi_reduction <maximumf>, %456, %cst_157 [1] : vector<16x16xf32> to vector<16xf32>
    %458 = vector.shape_cast %457 : vector<16xf32> to vector<16x1xf32>
    %459 = vector.broadcast %458 : vector<16x1xf32> to vector<16x16xf32>
    %460 = arith.subf %456, %459 : vector<16x16xf32>
    %461 = math.exp %460 : vector<16x16xf32>
    %cst_158 = arith.constant dense<0.000000e+00> : vector<16xf32>
    %462 = vector.multi_reduction <add>, %461, %cst_158 [1] : vector<16x16xf32> to vector<16xf32>
    %463 = vector.shape_cast %462 : vector<16xf32> to vector<16x1xf32>
    %464 = tpu.reciprocal %463 {approx = true} : vector<16x1xf32> -> vector<16x1xf32>
    %465 = vector.broadcast %464 : vector<16x1xf32> to vector<16x16xf32>
    %466 = arith.mulf %461, %465 : vector<16x16xf32>
    %cst_159 = arith.constant dense<0.000000e+00> : vector<16x8xf32>
    %467 = tpu.matmul %466, %452, %cst_159 {dimension_numbers = #tpu.dot_dimension_numbers<[1], [0], [0], [1], [0, 0, 1, 1], [], []>} : vector<16x16xf32>, vector<16x8xf32>, vector<16x8xf32> -> vector<16x8xf32>
    %468 = vector.extract_strided_slice %424 {offsets = [0, 16], sizes = [16, 8], strides = [1, 1]} : vector<16x32xf32> to vector<16x8xf32>
    %469 = vector.extract_strided_slice %430 {offsets = [0, 16], sizes = [16, 8], strides = [1, 1]} : vector<16x32xf32> to vector<16x8xf32>
    %470 = vector.extract_strided_slice %431 {offsets = [0, 16], sizes = [16, 8], strides = [1, 1]} : vector<16x32xf32> to vector<16x8xf32>
    %cst_160 = arith.constant dense<0.000000e+00> : vector<16x16xf32>
    %471 = tpu.matmul %468, %469, %cst_160 {dimension_numbers = #tpu.dot_dimension_numbers<[1], [1], [0], [0], [0, 0, 1, 0], [], []>} : vector<16x8xf32>, vector<16x8xf32>, vector<16x16xf32> -> vector<16x16xf32>
    %cst_161 = arith.constant 0.353553385 : f32
    %472 = vector.broadcast %cst_161 : f32 to vector<16x16xf32>
    %473 = arith.mulf %471, %472 : vector<16x16xf32>
    %474 = arith.addf %473, %0 : vector<16x16xf32>
    %cst_162 = arith.constant dense<0xFF800000> : vector<16xf32>
    %475 = vector.multi_reduction <maximumf>, %474, %cst_162 [1] : vector<16x16xf32> to vector<16xf32>
    %476 = vector.shape_cast %475 : vector<16xf32> to vector<16x1xf32>
    %477 = vector.broadcast %476 : vector<16x1xf32> to vector<16x16xf32>
    %478 = arith.subf %474, %477 : vector<16x16xf32>
    %479 = math.exp %478 : vector<16x16xf32>
    %cst_163 = arith.constant dense<0.000000e+00> : vector<16xf32>
    %480 = vector.multi_reduction <add>, %479, %cst_163 [1] : vector<16x16xf32> to vector<16xf32>
    %481 = vector.shape_cast %480 : vector<16xf32> to vector<16x1xf32>
    %482 = tpu.reciprocal %481 {approx = true} : vector<16x1xf32> -> vector<16x1xf32>
    %483 = vector.broadcast %482 : vector<16x1xf32> to vector<16x16xf32>
    %484 = arith.mulf %479, %483 : vector<16x16xf32>
    %cst_164 = arith.constant dense<0.000000e+00> : vector<16x8xf32>
    %485 = tpu.matmul %484, %470, %cst_164 {dimension_numbers = #tpu.dot_dimension_numbers<[1], [0], [0], [1], [0, 0, 1, 1], [], []>} : vector<16x16xf32>, vector<16x8xf32>, vector<16x8xf32> -> vector<16x8xf32>
    %486 = vector.extract_strided_slice %424 {offsets = [0, 24], sizes = [16, 8], strides = [1, 1]} : vector<16x32xf32> to vector<16x8xf32>
    %487 = vector.extract_strided_slice %430 {offsets = [0, 24], sizes = [16, 8], strides = [1, 1]} : vector<16x32xf32> to vector<16x8xf32>
    %488 = vector.extract_strided_slice %431 {offsets = [0, 24], sizes = [16, 8], strides = [1, 1]} : vector<16x32xf32> to vector<16x8xf32>
    %cst_165 = arith.constant dense<0.000000e+00> : vector<16x16xf32>
    %489 = tpu.matmul %486, %487, %cst_165 {dimension_numbers = #tpu.dot_dimension_numbers<[1], [1], [0], [0], [0, 0, 1, 0], [], []>} : vector<16x8xf32>, vector<16x8xf32>, vector<16x16xf32> -> vector<16x16xf32>
    %cst_166 = arith.constant 0.353553385 : f32
    %490 = vector.broadcast %cst_166 : f32 to vector<16x16xf32>
    %491 = arith.mulf %489, %490 : vector<16x16xf32>
    %492 = arith.addf %491, %0 : vector<16x16xf32>
    %cst_167 = arith.constant dense<0xFF800000> : vector<16xf32>
    %493 = vector.multi_reduction <maximumf>, %492, %cst_167 [1] : vector<16x16xf32> to vector<16xf32>
    %494 = vector.shape_cast %493 : vector<16xf32> to vector<16x1xf32>
    %495 = vector.broadcast %494 : vector<16x1xf32> to vector<16x16xf32>
    %496 = arith.subf %492, %495 : vector<16x16xf32>
    %497 = math.exp %496 : vector<16x16xf32>
    %cst_168 = arith.constant dense<0.000000e+00> : vector<16xf32>
    %498 = vector.multi_reduction <add>, %497, %cst_168 [1] : vector<16x16xf32> to vector<16xf32>
    %499 = vector.shape_cast %498 : vector<16xf32> to vector<16x1xf32>
    %500 = tpu.reciprocal %499 {approx = true} : vector<16x1xf32> -> vector<16x1xf32>
    %501 = vector.broadcast %500 : vector<16x1xf32> to vector<16x16xf32>
    %502 = arith.mulf %497, %501 : vector<16x16xf32>
    %cst_169 = arith.constant dense<0.000000e+00> : vector<16x8xf32>
    %503 = tpu.matmul %502, %488, %cst_169 {dimension_numbers = #tpu.dot_dimension_numbers<[1], [0], [0], [1], [0, 0, 1, 1], [], []>} : vector<16x16xf32>, vector<16x8xf32>, vector<16x8xf32> -> vector<16x8xf32>
    %504 = tpu.concatenate %449, %467, %485, %503 in 1 : vector<16x8xf32>, vector<16x8xf32>, vector<16x8xf32>, vector<16x8xf32> -> vector<16x32xf32>
    %cst_170 = arith.constant dense<0.000000e+00> : vector<16x32xf32>
    %505 = tpu.matmul %504, %418, %cst_170 {dimension_numbers = #tpu.dot_dimension_numbers<[1], [0], [0], [1], [0, 0, 1, 1], [], []>} : vector<16x32xf32>, vector<32x32xf32>, vector<16x32xf32> -> vector<16x32xf32>
    %506 = vector.broadcast %419 : vector<1x32xf32> to vector<16x32xf32>
    %507 = arith.addf %505, %506 : vector<16x32xf32>
    %508 = arith.addf %415, %507 : vector<16x32xf32>
    %c24 = arith.constant 24 : index
    %c0_171 = arith.constant 0 : index
    %509 = vector.load %arg5[%c24, %c0_171] : memref<32x128xf32, #tpu.memory_space<vmem>>, vector<1x32xf32>
    %c25 = arith.constant 25 : index
    %c0_172 = arith.constant 0 : index
    %510 = vector.load %arg5[%c25, %c0_172] : memref<32x128xf32, #tpu.memory_space<vmem>>, vector<1x32xf32>
    %cst_173 = arith.constant dense<0.000000e+00> : vector<16xf32>
    %511 = vector.multi_reduction <add>, %508, %cst_173 [1] : vector<16x32xf32> to vector<16xf32>
    %512 = vector.shape_cast %511 : vector<16xf32> to vector<16x1xf32>
    %cst_174 = arith.constant 3.200000e+01 : f32
    %513 = vector.broadcast %cst_174 : f32 to vector<16x1xf32>
    %514 = arith.divf %512, %513 : vector<16x1xf32>
    %515 = vector.broadcast %514 : vector<16x1xf32> to vector<16x32xf32>
    %516 = arith.subf %508, %515 : vector<16x32xf32>
    %517 = arith.mulf %516, %516 : vector<16x32xf32>
    %cst_175 = arith.constant dense<0.000000e+00> : vector<16xf32>
    %518 = vector.multi_reduction <add>, %517, %cst_175 [1] : vector<16x32xf32> to vector<16xf32>
    %519 = vector.shape_cast %518 : vector<16xf32> to vector<16x1xf32>
    %cst_176 = arith.constant 3.200000e+01 : f32
    %520 = vector.broadcast %cst_176 : f32 to vector<16x1xf32>
    %521 = arith.divf %519, %520 : vector<16x1xf32>
    %cst_177 = arith.constant 9.99999974E-6 : f32
    %522 = vector.broadcast %cst_177 : f32 to vector<16x1xf32>
    %523 = arith.addf %521, %522 : vector<16x1xf32>
    %524 = math.rsqrt %523 : vector<16x1xf32>
    %525 = vector.broadcast %524 : vector<16x1xf32> to vector<16x32xf32>
    %526 = arith.mulf %516, %525 : vector<16x32xf32>
    %527 = vector.broadcast %509 : vector<1x32xf32> to vector<16x32xf32>
    %528 = arith.mulf %526, %527 : vector<16x32xf32>
    %529 = vector.broadcast %510 : vector<1x32xf32> to vector<16x32xf32>
    %530 = arith.addf %528, %529 : vector<16x32xf32>
    %c528 = arith.constant 528 : index
    %c0_178 = arith.constant 0 : index
    %531 = vector.load %arg4[%c528, %c0_178] : memref<656x128xf32, #tpu.memory_space<vmem>>, vector<32x64xf32>
    %c26 = arith.constant 26 : index
    %c0_179 = arith.constant 0 : index
    %532 = vector.load %arg5[%c26, %c0_179] : memref<32x128xf32, #tpu.memory_space<vmem>>, vector<1x64xf32>
    %cst_180 = arith.constant dense<0.000000e+00> : vector<16x64xf32>
    %533 = tpu.matmul %530, %531, %cst_180 {dimension_numbers = #tpu.dot_dimension_numbers<[1], [0], [0], [1], [0, 0, 1, 1], [], []>} : vector<16x32xf32>, vector<32x64xf32>, vector<16x64xf32> -> vector<16x64xf32>
    %534 = vector.broadcast %532 : vector<1x64xf32> to vector<16x64xf32>
    %535 = arith.addf %533, %534 : vector<16x64xf32>
    %cst_181 = arith.constant 0.000000e+00 : f32
    %536 = vector.broadcast %cst_181 : f32 to vector<16x64xf32>
    %537 = arith.maximumf %535, %536 : vector<16x64xf32>
    %c560 = arith.constant 560 : index
    %c0_182 = arith.constant 0 : index
    %538 = vector.load %arg4[%c560, %c0_182] : memref<656x128xf32, #tpu.memory_space<vmem>>, vector<64x32xf32>
    %c27 = arith.constant 27 : index
    %c0_183 = arith.constant 0 : index
    %539 = vector.load %arg5[%c27, %c0_183] : memref<32x128xf32, #tpu.memory_space<vmem>>, vector<1x32xf32>
    %cst_184 = arith.constant dense<0.000000e+00> : vector<16x32xf32>
    %540 = tpu.matmul %537, %538, %cst_184 {dimension_numbers = #tpu.dot_dimension_numbers<[1], [0], [0], [1], [0, 0, 1, 1], [], []>} : vector<16x64xf32>, vector<64x32xf32>, vector<16x32xf32> -> vector<16x32xf32>
    %541 = vector.broadcast %539 : vector<1x32xf32> to vector<16x32xf32>
    %542 = arith.addf %540, %541 : vector<16x32xf32>
    %543 = arith.addf %530, %542 : vector<16x32xf32>
    %c28 = arith.constant 28 : index
    %c0_185 = arith.constant 0 : index
    %544 = vector.load %arg5[%c28, %c0_185] : memref<32x128xf32, #tpu.memory_space<vmem>>, vector<1x32xf32>
    %c29 = arith.constant 29 : index
    %c0_186 = arith.constant 0 : index
    %545 = vector.load %arg5[%c29, %c0_186] : memref<32x128xf32, #tpu.memory_space<vmem>>, vector<1x32xf32>
    %cst_187 = arith.constant dense<0.000000e+00> : vector<16xf32>
    %546 = vector.multi_reduction <add>, %543, %cst_187 [1] : vector<16x32xf32> to vector<16xf32>
    %547 = vector.shape_cast %546 : vector<16xf32> to vector<16x1xf32>
    %cst_188 = arith.constant 3.200000e+01 : f32
    %548 = vector.broadcast %cst_188 : f32 to vector<16x1xf32>
    %549 = arith.divf %547, %548 : vector<16x1xf32>
    %550 = vector.broadcast %549 : vector<16x1xf32> to vector<16x32xf32>
    %551 = arith.subf %543, %550 : vector<16x32xf32>
    %552 = arith.mulf %551, %551 : vector<16x32xf32>
    %cst_189 = arith.constant dense<0.000000e+00> : vector<16xf32>
    %553 = vector.multi_reduction <add>, %552, %cst_189 [1] : vector<16x32xf32> to vector<16xf32>
    %554 = vector.shape_cast %553 : vector<16xf32> to vector<16x1xf32>
    %cst_190 = arith.constant 3.200000e+01 : f32
    %555 = vector.broadcast %cst_190 : f32 to vector<16x1xf32>
    %556 = arith.divf %554, %555 : vector<16x1xf32>
    %cst_191 = arith.constant 9.99999974E-6 : f32
    %557 = vector.broadcast %cst_191 : f32 to vector<16x1xf32>
    %558 = arith.addf %556, %557 : vector<16x1xf32>
    %559 = math.rsqrt %558 : vector<16x1xf32>
    %560 = vector.broadcast %559 : vector<16x1xf32> to vector<16x32xf32>
    %561 = arith.mulf %551, %560 : vector<16x32xf32>
    %562 = vector.broadcast %544 : vector<1x32xf32> to vector<16x32xf32>
    %563 = arith.mulf %561, %562 : vector<16x32xf32>
    %564 = vector.broadcast %545 : vector<1x32xf32> to vector<16x32xf32>
    %565 = arith.addf %563, %564 : vector<16x32xf32>
    %c624 = arith.constant 624 : index
    %c0_192 = arith.constant 0 : index
    %566 = vector.load %arg4[%c624, %c0_192] : memref<656x128xf32, #tpu.memory_space<vmem>>, vector<32x32xf32>
    %c30 = arith.constant 30 : index
    %c0_193 = arith.constant 0 : index
    %567 = vector.load %arg5[%c30, %c0_193] : memref<32x128xf32, #tpu.memory_space<vmem>>, vector<1x32xf32>
    %cst_194 = arith.constant dense<0.000000e+00> : vector<16x32xf32>
    %568 = tpu.matmul %565, %566, %cst_194 {dimension_numbers = #tpu.dot_dimension_numbers<[1], [0], [0], [1], [0, 0, 1, 1], [], []>} : vector<16x32xf32>, vector<32x32xf32>, vector<16x32xf32> -> vector<16x32xf32>
    %569 = vector.broadcast %567 : vector<1x32xf32> to vector<16x32xf32>
    %570 = arith.addf %568, %569 : vector<16x32xf32>
    %c0_195 = arith.constant 0 : index
    %c0_196 = arith.constant 0 : index
    %571 = vector.load %arg6[%c0_195, %c0_196] : memref<16x32xf32, #tpu.memory_space<vmem>>, vector<16x32xf32>
    tpu.vector_store %arg6[%c0_195, %c0_196], %570 {strides = array<i32>} : memref<16x32xf32, #tpu.memory_space<vmem>>, vector<16x32xf32>,
    return
  }
}

</mosaic_0001>

<bundles_post_ra>
// kernel: eq.10
= control target key start
LH: loop header
LB: loop body
LE: loop exit
PB: predicated region body
PF: predicated region fallthrough
CT: control target
= control target key end

     0   :  { %vm7_vm0 = vcmask 64512   ;;  %vm13_vm1 = vcmask 130112   ;;  %s39_s0 = inlined_call_operand.vmem [shape: s32[2,8], index: 0, kind: input, shape index: {}]   ;;  %s40_s1 = inlined_call_operand.vmem [shape: s32[16], index: 1, kind: output, shape index: {}]  }
   0x1   :  { %v4_v0 = vld [vmem:[%s39_s0] sm:$0x3]  ;;  %s22_s0 = smov 8  }
   0x2   :  { %5 = vst [vmem:[#allocation1] sm:$0x3] %v4_v0 }
   0x9   :  { %v10_v1 = vld [vmem:[#allocation1 + $0x1] sm:$0x1]   ;;  %v6_v2 = vld [vmem:[#allocation1] sm:$0x1]  }
   0xa   :  { %11 = vrot.lane.b32.xlu0 %v10_v1, %s22_s0  ;;  %8 = vst.msk [vmem:[#allocation0] sm:$0x1] %vm7_vm0, %v6_v2  }
  0x7c   :  { %v12_v3 = vpop.permute.xlu0 %11  }
  0x7d   :  { %14 = vst.msk [vmem:[#allocation0] sm:$0x1] %vm13_vm1, %v12_v3  }
  0x84   :  { %v18_v4 = vld [vmem:[#allocation0] sm:$0x1] }
  0x85   :  { %20 = vst [vmem:[%s40_s1] sm:$0x1] %v18_v4 }

// kernel: forward.1
= control target key start
LH: loop header
LB: loop body
LE: loop exit
PB: predicated region body
PF: predicated region fallthrough
CT: control target
= control target key end

     0   :  { %11 = vsyncpa [#allocation3], 0  ;;  %s6943_s21 = smov [#allocation2]   ;;  %s7747_s0 = inlined_call_operand.vmem [shape: f32[16,16], index: 0, kind: input, shape index: {}]   ;;  %s7748_s1 = inlined_call_operand.vmem [shape: f32[16,16], index: 1, kind: input, shape index: {}]   ;;  %s7749_s2 = inlined_call_operand.vmem [shape: f32[16,16], index: 2, kind: input, shape index: {}]   ;;  %s7750_s3 = inlined_call_operand.vmem [shape: f32[16,32], index: 3, kind: input, shape index: {}]   ;;  %s7751_s4 = inlined_call_operand.hbm [shape: f32[656,128], index: 4, kind: input, shape index: {}]   ;;  %s7752_s5 = inlined_call_operand.vmem [shape: f32[32,128], index: 5, kind: input, shape index: {}]   ;;  %s7753_s6 = inlined_call_operand.vmem [shape: f32[16,32], index: 6, kind: output, shape index: {}]  }
   0x1   :  { %s25_s22 = sshll.u32 %s6943_s21, 4  ;;  %s6919_s25 = scalar_lea.hbm %s7751_s4, 10496  ;;  %s26_s22 = int_to_ptr.vmem [resolvable:$true] %s25_s22 }
   0x2   :  { %p6920_p0 = scmp.ne.s32.totalorder %s7751_s4, %s6919_s25  ;;  %p6923_p1 = scmp.lt.u32.totalorder %s6919_s25, %s7751_s4 }
   0x4   :  { %p6925_p2 = pnand %p6923_p1, %p6920_p0 }
   0x6   :  { %6928 = shalt.err (!%p6925_p2)
}
   0x7   :  { %s6929_s30 = scalar_lea.vmem %s26_s22, 10496  ;;  %p6934_p4 = scmp.lt.s32.totalorder %s26_s22, %s26_s22 }
   0x8   :  { %p6930_p3 = scmp.ne.s32.totalorder %s26_s22, %s6929_s30  ;;  %p6935_p5 = scmp.lt.s32.totalorder %s6929_s30, %s6929_s30 }
   0xa   :  { %p6936_p6 = por %p6935_p5, %p6934_p4 }
   0xc   :  { %p6937_p7 = pnand %p6936_p6, %p6930_p3 }
   0xe   :  { %6940 = shalt.err (!%p6937_p7)
}
   0xf   :  { %s6944_s7 = smov 128   ;;  %s6945_s8 = smov 8  }
  0x10   :  { %31 = dma.hbm_to_vmem [thread:$0]  %s7751_s4, 10496, %s26_s22, [#allocation3], %s6944_s7, %s6944_s7, %s6945_s8  }
  0x11   :  { %6941 = dma.done.wait [#allocation3], 10496  }
  0x12   :  { %6942 = vsyncadd [#allocation3], 4294956800  ;;  %vm50_vm0 = vcmask 130048   ;;  %v43_v0 = vld [vmem:[#allocation2] sm:$0xff]  ;;  %v44_v1 = vld [vmem:[#allocation2 + $0x8] sm:$0xff]  ;;  %vm151_vm3 = vcmask 523264  }
  0x13   :  { %v41_v2 = vld [vmem:[%s7747_s0] sm:$0xff]  ;;  %v6246_v3 = vpack.c.bf16 %v44_v1, %v43_v0  ;;  %v138_v4 = vld [vmem:[#allocation2 + $0x10] sm:$0xff]  ;;  %v139_v5 = vld [vmem:[#allocation2 + $0x18] sm:$0xff]  ;;  %vm247_vm4 = vcmask 261120   ;;  %vm335_vm5 = vcmask 64512   ;;  %s6946_s19 = smov 120  }
  0x14   :  { %5800 = vmatprep.mubr.msk.f32.mxu0 %vm50_vm0, %v41_v2  ;;  %v6250_v6 = vpack.c.bf16 %v139_v5, %v138_v4  ;;  %v140_v7 = vld [vmem:[#allocation2 + $0x20] sm:$0xff]  ;;  %v141_v8 = vld [vmem:[#allocation2 + $0x28] sm:$0xff]  ;;  %v142_v11 = vld [vmem:[#allocation2 + $0x30] sm:$0xff]  ;;  %s6947_s20 = smov 96   ;;  %s6948_s21 = smov 88   ;;  %vm1172_vm7 = vcmask 195584  }
  0x15   :  { %6247 = vmatprep.subr.bf16.mxu0 %v6246_v3  ;;  %v6254_v9 = vpack.c.bf16 %v141_v8, %v140_v7  ;;  %v42_v10 = vld [vmem:[%s7747_s0 + $0x8] sm:$0xff]  ;;  %v143_v12 = vld [vmem:[#allocation2 + $0x38] sm:$0xff]  ;;  %v144_v14 = vld [vmem:[#allocation2 + $0x40] sm:$0xff]  ;;  %s6949_s26 = smov 64   ;;  %s6950_s27 = smov 80  }
  0x16   :  { %6249 = vmatpush3.bf16.msra.mxu0 %v6246_v3  ;;  %6251 = vmatprep.subr.bf16.mxu1 %v6250_v6  ;;  %v6258_v13 = vpack.c.bf16 %v143_v12, %v142_v11  ;;  %v145_v15 = vld [vmem:[#allocation2 + $0x48] sm:$0xff]  ;;  %v233_v17 = vld [vmem:[#allocation2 + $0x50] sm:$0xff]  ;;  %v234_v18 = vld [vmem:[#allocation2 + $0x58] sm:$0xff]  ;;  %s6951_s28 = smov 56   ;;  %s6952_s29 = smov 112  }
  0x17   :  { %6253 = vmatpush3.bf16.msra.mxu1 %v6250_v6  ;;  %v6262_v16 = vpack.c.bf16 %v145_v15, %v144_v14  ;;  %v6266_v19 = vpack.c.bf16 %v234_v18, %v233_v17  ;;  %v5383_v20 = vld [vmem:[%s7752_s5] ss:$0 sm:$0xff]  ;;  %v236_v30 = vld [vmem:[#allocation2 + $0x68] sm:$0xff]  ;;  %v5386_v32 = vld [vmem:[%s7752_s5 + $0x1] ss:$0 sm:$0xff]  ;;  %s6953_s30 = smov 72  }
  0x18   :  { %6255 = vmatprep.subr.bf16.mxu1 %v6254_v9  ;;  %v235_v29 = vld [vmem:[#allocation2 + $0x60] sm:$0xff]  ;;  %vm7054_vm6 = vmpackc.low %vm335_vm5, %vm335_vm5  ;;  %v7073_v55 = vld [vmem:[%s7748_s1 + $0x8] sm:$0xff]  ;;  %s6954_s7 = smov 104   ;;  %s6955_s9 = smov 48  }
  0x19   :  { %5801 = vmatmul.mubr.msk.f32.vlgmr.msra.gmra.mrb[0].mxu0 %vm50_vm0, %v42_v10  ;;  %6267 = vmatprep.subr.bf16.mxu0 %v6266_v19  ;;  %v6270_v31 = vpack.c.bf16 %v236_v30, %v235_v29  ;;  %v5389_v37 = vld [vmem:[%s7752_s5 + $0x2] ss:$0 sm:$0xff]  ;;  %s6956_s10 = smov 40   ;;  %s6957_s11 = smov 16  }
  0x1a   :  { %6269 = vmatpush3.bf16.msra.mxu0 %v6266_v19  ;;  %v7078_v58 = vld [vmem:[%s7748_s1] sm:$0xff]  ;;  %s6958_s12 = smov 24  }
  0x1b   :  { %6257 = vmatpush3.bf16.msra.mxu1 %v6254_v9  ;;  %6271 = vmatprep.subr.bf16.mxu0 %v6270_v31 }
  0x1c   :  { %6259 = vmatprep.subr.bf16.mxu1 %v6258_v13 }
  0x1e   :  { %6273 = vmatpush3.bf16.msra.mxu0 %v6270_v31 }
  0x1f   :  { %6261 = vmatpush3.bf16.msra.mxu1 %v6258_v13 }
  0x20   :  { %6263 = vmatprep.subr.bf16.mxu1 %v6262_v16 }
  0x23   :  { %6265 = vmatpush3.bf16.msra.mxu1 %v6262_v16 }
  0xec   :  { %v5802_v21 = vpop.f32.mrb[0].mxu0 }
  0xed   :  { %v129_v22 = vadd.f32 %v5802_v21, %v5383_v20  ;;  %v123_v23 = vpop.f32.mrb[1].mxu0 }
  0xee   :  { %v124_v24 = vadd.f32 %v5383_v20, %v123_v23 }
  0xef   :  { %v135_v25 = vmul.f32 0.01, %v129_v22  ;;  %vm133_vm1 = vcmp.gt.f32.partialorder %v129_v22, 0.0 }
  0xf0   :  { %vm132_vm2 = vcmp.gt.f32.partialorder %v124_v24, 0.0  ;;  %v134_v26 = vmul.f32 0.01, %v124_v24 }
  0xf1   :  { %v137_v28 = vsel %vm133_vm1, %v129_v22, %v135_v25 }
  0xf2   :  { %v136_v27 = vsel %vm132_vm2, %v124_v24, %v134_v26 }
  0xf3   :  { %5819 = vmatprep.mubr.msk.f32.mxu1 %vm151_vm3, %v136_v27 }
  0xf4   :  { %5820 = vmatmul.mubr.msk.f32.vlgmr.msra.gmra.mrb[0].mxu1 %vm151_vm3, %v137_v28 }
 0x1c7   :  { %v5821_v33 = vpop.f32.mrb[0].mxu1 }
 0x1c8   :  { %v224_v34 = vpop.f32.mrb[1].mxu1  ;;  %v7025_v36 = vadd.f32 %v5821_v33, %v5386_v32 }
 0x1c9   :  { %v7023_v35 = vadd.f32 %v5386_v32, %v224_v34 }
 0x1cb   :  { %5830 = vmatprep.mubr.msk.f32.mxu0 %vm247_vm4, %v7023_v35 }
 0x1cc   :  { %5831 = vmatmul.mubr.msk.f32.vlgmr.msra.gmra.mrb[2].mxu0 %vm247_vm4, %v7025_v36 }
 0x29f   :  { %v5832_v38 = vpop.f32.mrb[2].mxu0 }
 0x2a0   :  { %v7034_v39 = vadd.f32 %v5832_v38, %v5389_v37  ;;  %v320_v40 = vpop.f32.mrb[3].mxu0 }
 0x2a1   :  { %v7036_v41 = vadd.f32 %v5389_v37, %v320_v40 }
 0x2a3   :  { %532 = vrot.lane.b32.xlu1 %v7036_v41, %s6946_s19  ;;  %5837 = vmatprep.mubr.msk.f32.mxu0 %vm335_vm5, %v7036_v41  ;;  %v7044_v42 = vpack.i.bf16 %v7034_v39, %v7036_v41 }
 0x2a5   :  { %6595 = vrot.lane.b32.xlu0 %v7044_v42, %s6947_s20 }
 0x2a7   :  { %534 = vrot.lane.b32.xlu1 %v7034_v39, %s6946_s19 }
 0x2a9   :  { %6600 = vrot.lane.b32.xlu0 %v7044_v42, %s6948_s21 }
 0x315   :  { %v533_v52 = vpop.permute.xlu1 %532 }
 0x317   :  { %v6596_v43 = vpop.permute.xlu0 %6595 }
 0x318   :  { %v6598_v44 = vunpack.i.h.bf16 %v6596_v43  ;;  %v6597_v45 = vunpack.i.l.bf16 %v6596_v43 }
 0x319   :  { %v535_v53 = vpop.permute.xlu1 %534 }
 0x31a   :  { %v6274_v47 = vpack.c.bf16 %v6598_v44, %v6597_v45 }
 0x31b   :  { %v6601_v48 = vpop.permute.xlu0 %6600 }
 0x31c   :  { %v6603_v49 = vunpack.i.h.bf16 %v6601_v48  ;;  %v6602_v50 = vunpack.i.l.bf16 %v6601_v48  ;;  %6276 = vmatprep.subr.msk.bf16.mxu0 %vm7054_vm6, %v6274_v47 }
 0x31d   :  { %6279 = vmatpush3.bf16.xpose.msk.msra.mxu0 %vm7054_vm6, %v6274_v47 }
 0x31e   :  { %v6284_v51 = vpack.c.bf16 %v6603_v49, %v6602_v50 }
 0x320   :  { %6286 = vmatprep.subr.msk.bf16.mxu0 %vm7054_vm6, %v6284_v51 }
 0x324   :  { %5838 = vmatmul.mubr.msk.f32.vlgmr.msra.gmra.mrb[4].mxu0 %vm335_vm5, %v7034_v39 }
 0x325   :  { %6289 = vmatpush3.bf16.xpose.msk.msra.mxu0 %vm7054_vm6, %v6284_v51  ;;  %5851 = vmatprep.mubr.msk.f32.mxu0 %vm335_vm5, %v533_v52 }
 0x32c   :  { %5852 = vmatmul.mubr.msk.f32.vlgmr.msra.gmra.mrb[6].mxu0 %vm335_vm5, %v535_v53 }
 0x3f7   :  { %v5839_v54 = vpop.f32.mrb[4].mxu0 }
 0x3f8   :  { %v420_v56 = vmul.f32 0.35355338, %v5839_v54  ;;  %v410_v57 = vpop.f32.mrb[5].mxu0 }
 0x3f9   :  { %v419_v59 = vmul.f32 0.35355338, %v410_v57 }
 0x3fa   :  { %v422_v60 = vadd.f32 %v420_v56, %v7073_v55 }
 0x3fb   :  { %v421_v61 = vadd.f32 %v419_v59, %v7078_v58 }
 0x3fc   :  { %v426_v62 = vsel %vm50_vm0, %v422_v60, -inf }
 0x3fd   :  { %427 = vmax.xlane.f32.xlu1 %v426_v62  ;;  %v423_v63 = vsel %vm50_vm0, %v421_v61, -inf }
 0x3fe   :  { %424 = vmax.xlane.f32.xlu0 %v423_v63 }
 0x3ff   :  { %v5853_v0 = vpop.f32.mrb[6].mxu0 }
 0x400   :  { %v614_v1 = vpop.f32.mrb[7].mxu0  ;;  %v624_v2 = vmul.f32 0.35355338, %v5853_v0 }
 0x401   :  { %v623_v3 = vmul.f32 0.35355338, %v614_v1 }
 0x402   :  { %v626_v6 = vadd.f32 %v624_v2, %v7073_v55 }
 0x403   :  { %v625_v4 = vadd.f32 %v623_v3, %v7078_v58 }
 0x404   :  { %v630_v7 = vsel %vm50_vm0, %v626_v6, -inf }
 0x405   :  { %v627_v5 = vsel %vm50_vm0, %v625_v4, -inf }
 0x406   :  { %628 = vmax.xlane.f32.xlu0 %v627_v5 }
 0x40a   :  { %631 = vmax.xlane.f32.xlu0 %v630_v7 }
 0x40e   :  { %6605 = vrot.lane.b32.xlu1 %v7044_v42, %s6949_s26 }
 0x48a   :  { %v428_v8 = vpop.xlane.xlu1 %427 }
 0x48b   :  { %v430_v9 = vsub.f32 %v422_v60, %v428_v8  ;;  %v425_v10 = vpop.xlane.xlu0 %424 }
 0x48c   :  { %v429_v11 = vsub.f32 %v421_v61, %v425_v10 }
 0x48d   :  { %v433_v12 = vmul.f32 1.442695, %v430_v9 }
 0x48e   :  { %v431_v13 = vmul.f32 1.442695, %v429_v11  ;;  %v6606_v14 = vpop.permute.xlu1 %6605 }
 0x48f   :  { %6759 = vpow2.f32 %v433_v12  ;;  %v6608_v15 = vunpack.i.h.bf16 %v6606_v14  ;;  %v6607_v16 = vunpack.i.l.bf16 %v6606_v14 }
 0x490   :  { %6761 = vpow2.f32 %v431_v13 }
 0x491   :  { %v6280_v17 = vpack.c.bf16 %v6608_v15, %v6607_v16 }
 0x493   :  { %6281 = vmatprep.subr.bf16.mxu1 %v6280_v17  ;;  %v629_v18 = vpop.xlane.xlu0 %628 }
 0x494   :  { %6283 = vmatpush3.bf16.msra.mxu1 %v6280_v17  ;;  %v633_v28 = vsub.f32 %v625_v4, %v629_v18 }
 0x496   :  { %v635_v29 = vmul.f32 1.442695, %v633_v28 }
 0x497   :  { %v632_v19 = vpop.xlane.xlu0 %631 }
 0x498   :  { %v634_v20 = vsub.f32 %v626_v6, %v632_v19 }
 0x499   :  { %v6760_v21 = vpop.eup %6759 }
 0x49a   :  { %v6762_v22 = vpop.eup %6761  ;;  %v637_v23 = vmul.f32 1.442695, %v634_v20  ;;  %v438_v24 = vsel %vm50_vm0, %v6760_v21, 0.0 }
 0x49b   :  { %439 = vadd.xlane.f32.xlu0 %v438_v24  ;;  %v435_v25 = vsel %vm50_vm0, %v6762_v22, 0.0 }
 0x49c   :  { %6763 = vpow2.f32 %v637_v23  ;;  %436 = vadd.xlane.f32.xlu1 %v435_v25 }
 0x49d   :  { %6765 = vpow2.f32 %v635_v29 }
 0x4a6   :  { %v6764_v26 = vpop.eup %6763 }
 0x4a7   :  { %v642_v27 = vsel %vm50_vm0, %v6764_v26, 0.0  ;;  %v6766_v30 = vpop.eup %6765 }
 0x4a8   :  { %643 = vadd.xlane.f32.xlu0 %v642_v27  ;;  %v639_v31 = vsel %vm50_vm0, %v6766_v30, 0.0 }
 0x4ad   :  { %6615 = vrot.lane.b32.xlu1 %v7044_v42, %s6950_s27 }
 0x4be   :  { %6610 = vrot.lane.b32.xlu0 %v7044_v42, %s6951_s28 }
 0x4c2   :  { %738 = vrot.lane.b32.xlu0 %v7034_v39, %s6952_s29 }
 0x4d1   :  { %640 = vadd.xlane.f32.xlu1 %v639_v31 }
 0x4e2   :  { %736 = vrot.lane.b32.xlu1 %v7036_v41, %s6952_s29 }
 0x528   :  { %v440_v32 = vpop.xlane.xlu0 %439 }
 0x529   :  { %6767 = vrcp.f32 %v440_v32  ;;  %v437_v33 = vpop.xlane.xlu1 %436 }
 0x52a   :  { %6769 = vrcp.f32 %v437_v33 }
 0x52d   :  { %v6616_v44 = vpop.permute.xlu1 %6615 }
 0x52e   :  { %v6618_v47 = vunpack.i.h.bf16 %v6616_v44  ;;  %v6617_v48 = vunpack.i.l.bf16 %v6616_v44 }
 0x530   :  { %v6294_v52 = vpack.c.bf16 %v6618_v47, %v6617_v48 }
 0x533   :  { %v6768_v34 = vpop.eup %6767 }
 0x534   :  { %v6770_v37 = vpop.eup %6769  ;;  %v444_v43 = vmul.f32 %v6768_v34, %v6760_v21 }
 0x535   :  { %v644_v38 = vpop.xlane.xlu0 %643  ;;  %v443_v40 = vmul.f32 %v6770_v37, %v6762_v22 }
 0x536   :  { %6771 = vrcp.f32 %v644_v38 }
 0x537   :  { %5844 = vmatprep.mubr.msk.f32.mxu1 %vm50_vm0, %v443_v40 }
 0x538   :  { %5845 = vmatmul.mubr.msk.f32.vlgmr.msra.gmra.mrb[2].mxu1 %vm50_vm0, %v444_v43 }
 0x539   :  { %v6611_v45 = vpop.permute.xlu0 %6610 }
 0x53a   :  { %v6613_v49 = vunpack.i.h.bf16 %v6611_v45  ;;  %v6612_v50 = vunpack.i.l.bf16 %v6611_v45 }
 0x53c   :  { %v6290_v51 = vpack.c.bf16 %v6613_v49, %v6612_v50 }
 0x53d   :  { %v739_v61 = vpop.permute.xlu0 %738 }
 0x53e   :  { %6291 = vmatprep.subr.bf16.mxu1 %v6290_v51 }
 0x53f   :  { %6293 = vmatpush3.bf16.msra.mxu1 %v6290_v51 }
 0x540   :  { %6296 = vmatprep.subr.msk.bf16.mxu1 %vm7054_vm6, %v6294_v52  ;;  %v6772_v54 = vpop.eup %6771 }
 0x541   :  { %v648_v59 = vmul.f32 %v6772_v54, %v6764_v26 }
 0x55e   :  { %v641_v53 = vpop.xlane.xlu1 %640 }
 0x55f   :  { %6773 = vrcp.f32 %v641_v53 }
 0x562   :  { %v737_v60 = vpop.permute.xlu1 %736 }
 0x569   :  { %v6774_v56 = vpop.eup %6773 }
 0x56a   :  { %v647_v57 = vmul.f32 %v6774_v56, %v6766_v30 }
 0x56c   :  { %5858 = vmatprep.mubr.msk.f32.mxu1 %vm50_vm0, %v647_v57 }
 0x56d   :  { %5859 = vmatmul.mubr.msk.f32.vlgmr.msra.gmra.mrb[4].mxu1 %vm50_vm0, %v648_v59 }
 0x56e   :  { %6299 = vmatpush3.bf16.xpose.msk.msra.mxu1 %vm7054_vm6, %v6294_v52  ;;  %5865 = vmatprep.mubr.msk.f32.mxu1 %vm335_vm5, %v737_v60 }
 0x575   :  { %5866 = vmatmul.mubr.msk.f32.vlgmr.msra.gmra.mrb[6].mxu1 %vm335_vm5, %v739_v61 }
 0x60b   :  { %v7112_v62 = vpop.f32.mrb[2].mxu1 }
 0x60c   :  { %v7114_v63 = vpop.f32.mrb[3].mxu1 }
 0x640   :  { %v7116_v0 = vpop.f32.mrb[4].mxu1 }
 0x641   :  { %v7118_v1 = vpop.f32.mrb[5].mxu1 }
 0x648   :  { %v5867_v2 = vpop.f32.mrb[6].mxu1 }
 0x649   :  { %v828_v3 = vmul.f32 0.35355338, %v5867_v2  ;;  %v818_v4 = vpop.f32.mrb[7].mxu1 }
 0x64a   :  { %v827_v5 = vmul.f32 0.35355338, %v818_v4 }
 0x64b   :  { %v830_v6 = vadd.f32 %v828_v3, %v7073_v55 }
 0x64c   :  { %v829_v7 = vadd.f32 %v827_v5, %v7078_v58 }
 0x64d   :  { %v834_v8 = vsel %vm50_vm0, %v830_v6, -inf }
 0x64e   :  { %835 = vmax.xlane.f32.xlu0 %v834_v8  ;;  %v831_v9 = vsel %vm50_vm0, %v829_v7, -inf }
 0x64f   :  { %832 = vmax.xlane.f32.xlu1 %v831_v9 }
 0x6db   :  { %v836_v10 = vpop.xlane.xlu0 %835 }
 0x6dc   :  { %v838_v11 = vsub.f32 %v830_v6, %v836_v10  ;;  %v833_v12 = vpop.xlane.xlu1 %832  ;;  %v239_v10 = vld [vmem:[#allocation2 + $0x78] sm:$0xff] }
 0x6dd   :  { %v837_v13 = vsub.f32 %v829_v7, %v833_v12 }
 0x6de   :  { %v841_v14 = vmul.f32 1.442695, %v838_v11  ;;  %v240_v11 = vld [vmem:[#allocation2 + $0x80] sm:$0xff] }
 0x6df   :  { %v839_v15 = vmul.f32 1.442695, %v837_v13  ;;  %v241_v13 = vld [vmem:[#allocation2 + $0x88] sm:$0xff] }
 0x6e0   :  { %6775 = vpow2.f32 %v841_v14  ;;  %v6318_v14 = vpack.c.bf16 %v241_v13, %v240_v11  ;;  %v5420_v11 = vld [vmem:[%s7752_s5 + $0x5] ss:$0 sm:$0xff] }
 0x6e1   :  { %6777 = vpow2.f32 %v839_v15 }
 0x6ea   :  { %v6776_v16 = vpop.eup %6775 }
 0x6eb   :  { %v6778_v17 = vpop.eup %6777  ;;  %v846_v18 = vsel %vm50_vm0, %v6776_v16, 0.0 }
 0x6ec   :  { %847 = vadd.xlane.f32.xlu1 %v846_v18  ;;  %v843_v19 = vsel %vm50_vm0, %v6778_v17, 0.0 }
 0x6ed   :  { %844 = vadd.xlane.f32.xlu0 %v843_v19 }
 0x6fd   :  { %6625 = vrot.lane.b32.xlu1 %v7044_v42, %s6953_s30 }
 0x701   :  { %940 = vrot.lane.b32.xlu1 %v7036_v41, %s6954_s7 }
 0x703   :  { %6620 = vrot.lane.b32.xlu0 %v7044_v42, %s6955_s9 }
 0x707   :  { %942 = vrot.lane.b32.xlu0 %v7034_v39, %s6954_s7 }
 0x779   :  { %v848_v20 = vpop.xlane.xlu1 %847 }
 0x77a   :  { %6779 = vrcp.f32 %v848_v20  ;;  %v845_v21 = vpop.xlane.xlu0 %844 }
 0x77b   :  { %6781 = vrcp.f32 %v845_v21 }
 0x77d   :  { %v6626_v22 = vpop.permute.xlu1 %6625 }
 0x77e   :  { %v6621_v23 = vpop.permute.xlu0 %6620  ;;  %v6628_v24 = vunpack.i.h.bf16 %v6626_v22  ;;  %v6627_v25 = vunpack.i.l.bf16 %v6626_v22 }
 0x77f   :  { %v6623_v26 = vunpack.i.h.bf16 %v6621_v23  ;;  %v6622_v27 = vunpack.i.l.bf16 %v6621_v23 }
 0x780   :  { %v6304_v29 = vpack.c.bf16 %v6628_v24, %v6627_v25 }
 0x781   :  { %v6300_v28 = vpack.c.bf16 %v6623_v26, %v6622_v27  ;;  %v941_v32 = vpop.permute.xlu1 %940 }
 0x782   :  { %v943_v33 = vpop.permute.xlu0 %942 }
 0x783   :  { %6301 = vmatprep.subr.bf16.mxu0 %v6300_v28 }
 0x784   :  { %v6780_v41 = vpop.eup %6779  ;;  %6303 = vmatpush3.bf16.msra.mxu0 %v6300_v28 }
 0x785   :  { %v6782_v30 = vpop.eup %6781  ;;  %6306 = vmatprep.subr.msk.bf16.mxu0 %vm7054_vm6, %v6304_v29  ;;  %v852_v31 = vmul.f32 %v6780_v41, %v6776_v16 }
 0x786   :  { %v851_v39 = vmul.f32 %v6782_v30, %v6778_v17 }
 0x788   :  { %5872 = vmatprep.mubr.msk.f32.mxu0 %vm50_vm0, %v851_v39 }
 0x789   :  { %5873 = vmatmul.mubr.msk.f32.vlgmr.msra.gmra.mrb[8].mxu0 %vm50_vm0, %v852_v31 }
 0x78a   :  { %5879 = vmatprep.mubr.msk.f32.mxu0 %vm335_vm5, %v941_v32 }
 0x78d   :  { %6309 = vmatpush3.bf16.xpose.msk.msra.mxu0 %vm7054_vm6, %v6304_v29 }
 0x794   :  { %5880 = vmatmul.mubr.msk.f32.vlgmr.msra.gmra.mrb[10].mxu0 %vm335_vm5, %v943_v33 }
 0x85c   :  { %v5874_v34 = vpop.f32.mrb[8].mxu0 }
 0x85d   :  { %v931_v37 = vpop.f32.mrb[9].mxu0 }
 0x867   :  { %v5881_v38 = vpop.f32.mrb[10].mxu0 }
 0x868   :  { %v1032_v40 = vmul.f32 0.35355338, %v5881_v38  ;;  %v1022_v43 = vpop.f32.mrb[11].mxu0 }
 0x869   :  { %v1031_v44 = vmul.f32 0.35355338, %v1022_v43 }
 0x86a   :  { %v1034_v45 = vadd.f32 %v1032_v40, %v7073_v55 }
 0x86b   :  { %v1033_v47 = vadd.f32 %v1031_v44, %v7078_v58 }
 0x86c   :  { %v1038_v48 = vsel %vm50_vm0, %v1034_v45, -inf }
 0x86d   :  { %1039 = vmax.xlane.f32.xlu0 %v1038_v48  ;;  %v1035_v49 = vsel %vm50_vm0, %v1033_v47, -inf }
 0x86e   :  { %1036 = vmax.xlane.f32.xlu1 %v1035_v49  ;;  %v1304_v49 = vld [vmem:[#allocation2 + $0x98] sm:$0xff] }
 0x8fa   :  { %v1040_v50 = vpop.xlane.xlu0 %1039 }
 0x8fb   :  { %v1042_v51 = vsub.f32 %v1034_v45, %v1040_v50  ;;  %v1037_v52 = vpop.xlane.xlu1 %1036  ;;  %v1305_v50 = vld [vmem:[#allocation2 + $0xa0] sm:$0xff] }
 0x8fc   :  { %v1041_v53 = vsub.f32 %v1033_v47, %v1037_v52  ;;  %v1306_v52 = vld [vmem:[#allocation2 + $0xa8] sm:$0xff] }
 0x8fd   :  { %v1045_v54 = vmul.f32 1.442695, %v1042_v51 }
 0x8fe   :  { %v1043_v56 = vmul.f32 1.442695, %v1041_v53  ;;  %v6326_v53 = vpack.c.bf16 %v1306_v52, %v1305_v50 }
 0x8ff   :  { %6783 = vpow2.f32 %v1045_v54  ;;  %v1395_v54 = vld [vmem:[#allocation2 + $0xb0] sm:$0xff] }
 0x900   :  { %6785 = vpow2.f32 %v1043_v56  ;;  %v1396_v56 = vld [vmem:[#allocation2 + $0xb8] sm:$0xff] }
 0x909   :  { %v6784_v57 = vpop.eup %6783 }
 0x90a   :  { %v6786_v59 = vpop.eup %6785  ;;  %v1050_v60 = vsel %vm50_vm0, %v6784_v57, 0.0 }
 0x90b   :  { %1051 = vadd.xlane.f32.xlu1 %v1050_v60  ;;  %v1047_v61 = vsel %vm50_vm0, %v6786_v59, 0.0  ;;  %v1398_v60 = vld [vmem:[#allocation2 + $0xc8] sm:$0xff] }
 0x90c   :  { %1048 = vadd.xlane.f32.xlu0 %v1047_v61 }
 0x91c   :  { %1146 = vrot.lane.b32.xlu1 %v7118_v1, %s6945_s8 }
 0x920   :  { %1148 = vrot.lane.b32.xlu1 %v7116_v0, %s6945_s8 }
 0x922   :  { %6630 = vrot.lane.b32.xlu0 %v7044_v42, %s6956_s10  ;;  %v238_v42 = vld [vmem:[#allocation2 + $0x70] sm:$0xff] }
 0x923   :  { %v6314_v12 = vpack.c.bf16 %v239_v10, %v238_v42  ;;  %v5419_v42 = vld [vmem:[%s7752_s5 + $0x4] ss:$0 sm:$0xff] }
 0x924   :  { %1156 = vrot.lane.b32.xlu1 %v5874_v34, %s6957_s11 }
 0x926   :  { %1154 = vrot.lane.b32.xlu0 %v931_v37, %s6957_s11 }
 0x998   :  { %v1052_v2 = vpop.xlane.xlu1 %1051 }
 0x999   :  { %6787 = vrcp.f32 %v1052_v2  ;;  %v1049_v3 = vpop.xlane.xlu0 %1048  ;;  %v1399_v2 = vld [vmem:[#allocation2 + $0xd0] sm:$0xff] }
 0x99a   :  { %6789 = vrcp.f32 %v1049_v3  ;;  %v1400_v3 = vld [vmem:[#allocation2 + $0xd8] sm:$0xff] }
 0x99c   :  { %v1147_v17 = vpop.permute.xlu1 %1146 }
 0x99d   :  { %v6631_v4 = vpop.permute.xlu0 %6630  ;;  %v1168_v21 = vsel %vm335_vm5, %v7114_v63, %v1147_v17  ;;  %v5416_v63 = vld [vmem:[%s7752_s5 + $0x3] ss:$0 sm:$0xff] }
 0x99e   :  { %v6633_v5 = vunpack.i.h.bf16 %v6631_v4  ;;  %v6632_v6 = vunpack.i.l.bf16 %v6631_v4  ;;  %v6338_v4 = vpack.c.bf16 %v1400_v3, %v1399_v2  ;;  %v5427_v2 = vld [vmem:[%s7752_s5 + $0x8] ss:$0 sm:$0xff] }
 0x9a0   :  { %v6310_v1 = vpack.c.bf16 %v6633_v5, %v6632_v6  ;;  %v1149_v18 = vpop.permute.xlu1 %1148 }
 0x9a1   :  { %v1155_v20 = vpop.permute.xlu0 %1154  ;;  %v1169_v23 = vsel %vm335_vm5, %v7112_v62, %v1149_v18  ;;  %v1401_v18 = vld [vmem:[#allocation2 + $0xe0] sm:$0xff] }
 0x9a2   :  { %6311 = vmatprep.subr.bf16.mxu1 %v6310_v1  ;;  %v1170_v24 = vsel %vm50_vm0, %v1168_v21, %v1155_v20  ;;  %v5421_v21 = vld [vmem:[%s7752_s5 + $0x6] ss:$0 sm:$0xff] }
 0x9a3   :  { %v6788_v7 = vpop.eup %6787  ;;  %6313 = vmatpush3.bf16.msra.mxu1 %v6310_v1 }
 0x9a4   :  { %v6790_v0 = vpop.eup %6789  ;;  %v1056_v9 = vmul.f32 %v6788_v7, %v6784_v57  ;;  %6315 = vmatprep.subr.bf16.mxu1 %v6314_v12  ;;  %v1157_v19 = vpop.permute.xlu1 %1156  ;;  %v1397_v57 = vld [vmem:[#allocation2 + $0xc0] sm:$0xff] }
 0x9a5   :  { %v1055_v8 = vmul.f32 %v6790_v0, %v6786_v59  ;;  %v1171_v26 = vsel %vm50_vm0, %v1169_v23, %v1157_v19  ;;  %v6330_v59 = vpack.c.bf16 %v1396_v56, %v1395_v54  ;;  %v6334_v61 = vpack.c.bf16 %v1398_v60, %v1397_v57  ;;  %v1402_v19 = vld [vmem:[#allocation2 + $0xe8] sm:$0xff] }
 0x9a6   :  { %v6342_v20 = vpack.c.bf16 %v1402_v19, %v1401_v18 }
 0x9a7   :  { %5886 = vmatprep.mubr.msk.f32.mxu1 %vm50_vm0, %v1055_v8 }
 0x9a8   :  { %5887 = vmatmul.mubr.msk.f32.vlgmr.msra.gmra.mrb[8].mxu1 %vm50_vm0, %v1056_v9 }
 0x9a9   :  { %6317 = vmatpush3.bf16.msra.mxu1 %v6314_v12 }
 0x9aa   :  { %6319 = vmatprep.subr.bf16.mxu1 %v6318_v14 }
 0x9ad   :  { %6321 = vmatpush3.bf16.msra.mxu1 %v6318_v14 }
 0x9ae   :  { %6331 = vmatprep.subr.bf16.mxu1 %v6330_v59 }
 0xa7b   :  { %v5888_v15 = vpop.f32.mrb[8].mxu1 }
 0xa7c   :  { %1164 = vrot.lane.b32.xlu1 %v5888_v15, %s6958_s12  ;;  %v1135_v16 = vpop.f32.mrb[9].mxu1 }
 0xa7d   :  { %1162 = vrot.lane.b32.xlu0 %v1135_v16, %s6958_s12 }
 0xaee   :  { %v1165_v22 = vpop.permute.xlu1 %1164 }
 0xaef   :  { %v1163_v25 = vpop.permute.xlu0 %1162  ;;  %v1174_v28 = vsel %vm1172_vm7, %v1171_v26, %v1165_v22 }
 0xaf0   :  { %v1173_v27 = vsel %vm1172_vm7, %v1170_v24, %v1163_v25 }
 0xaf1   :  { %5897 = vmatprep.mubr.msk.f32.mxu1 %vm247_vm4, %v1173_v27 }
 0xaf2   :  { %5898 = vmatmul.mubr.msk.f32.vlgmr.msra.gmra.mrb[10].mxu1 %vm247_vm4, %v1174_v28  ;;  %v5424_v28 = vld [vmem:[%s7752_s5 + $0x7] ss:$0 sm:$0xff] }
 0xaf3   :  { %6333 = vmatpush3.bf16.msra.mxu1 %v6330_v59 }
 0xaf4   :  { %6335 = vmatprep.subr.bf16.mxu1 %v6334_v61 }
 0xaf7   :  { %6337 = vmatpush3.bf16.msra.mxu1 %v6334_v61 }
 0xaf8   :  { %6339 = vmatprep.subr.bf16.mxu1 %v6338_v4 }
 0xafb   :  { %6341 = vmatpush3.bf16.msra.mxu1 %v6338_v4 }
 0xafc   :  { %6343 = vmatprep.subr.bf16.mxu1 %v6342_v20 }
 0xaff   :  { %6345 = vmatpush3.bf16.msra.mxu1 %v6342_v20 }
 0xbc5   :  { %v5899_v29 = vpop.f32.mrb[10].mxu1 }
 0xbc6   :  { %v1257_v41 = vadd.f32 %v5899_v29, %v5416_v63  ;;  %v1251_v62 = vpop.f32.mrb[11].mxu1 }
 0xbc7   :  { %v1252_v30 = vadd.f32 %v5416_v63, %v1251_v62 }
 0xbc8   :  { %v1261_v39 = vadd.f32 %v1257_v41, %v7025_v36 }
 0xbc9   :  { %v1260_v31 = vadd.f32 %v1252_v30, %v7023_v35  ;;  %v1303_v35 = vld [vmem:[#allocation2 + $0x90] sm:$0xff] }
 0xbca   :  { %v1267_v32 = vsel %vm247_vm4, %v1261_v39, 0.0  ;;  %v6322_v51 = vpack.c.bf16 %v1304_v49, %v1303_v35  ;;  %v1532_v35 = vld [vmem:[#allocation2 + $0xf8] sm:$0xff]  ;;  %v1533_v49 = vld [vmem:[#allocation2 + $0x100] sm:$0xff] }
 0xbcb   :  { %1268 = vadd.xlane.f32.xlu1 %v1267_v32  ;;  %v1264_v33 = vsel %vm247_vm4, %v1260_v31, 0.0 }
 0xbcc   :  { %1265 = vadd.xlane.f32.xlu0 %v1264_v33  ;;  %6323 = vmatprep.subr.bf16.mxu0 %v6322_v51 }
 0xbcd   :  { %6325 = vmatpush3.bf16.msra.mxu0 %v6322_v51  ;;  %v1534_v51 = vld [vmem:[#allocation2 + $0x108] sm:$0xff] }
 0xbce   :  { %6327 = vmatprep.subr.bf16.mxu0 %v6326_v53  ;;  %v6350_v52 = vpack.c.bf16 %v1534_v51, %v1533_v49 }
 0xbd1   :  { %6329 = vmatpush3.bf16.msra.mxu0 %v6326_v53 }
 0xc58   :  { %v1269_v34 = vpop.xlane.xlu1 %1268 }
 0xc59   :  { %v1272_v37 = vmul.f32 0.03125, %v1269_v34  ;;  %v1266_v38 = vpop.xlane.xlu0 %1265 }
 0xc5a   :  { %v1271_v40 = vmul.f32 0.03125, %v1266_v38 }
 0xc5b   :  { %v1274_v43 = vsub.f32 %v1261_v39, %v1272_v37 }
 0xc5c   :  { %v1273_v44 = vsub.f32 %v1260_v31, %v1271_v40 }
 0xc5d   :  { %v1276_v48 = vmul.f32 %v1274_v43, %v1274_v43 }
 0xc5e   :  { %v1275_v45 = vmul.f32 %v1273_v44, %v1273_v44 }
 0xc5f   :  { %v1280_v36 = vsel %vm247_vm4, %v1276_v48, 0.0 }
 0xc60   :  { %v1277_v47 = vsel %vm247_vm4, %v1275_v45, 0.0 }
 0xc61   :  { %1278 = vadd.xlane.f32.xlu0 %v1277_v47 }
 0xc65   :  { %1281 = vadd.xlane.f32.xlu0 %v1280_v36  ;;  %v1531_v36 = vld [vmem:[#allocation2 + $0xf0] sm:$0xff] }
 0xc66   :  { %v6346_v50 = vpack.c.bf16 %v1532_v35, %v1531_v36 }
 0xc68   :  { %6347 = vmatprep.subr.bf16.mxu0 %v6346_v50 }
 0xcee   :  { %v1279_v5 = vpop.xlane.xlu0 %1278 }
 0xcef   :  { %v1283_v6 = vmul.f32 0.03125, %v1279_v5 }
 0xcf1   :  { %v1285_v1 = vadd.f32 1e-05, %v1283_v6  ;;  %v5428_v6 = vld [vmem:[%s7752_s5 + $0x9] ss:$0 sm:$0xff] }
 0xcf2   :  { %v1282_v7 = vpop.xlane.xlu0 %1281 }
 0xcf3   :  { %6791 = vrsqrt.f32 %v1285_v1  ;;  %v1284_v0 = vmul.f32 0.03125, %v1282_v7 }
 0xcf5   :  { %v1286_v8 = vadd.f32 1e-05, %v1284_v0 }
 0xcf7   :  { %6793 = vrsqrt.f32 %v1286_v8 }
 0xcfd   :  { %v6792_v9 = vpop.eup %6791 }
 0xcfe   :  { %v1289_v10 = vmul.f32 %v6792_v9, %v1273_v44  ;;  %v5429_v9 = vld [vmem:[%s7752_s5 + $0xa] ss:$0 sm:$0xff] }
 0xd00   :  { %v1295_v12 = vmul.f32 %v5419_v42, %v1289_v10 }
 0xd01   :  { %v6794_v13 = vpop.eup %6793 }
 0xd02   :  { %v1290_v14 = vmul.f32 %v6794_v13, %v1274_v43  ;;  %v1301_v15 = vadd.f32 %v5420_v11, %v1295_v12 }
 0xd04   :  { %v1296_v16 = vmul.f32 %v5419_v42, %v1290_v14  ;;  %5908 = vmatprep.mubr.msk.f32.mxu0 %vm247_vm4, %v1301_v15 }
 0xd06   :  { %v1302_v17 = vadd.f32 %v5420_v11, %v1296_v16 }
 0xd08   :  { %5909 = vmatmul.mubr.msk.f32.vlgmr.msra.gmra.mrb[12].mxu0 %vm247_vm4, %v1302_v17 }
 0xd09   :  { %6349 = vmatpush3.bf16.msra.mxu0 %v6346_v50 }
 0xd0a   :  { %6351 = vmatprep.subr.bf16.mxu0 %v6350_v52 }
 0xd0d   :  { %6353 = vmatpush3.bf16.msra.mxu0 %v6350_v52 }
 0xddb   :  { %v5910_v22 = vpop.f32.mrb[12].mxu0 }
 0xddc   :  { %v1390_v23 = vadd.f32 %v5910_v22, %v5421_v21  ;;  %v1384_v24 = vpop.f32.mrb[13].mxu0 }
 0xddd   :  { %v1385_v25 = vadd.f32 %v5421_v21, %v1384_v24 }
 0xdde   :  { %v1394_v27 = vmax.f32 %v1390_v23, 0.0 }
 0xddf   :  { %v1393_v26 = vmax.f32 %v1385_v25, 0.0 }
 0xde1   :  { %5927 = vmatprep.mubr.msk.f32.mxu1 %vm151_vm3, %v1393_v26 }
 0xde2   :  { %5928 = vmatmul.mubr.msk.f32.vlgmr.msra.gmra.mrb[12].mxu1 %vm151_vm3, %v1394_v27 }
 0xeb5   :  { %v5929_v63 = vpop.f32.mrb[12].mxu1 }
 0xeb6   :  { %v1486_v29 = vadd.f32 %v5929_v63, %v5424_v28  ;;  %v1480_v41 = vpop.f32.mrb[13].mxu1 }
 0xeb7   :  { %v1481_v62 = vadd.f32 %v5424_v28, %v1480_v41 }
 0xeb8   :  { %v1490_v30 = vadd.f32 %v1486_v29, %v1302_v17 }
 0xeb9   :  { %v1489_v39 = vadd.f32 %v1481_v62, %v1301_v15 }
 0xeba   :  { %v1496_v31 = vsel %vm247_vm4, %v1490_v30, 0.0 }
 0xebb   :  { %1497 = vadd.xlane.f32.xlu0 %v1496_v31  ;;  %v1493_v32 = vsel %vm247_vm4, %v1489_v39, 0.0 }
 0xebc   :  { %1494 = vadd.xlane.f32.xlu1 %v1493_v32 }
 0xf48   :  { %v1498_v33 = vpop.xlane.xlu0 %1497 }
 0xf49   :  { %v1500_v34 = vmul.f32 0.03125, %v1498_v33  ;;  %v1495_v37 = vpop.xlane.xlu1 %1494 }
 0xf4a   :  { %v1499_v38 = vmul.f32 0.03125, %v1495_v37 }
 0xf4b   :  { %v1502_v40 = vsub.f32 %v1490_v30, %v1500_v34 }
 0xf4c   :  { %v1501_v43 = vsub.f32 %v1489_v39, %v1499_v38 }
 0xf4d   :  { %v1504_v44 = vmul.f32 %v1502_v40, %v1502_v40 }
 0xf4e   :  { %v1503_v45 = vmul.f32 %v1501_v43, %v1501_v43 }
 0xf4f   :  { %v1508_v47 = vsel %vm247_vm4, %v1504_v44, 0.0 }
 0xf50   :  { %1509 = vadd.xlane.f32.xlu0 %v1508_v47  ;;  %v1505_v48 = vsel %vm247_vm4, %v1503_v45, 0.0 }
 0xf51   :  { %1506 = vadd.xlane.f32.xlu1 %v1505_v48 }
 0xfdd   :  { %v1510_v53 = vpop.xlane.xlu0 %1509 }
 0xfde   :  { %v1512_v54 = vmul.f32 0.03125, %v1510_v53  ;;  %v1507_v56 = vpop.xlane.xlu1 %1506 }
 0xfdf   :  { %v1511_v57 = vmul.f32 0.03125, %v1507_v56 }
 0xfe0   :  { %v1514_v59 = vadd.f32 1e-05, %v1512_v54 }
 0xfe1   :  { %v1513_v60 = vadd.f32 1e-05, %v1511_v57 }
 0xfe2   :  { %6795 = vrsqrt.f32 %v1514_v59 }
 0xfe3   :  { %6797 = vrsqrt.f32 %v1513_v60 }
 0xfec   :  { %v6796_v61 = vpop.eup %6795 }
 0xfed   :  { %v6798_v3 = vpop.eup %6797  ;;  %v1518_v4 = vmul.f32 %v6796_v61, %v1502_v40 }
 0xfee   :  { %v1517_v5 = vmul.f32 %v6798_v3, %v1501_v43 }
 0xfef   :  { %v1524_v1 = vmul.f32 %v5427_v2, %v1518_v4 }
 0xff0   :  { %v1523_v7 = vmul.f32 %v5427_v2, %v1517_v5 }
 0xff1   :  { %v7207_v8 = vadd.f32 %v5428_v6, %v1524_v1 }
 0xff2   :  { %v7205_v0 = vadd.f32 %v5428_v6, %v1523_v7 }
 0xff4   :  { %5938 = vmatprep.mubr.msk.f32.mxu0 %vm247_vm4, %v7205_v0 }
 0xff5   :  { %5939 = vmatmul.mubr.msk.f32.vlgmr.msra.gmra.mrb[14].mxu0 %vm247_vm4, %v7207_v8 }
0x10c8   :  { %v5940_v42 = vpop.f32.mrb[14].mxu0 }
0x10c9   :  { %v7216_v10 = vadd.f32 %v5940_v42, %v5429_v9  ;;  %v1617_v11 = vpop.f32.mrb[15].mxu0 }
0x10ca   :  { %v7218_v12 = vadd.f32 %v5429_v9, %v1617_v11 }
0x10cc   :  { %5945 = vmatprep.mubr.msk.f32.mxu0 %vm335_vm5, %v7218_v12  ;;  %v7224_v13 = vpack.i.bf16 %v7216_v10, %v7218_v12 }
0x10ce   :  { %6640 = vrot.lane.b32.xlu0 %v7224_v13, %s6948_s21  ;;  %6635 = vrot.lane.b32.xlu1 %v7224_v13, %s6947_s20 }
0x10d2   :  { %1828 = vrot.lane.b32.xlu1 %v7218_v12, %s6946_s19 }
0x10d6   :  { %1830 = vrot.lane.b32.xlu1 %v7216_v10, %s6946_s19 }
0x1140   :  { %v6641_v14 = vpop.permute.xlu0 %6640  ;;  %v6636_v15 = vpop.permute.xlu1 %6635 }
0x1141   :  { %v6643_v16 = vunpack.i.h.bf16 %v6641_v14  ;;  %v6642_v17 = vunpack.i.l.bf16 %v6641_v14  ;;  %v6638_v18 = vunpack.i.h.bf16 %v6636_v15  ;;  %v6637_v19 = vunpack.i.l.bf16 %v6636_v15 }
0x1143   :  { %v6354_v20 = vpack.c.bf16 %v6638_v18, %v6637_v19  ;;  %v6364_v21 = vpack.c.bf16 %v6643_v16, %v6642_v17 }
0x1144   :  { %v1829_v22 = vpop.permute.xlu1 %1828 }
0x1145   :  { %6356 = vmatprep.subr.msk.bf16.mxu0 %vm7054_vm6, %v6354_v20 }
0x1146   :  { %6359 = vmatpush3.bf16.xpose.msk.msra.mxu0 %vm7054_vm6, %v6354_v20 }
0x1147   :  { %6366 = vmatprep.subr.msk.bf16.mxu0 %vm7054_vm6, %v6364_v21 }
0x1148   :  { %v1831_v23 = vpop.permute.xlu1 %1830 }
0x114d   :  { %5946 = vmatmul.mubr.msk.f32.vlgmr.msra.gmra.mrb[16].mxu0 %vm335_vm5, %v7216_v10 }
0x114e   :  { %6369 = vmatpush3.bf16.xpose.msk.msra.mxu0 %vm7054_vm6, %v6364_v21  ;;  %5959 = vmatprep.mubr.msk.f32.mxu0 %vm335_vm5, %v1829_v22 }
0x1155   :  { %5960 = vmatmul.mubr.msk.f32.vlgmr.msra.gmra.mrb[18].mxu0 %vm335_vm5, %v1831_v23 }
0x1220   :  { %v5947_v24 = vpop.f32.mrb[16].mxu0 }
0x1221   :  { %v1716_v25 = vmul.f32 0.35355338, %v5947_v24  ;;  %v1706_v26 = vpop.f32.mrb[17].mxu0 }
0x1222   :  { %v1715_v27 = vmul.f32 0.35355338, %v1706_v26 }
0x1223   :  { %v1718_v28 = vadd.f32 %v1716_v25, %v7073_v55 }
0x1224   :  { %v1717_v63 = vadd.f32 %v1715_v27, %v7078_v58 }
0x1225   :  { %v1722_v29 = vsel %vm50_vm0, %v1718_v28, -inf }
0x1226   :  { %1723 = vmax.xlane.f32.xlu1 %v1722_v29  ;;  %v1719_v41 = vsel %vm50_vm0, %v1717_v63, -inf }
0x1227   :  { %1720 = vmax.xlane.f32.xlu0 %v1719_v41 }
0x1228   :  { %v5961_v62 = vpop.f32.mrb[18].mxu0 }
0x1229   :  { %v1910_v30 = vpop.f32.mrb[19].mxu0  ;;  %v1920_v39 = vmul.f32 0.35355338, %v5961_v62 }
0x122a   :  { %v1919_v31 = vmul.f32 0.35355338, %v1910_v30 }
0x122b   :  { %v1922_v34 = vadd.f32 %v1920_v39, %v7073_v55 }
0x122c   :  { %v1921_v32 = vadd.f32 %v1919_v31, %v7078_v58 }
0x122d   :  { %v1926_v37 = vsel %vm50_vm0, %v1922_v34, -inf }
0x122e   :  { %v1923_v33 = vsel %vm50_vm0, %v1921_v32, -inf }
0x122f   :  { %1924 = vmax.xlane.f32.xlu0 %v1923_v33 }
0x1233   :  { %1927 = vmax.xlane.f32.xlu0 %v1926_v37 }
0x1237   :  { %6645 = vrot.lane.b32.xlu1 %v7224_v13, %s6949_s26 }
0x12b3   :  { %v1724_v38 = vpop.xlane.xlu1 %1723 }
0x12b4   :  { %v1726_v40 = vsub.f32 %v1718_v28, %v1724_v38  ;;  %v1721_v43 = vpop.xlane.xlu0 %1720 }
0x12b5   :  { %v1725_v44 = vsub.f32 %v1717_v63, %v1721_v43 }
0x12b6   :  { %v1729_v45 = vmul.f32 1.442695, %v1726_v40 }
0x12b7   :  { %v1727_v47 = vmul.f32 1.442695, %v1725_v44  ;;  %v6646_v48 = vpop.permute.xlu1 %6645 }
0x12b8   :  { %6799 = vpow2.f32 %v1729_v45  ;;  %v6648_v58 = vunpack.i.h.bf16 %v6646_v48  ;;  %v6647_v36 = vunpack.i.l.bf16 %v6646_v48 }
0x12b9   :  { %6801 = vpow2.f32 %v1727_v47 }
0x12ba   :  { %v6360_v35 = vpack.c.bf16 %v6648_v58, %v6647_v36 }
0x12bc   :  { %6361 = vmatprep.subr.bf16.mxu1 %v6360_v35  ;;  %v1925_v55 = vpop.xlane.xlu0 %1924 }
0x12bd   :  { %6363 = vmatpush3.bf16.msra.mxu1 %v6360_v35  ;;  %v1929_v60 = vsub.f32 %v1921_v32, %v1925_v55  ;;  %v6915_v32 = vld [vmem:[%s7748_s1 + $0x8] sm:$0xff] }
0x12bf   :  { %v1931_v61 = vmul.f32 1.442695, %v1929_v60 }
0x12c0   :  { %v1928_v49 = vpop.xlane.xlu0 %1927 }
0x12c1   :  { %v1930_v50 = vsub.f32 %v1922_v34, %v1928_v49  ;;  %v6916_v34 = vld [vmem:[%s7748_s1] sm:$0xff] }
0x12c2   :  { %v6800_v51 = vpop.eup %6799 }
0x12c3   :  { %v6802_v52 = vpop.eup %6801  ;;  %v1933_v53 = vmul.f32 1.442695, %v1930_v50  ;;  %v1734_v54 = vsel %vm50_vm0, %v6800_v51, 0.0 }
0x12c4   :  { %1735 = vadd.xlane.f32.xlu0 %v1734_v54  ;;  %v1731_v56 = vsel %vm50_vm0, %v6802_v52, 0.0 }
0x12c5   :  { %6803 = vpow2.f32 %v1933_v53  ;;  %1732 = vadd.xlane.f32.xlu1 %v1731_v56 }
0x12c6   :  { %6805 = vpow2.f32 %v1931_v61 }
0x12cf   :  { %v6804_v57 = vpop.eup %6803 }
0x12d0   :  { %v1938_v59 = vsel %vm50_vm0, %v6804_v57, 0.0  ;;  %v6806_v2 = vpop.eup %6805 }
0x12d1   :  { %1939 = vadd.xlane.f32.xlu0 %v1938_v59  ;;  %v1935_v3 = vsel %vm50_vm0, %v6806_v2, 0.0 }
0x12d6   :  { %6655 = vrot.lane.b32.xlu1 %v7224_v13, %s6950_s27 }
0x12e7   :  { %6650 = vrot.lane.b32.xlu0 %v7224_v13, %s6951_s28 }
0x12eb   :  { %2034 = vrot.lane.b32.xlu0 %v7216_v10, %s6952_s29 }
0x12fa   :  { %1936 = vadd.xlane.f32.xlu1 %v1935_v3 }
0x130b   :  { %2032 = vrot.lane.b32.xlu1 %v7218_v12, %s6952_s29 }
0x1351   :  { %v1736_v4 = vpop.xlane.xlu0 %1735 }
0x1352   :  { %6807 = vrcp.f32 %v1736_v4  ;;  %v1733_v5 = vpop.xlane.xlu1 %1732 }
0x1353   :  { %6809 = vrcp.f32 %v1733_v5 }
0x1356   :  { %v6656_v11 = vpop.permute.xlu1 %6655 }
0x1357   :  { %v6658_v15 = vunpack.i.h.bf16 %v6656_v11  ;;  %v6657_v16 = vunpack.i.l.bf16 %v6656_v11 }
0x1359   :  { %v6374_v20 = vpack.c.bf16 %v6658_v15, %v6657_v16 }
0x135c   :  { %v6808_v6 = vpop.eup %6807 }
0x135d   :  { %v6810_v1 = vpop.eup %6809  ;;  %v1740_v42 = vmul.f32 %v6808_v6, %v6800_v51 }
0x135e   :  { %v1940_v7 = vpop.xlane.xlu0 %1939  ;;  %v1739_v9 = vmul.f32 %v6810_v1, %v6802_v52 }
0x135f   :  { %6811 = vrcp.f32 %v1940_v7 }
0x1360   :  { %5952 = vmatprep.mubr.msk.f32.mxu1 %vm50_vm0, %v1739_v9 }
0x1361   :  { %5953 = vmatmul.mubr.msk.f32.vlgmr.msra.gmra.mrb[14].mxu1 %vm50_vm0, %v1740_v42 }
0x1362   :  { %v6651_v14 = vpop.permute.xlu0 %6650 }
0x1363   :  { %v6653_v17 = vunpack.i.h.bf16 %v6651_v14  ;;  %v6652_v18 = vunpack.i.l.bf16 %v6651_v14 }
0x1365   :  { %v6370_v19 = vpack.c.bf16 %v6653_v17, %v6652_v18 }
0x1366   :  { %v2035_v27 = vpop.permute.xlu0 %2034 }
0x1367   :  { %6371 = vmatprep.subr.bf16.mxu1 %v6370_v19 }
0x1368   :  { %6373 = vmatpush3.bf16.msra.mxu1 %v6370_v19 }
0x1369   :  { %6376 = vmatprep.subr.msk.bf16.mxu1 %vm7054_vm6, %v6374_v20  ;;  %v6812_v22 = vpop.eup %6811 }
0x136a   :  { %v1944_v25 = vmul.f32 %v6812_v22, %v6804_v57 }
0x1387   :  { %v1937_v21 = vpop.xlane.xlu1 %1936 }
0x1388   :  { %6813 = vrcp.f32 %v1937_v21 }
0x138b   :  { %v2033_v26 = vpop.permute.xlu1 %2032 }
0x1392   :  { %v6814_v23 = vpop.eup %6813 }
0x1393   :  { %v1943_v24 = vmul.f32 %v6814_v23, %v6806_v2 }
0x1395   :  { %5966 = vmatprep.mubr.msk.f32.mxu1 %vm50_vm0, %v1943_v24 }
0x1396   :  { %5967 = vmatmul.mubr.msk.f32.vlgmr.msra.gmra.mrb[16].mxu1 %vm50_vm0, %v1944_v25 }
0x1397   :  { %6379 = vmatpush3.bf16.xpose.msk.msra.mxu1 %vm7054_vm6, %v6374_v20  ;;  %5973 = vmatprep.mubr.msk.f32.mxu1 %vm335_vm5, %v2033_v26 }
0x139e   :  { %5974 = vmatmul.mubr.msk.f32.vlgmr.msra.gmra.mrb[18].mxu1 %vm335_vm5, %v2035_v27 }
0x1434   :  { %v7278_v28 = vpop.f32.mrb[14].mxu1 }
0x1435   :  { %v7280_v63 = vpop.f32.mrb[15].mxu1 }
0x1469   :  { %v7282_v29 = vpop.f32.mrb[16].mxu1 }
0x146a   :  { %v7284_v41 = vpop.f32.mrb[17].mxu1 }
0x1471   :  { %v5975_v62 = vpop.f32.mrb[18].mxu1 }
0x1472   :  { %v2124_v30 = vmul.f32 0.35355338, %v5975_v62  ;;  %v2114_v39 = vpop.f32.mrb[19].mxu1 }
0x1473   :  { %v2123_v31 = vmul.f32 0.35355338, %v2114_v39 }
0x1474   :  { %v2126_v33 = vadd.f32 %v6915_v32, %v2124_v30 }
0x1475   :  { %v2125_v37 = vadd.f32 %v6916_v34, %v2123_v31 }
0x1476   :  { %v2130_v38 = vsel %vm50_vm0, %v2126_v33, -inf }
0x1477   :  { %2131 = vmax.xlane.f32.xlu0 %v2130_v38  ;;  %v2127_v40 = vsel %vm50_vm0, %v2125_v37, -inf  ;;  %v1537_v38 = vld [vmem:[#allocation2 + $0x118] sm:$0xff] }
0x1478   :  { %2128 = vmax.xlane.f32.xlu1 %v2127_v40  ;;  %v1538_v40 = vld [vmem:[#allocation2 + $0x120] sm:$0xff] }
0x1504   :  { %v2132_v43 = vpop.xlane.xlu0 %2131 }
0x1505   :  { %v2134_v44 = vsub.f32 %v2126_v33, %v2132_v43  ;;  %v2129_v45 = vpop.xlane.xlu1 %2128 }
0x1506   :  { %v2133_v47 = vsub.f32 %v2125_v37, %v2129_v45 }
0x1507   :  { %v2137_v48 = vmul.f32 1.442695, %v2134_v44  ;;  %v1539_v44 = vld [vmem:[#allocation2 + $0x128] sm:$0xff] }
0x1508   :  { %v2135_v58 = vmul.f32 1.442695, %v2133_v47  ;;  %v6398_v45 = vpack.c.bf16 %v1539_v44, %v1538_v40 }
0x1509   :  { %6815 = vpow2.f32 %v2137_v48 }
0x150a   :  { %6817 = vpow2.f32 %v2135_v58 }
0x1513   :  { %v6816_v36 = vpop.eup %6815 }
0x1514   :  { %v6818_v35 = vpop.eup %6817  ;;  %v2142_v55 = vsel %vm50_vm0, %v6816_v36, 0.0 }
0x1515   :  { %2143 = vadd.xlane.f32.xlu1 %v2142_v55  ;;  %v2139_v49 = vsel %vm50_vm0, %v6818_v35, 0.0 }
0x1516   :  { %2140 = vadd.xlane.f32.xlu0 %v2139_v49 }
0x1526   :  { %6665 = vrot.lane.b32.xlu1 %v7224_v13, %s6953_s30 }
0x152a   :  { %2236 = vrot.lane.b32.xlu1 %v7218_v12, %s6954_s7 }
0x152c   :  { %6660 = vrot.lane.b32.xlu0 %v7224_v13, %s6955_s9 }
0x1530   :  { %2238 = vrot.lane.b32.xlu0 %v7216_v10, %s6954_s7 }
0x15a2   :  { %v2144_v50 = vpop.xlane.xlu1 %2143 }
0x15a3   :  { %6819 = vrcp.f32 %v2144_v50  ;;  %v2141_v51 = vpop.xlane.xlu0 %2140 }
0x15a4   :  { %6821 = vrcp.f32 %v2141_v51 }
0x15a6   :  { %v6666_v52 = vpop.permute.xlu1 %6665 }
0x15a7   :  { %v6661_v53 = vpop.permute.xlu0 %6660  ;;  %v6668_v54 = vunpack.i.h.bf16 %v6666_v52  ;;  %v6667_v56 = vunpack.i.l.bf16 %v6666_v52 }
0x15a8   :  { %v6663_v57 = vunpack.i.h.bf16 %v6661_v53  ;;  %v6662_v59 = vunpack.i.l.bf16 %v6661_v53 }
0x15a9   :  { %v6384_v61 = vpack.c.bf16 %v6668_v54, %v6667_v56 }
0x15aa   :  { %v6380_v60 = vpack.c.bf16 %v6663_v57, %v6662_v59  ;;  %v2237_v4 = vpop.permute.xlu1 %2236 }
0x15ab   :  { %v2239_v5 = vpop.permute.xlu0 %2238 }
0x15ac   :  { %6381 = vmatprep.subr.bf16.mxu0 %v6380_v60 }
0x15ad   :  { %v6820_v12 = vpop.eup %6819  ;;  %6383 = vmatpush3.bf16.msra.mxu0 %v6380_v60 }
0x15ae   :  { %v6822_v2 = vpop.eup %6821  ;;  %6386 = vmatprep.subr.msk.bf16.mxu0 %vm7054_vm6, %v6384_v61  ;;  %v2148_v3 = vmul.f32 %v6820_v12, %v6816_v36 }
0x15af   :  { %v2147_v10 = vmul.f32 %v6822_v2, %v6818_v35 }
0x15b1   :  { %5980 = vmatprep.mubr.msk.f32.mxu0 %vm50_vm0, %v2147_v10 }
0x15b2   :  { %5981 = vmatmul.mubr.msk.f32.vlgmr.msra.gmra.mrb[20].mxu0 %vm50_vm0, %v2148_v3 }
0x15b3   :  { %5987 = vmatprep.mubr.msk.f32.mxu0 %vm335_vm5, %v2237_v4 }
0x15b6   :  { %6389 = vmatpush3.bf16.xpose.msk.msra.mxu0 %vm7054_vm6, %v6384_v61 }
0x15bd   :  { %5988 = vmatmul.mubr.msk.f32.vlgmr.msra.gmra.mrb[22].mxu0 %vm335_vm5, %v2239_v5 }
0x1685   :  { %v5982_v6 = vpop.f32.mrb[20].mxu0 }
0x1686   :  { %v2227_v1 = vpop.f32.mrb[21].mxu0 }
0x1690   :  { %v5989_v7 = vpop.f32.mrb[22].mxu0 }
0x1691   :  { %v2328_v9 = vmul.f32 0.35355338, %v5989_v7  ;;  %v2318_v42 = vpop.f32.mrb[23].mxu0 }
0x1692   :  { %v2327_v11 = vmul.f32 0.35355338, %v2318_v42 }
0x1693   :  { %v2330_v14 = vadd.f32 %v6915_v32, %v2328_v9 }
0x1694   :  { %v2329_v15 = vadd.f32 %v6916_v34, %v2327_v11 }
0x1695   :  { %v2334_v16 = vsel %vm50_vm0, %v2330_v14, -inf }
0x1696   :  { %2335 = vmax.xlane.f32.xlu0 %v2334_v16  ;;  %v2331_v17 = vsel %vm50_vm0, %v2329_v15, -inf }
0x1697   :  { %2332 = vmax.xlane.f32.xlu1 %v2331_v17  ;;  %v2599_v17 = vld [vmem:[#allocation2 + $0x140] sm:$0xff] }
0x1723   :  { %v2336_v18 = vpop.xlane.xlu0 %2335 }
0x1724   :  { %v2338_v19 = vsub.f32 %v2330_v14, %v2336_v18  ;;  %v2333_v20 = vpop.xlane.xlu1 %2332  ;;  %v2600_v18 = vld [vmem:[#allocation2 + $0x148] sm:$0xff] }
0x1725   :  { %v2337_v21 = vsub.f32 %v2329_v15, %v2333_v20  ;;  %v2598_v15 = vld [vmem:[#allocation2 + $0x138] sm:$0xff]  ;;  %v2827_v20 = vld [vmem:[#allocation2 + $0x190] sm:$0xff] }
0x1726   :  { %v2341_v22 = vmul.f32 1.442695, %v2338_v19  ;;  %v6406_v19 = vpack.c.bf16 %v2600_v18, %v2599_v17 }
0x1727   :  { %v2339_v23 = vmul.f32 1.442695, %v2337_v21  ;;  %v2828_v21 = vld [vmem:[#allocation2 + $0x198] sm:$0xff] }
0x1728   :  { %6823 = vpow2.f32 %v2341_v22  ;;  %v6426_v22 = vpack.c.bf16 %v2828_v21, %v2827_v20 }
0x1729   :  { %6825 = vpow2.f32 %v2339_v23  ;;  %v2689_v23 = vld [vmem:[#allocation2 + $0x150] sm:$0xff] }
0x1732   :  { %v6824_v24 = vpop.eup %6823 }
0x1733   :  { %v6826_v25 = vpop.eup %6825  ;;  %v2346_v26 = vsel %vm50_vm0, %v6824_v24, 0.0 }
0x1734   :  { %2347 = vadd.xlane.f32.xlu1 %v2346_v26  ;;  %v2343_v27 = vsel %vm50_vm0, %v6826_v25, 0.0 }
0x1735   :  { %2344 = vadd.xlane.f32.xlu0 %v2343_v27  ;;  %v2692_v27 = vld [vmem:[#allocation2 + $0x168] sm:$0xff] }
0x1745   :  { %2442 = vrot.lane.b32.xlu1 %v7284_v41, %s6945_s8 }
0x1749   :  { %2444 = vrot.lane.b32.xlu1 %v7282_v29, %s6945_s8 }
0x174b   :  { %6670 = vrot.lane.b32.xlu0 %v7224_v13, %s6956_s10  ;;  %v1536_v13 = vld [vmem:[#allocation2 + $0x110] sm:$0xff] }
0x174c   :  { %v6394_v43 = vpack.c.bf16 %v1537_v38, %v1536_v13  ;;  %v5459_v38 = vld [vmem:[%s7752_s5 + $0xc] ss:$0 sm:$0xff] }
0x174d   :  { %2452 = vrot.lane.b32.xlu1 %v5982_v6, %s6957_s11 }
0x174f   :  { %2450 = vrot.lane.b32.xlu0 %v2227_v1, %s6957_s11 }
0x17c1   :  { %v2348_v62 = vpop.xlane.xlu1 %2347 }
0x17c2   :  { %6827 = vrcp.f32 %v2348_v62  ;;  %v2345_v30 = vpop.xlane.xlu0 %2344 }
0x17c3   :  { %6829 = vrcp.f32 %v2345_v30  ;;  %v2693_v30 = vld [vmem:[#allocation2 + $0x170] sm:$0xff] }
0x17c5   :  { %v2443_v58 = vpop.permute.xlu1 %2442 }
0x17c6   :  { %v6671_v39 = vpop.permute.xlu0 %6670  ;;  %v2464_v49 = vsel %vm335_vm5, %v7280_v63, %v2443_v58  ;;  %v5456_v63 = vld [vmem:[%s7752_s5 + $0xb] ss:$0 sm:$0xff]  ;;  %v2829_v58 = vld [vmem:[#allocation2 + $0x1a0] sm:$0xff] }
0x17c7   :  { %v6673_v31 = vunpack.i.h.bf16 %v6671_v39  ;;  %v6672_v32 = vunpack.i.l.bf16 %v6671_v39  ;;  %v2694_v39 = vld [vmem:[#allocation2 + $0x178] sm:$0xff] }
0x17c9   :  { %v6390_v33 = vpack.c.bf16 %v6673_v31, %v6672_v32  ;;  %v2445_v36 = vpop.permute.xlu1 %2444  ;;  %v6418_v31 = vpack.c.bf16 %v2694_v39, %v2693_v30 }
0x17ca   :  { %v2451_v55 = vpop.permute.xlu0 %2450  ;;  %v2465_v51 = vsel %vm335_vm5, %v7278_v28, %v2445_v36  ;;  %v2830_v36 = vld [vmem:[#allocation2 + $0x1a8] sm:$0xff] }
0x17cb   :  { %6391 = vmatprep.subr.bf16.mxu1 %v6390_v33  ;;  %v2466_v52 = vsel %vm50_vm0, %v2464_v49, %v2451_v55  ;;  %v6430_v49 = vpack.c.bf16 %v2830_v36, %v2829_v58 }
0x17cc   :  { %v6828_v41 = vpop.eup %6827  ;;  %6393 = vmatpush3.bf16.msra.mxu1 %v6390_v33 }
0x17cd   :  { %v6830_v34 = vpop.eup %6829  ;;  %v2352_v37 = vmul.f32 %v6828_v41, %v6824_v24  ;;  %6395 = vmatprep.subr.bf16.mxu1 %v6394_v43  ;;  %v2453_v35 = vpop.permute.xlu1 %2452  ;;  %v2690_v24 = vld [vmem:[#allocation2 + $0x158] sm:$0xff] }
0x17ce   :  { %v2351_v29 = vmul.f32 %v6830_v34, %v6826_v25  ;;  %v2467_v54 = vsel %vm50_vm0, %v2465_v51, %v2453_v35  ;;  %v2691_v25 = vld [vmem:[#allocation2 + $0x160] sm:$0xff]  ;;  %v6410_v26 = vpack.c.bf16 %v2690_v24, %v2689_v23  ;;  %v7371_v51 = vld [vmem:[%s7750_s3 + $0x8] sm:$0xff] }
0x17cf   :  { %v6414_v62 = vpack.c.bf16 %v2692_v27, %v2691_v25 }
0x17d0   :  { %5994 = vmatprep.mubr.msk.f32.mxu1 %vm50_vm0, %v2351_v29 }
0x17d1   :  { %5995 = vmatmul.mubr.msk.f32.vlgmr.msra.gmra.mrb[20].mxu1 %vm50_vm0, %v2352_v37 }
0x17d2   :  { %6397 = vmatpush3.bf16.msra.mxu1 %v6394_v43  ;;  %v5460_v43 = vld [vmem:[%s7752_s5 + $0xd] ss:$0 sm:$0xff] }
0x17d3   :  { %6399 = vmatprep.subr.bf16.mxu1 %v6398_v45 }
0x17d6   :  { %6401 = vmatpush3.bf16.msra.mxu1 %v6398_v45 }
0x17d7   :  { %6411 = vmatprep.subr.bf16.mxu1 %v6410_v26 }
0x18a4   :  { %v5996_v47 = vpop.f32.mrb[20].mxu1 }
0x18a5   :  { %2460 = vrot.lane.b32.xlu1 %v5996_v47, %s6958_s12  ;;  %v2431_v48 = vpop.f32.mrb[21].mxu1 }
0x18a6   :  { %2458 = vrot.lane.b32.xlu0 %v2431_v48, %s6958_s12 }
0x1917   :  { %v2461_v50 = vpop.permute.xlu1 %2460 }
0x1918   :  { %v2459_v53 = vpop.permute.xlu0 %2458  ;;  %v2469_v57 = vsel %vm1172_vm7, %v2467_v54, %v2461_v50  ;;  %v7362_v50 = vld [vmem:[%s7750_s3] sm:$0xff] }
0x1919   :  { %v2468_v56 = vsel %vm1172_vm7, %v2466_v52, %v2459_v53  ;;  %v2695_v52 = vld [vmem:[#allocation2 + $0x180] sm:$0xff]  ;;  %v2696_v53 = vld [vmem:[#allocation2 + $0x188] sm:$0xff] }
0x191a   :  { %6005 = vmatprep.mubr.msk.f32.mxu1 %vm247_vm4, %v2468_v56  ;;  %v6422_v54 = vpack.c.bf16 %v2696_v53, %v2695_v52  ;;  %v5461_v56 = vld [vmem:[%s7752_s5 + $0xe] ss:$0 sm:$0xff] }
0x191b   :  { %6006 = vmatmul.mubr.msk.f32.vlgmr.msra.gmra.mrb[22].mxu1 %vm247_vm4, %v2469_v57 }
0x191c   :  { %6413 = vmatpush3.bf16.msra.mxu1 %v6410_v26 }
0x191d   :  { %6415 = vmatprep.subr.bf16.mxu1 %v6414_v62 }
0x1920   :  { %6417 = vmatpush3.bf16.msra.mxu1 %v6414_v62 }
0x1921   :  { %6419 = vmatprep.subr.bf16.mxu1 %v6418_v31 }
0x1924   :  { %6421 = vmatpush3.bf16.msra.mxu1 %v6418_v31 }
0x1925   :  { %6423 = vmatprep.subr.bf16.mxu1 %v6422_v54 }
0x1928   :  { %6425 = vmatpush3.bf16.msra.mxu1 %v6422_v54 }
0x19ee   :  { %v6007_v59 = vpop.f32.mrb[22].mxu1 }
0x19ef   :  { %v2552_v60 = vadd.f32 %v6007_v59, %v5456_v63  ;;  %v2546_v28 = vpop.f32.mrb[23].mxu1 }
0x19f0   :  { %v2547_v61 = vadd.f32 %v5456_v63, %v2546_v28 }
0x19f1   :  { %v2556_v12 = vadd.f32 %v2552_v60, %v7207_v8 }
0x19f2   :  { %v2555_v2 = vadd.f32 %v2547_v61, %v7205_v0  ;;  %v2597_v0 = vld [vmem:[#allocation2 + $0x130] sm:$0xff] }
0x19f3   :  { %v2562_v10 = vsel %vm247_vm4, %v2556_v12, 0.0  ;;  %v6402_v16 = vpack.c.bf16 %v2598_v15, %v2597_v0 }
0x19f4   :  { %2563 = vadd.xlane.f32.xlu1 %v2562_v10  ;;  %v2559_v3 = vsel %vm247_vm4, %v2555_v2, 0.0 }
0x19f5   :  { %2560 = vadd.xlane.f32.xlu0 %v2559_v3  ;;  %6403 = vmatprep.subr.bf16.mxu0 %v6402_v16 }
0x19f6   :  { %6405 = vmatpush3.bf16.msra.mxu0 %v6402_v16 }
0x19f7   :  { %6407 = vmatprep.subr.bf16.mxu0 %v6406_v19 }
0x19fa   :  { %6409 = vmatpush3.bf16.msra.mxu0 %v6406_v19  ;;  %v7420_v19 = vld [vmem:[%s7749_s2 + $0x8] sm:$0xff] }
0x19fb   :  { %6427 = vmatprep.subr.bf16.mxu0 %v6426_v22 }
0x1a81   :  { %v2564_v4 = vpop.xlane.xlu1 %2563 }
0x1a82   :  { %v2566_v5 = vmul.f32 0.03125, %v2564_v4  ;;  %v2561_v6 = vpop.xlane.xlu0 %2560 }
0x1a83   :  { %v2565_v1 = vmul.f32 0.03125, %v2561_v6 }
0x1a84   :  { %v2568_v7 = vsub.f32 %v2556_v12, %v2566_v5  ;;  %v5469_v12 = vld [vmem:[%s7752_s5 + $0x12] ss:$0 sm:$0xff] }
0x1a85   :  { %v2567_v9 = vsub.f32 %v2555_v2, %v2565_v1 }
0x1a86   :  { %v2570_v14 = vmul.f32 %v2568_v7, %v2568_v7 }
0x1a87   :  { %v2569_v42 = vmul.f32 %v2567_v9, %v2567_v9 }
0x1a88   :  { %v2574_v8 = vsel %vm247_vm4, %v2570_v14, 0.0 }
0x1a89   :  { %v2571_v11 = vsel %vm247_vm4, %v2569_v42, 0.0 }
0x1a8a   :  { %2572 = vadd.xlane.f32.xlu0 %v2571_v11 }
0x1a8e   :  { %2575 = vadd.xlane.f32.xlu0 %v2574_v8 }
0x1b17   :  { %v2573_v32 = vpop.xlane.xlu0 %2572 }
0x1b18   :  { %v2577_v33 = vmul.f32 0.03125, %v2573_v32 }
0x1b1a   :  { %v2579_v41 = vadd.f32 1e-05, %v2577_v33 }
0x1b1b   :  { %v2576_v34 = vpop.xlane.xlu0 %2575 }
0x1b1c   :  { %6831 = vrsqrt.f32 %v2579_v41  ;;  %v2578_v29 = vmul.f32 0.03125, %v2576_v34 }
0x1b1e   :  { %v2580_v37 = vadd.f32 1e-05, %v2578_v29 }
0x1b20   :  { %6833 = vrsqrt.f32 %v2580_v37 }
0x1b26   :  { %v6832_v13 = vpop.eup %6831 }
0x1b27   :  { %v2583_v40 = vmul.f32 %v6832_v13, %v2567_v9 }
0x1b29   :  { %v2589_v44 = vmul.f32 %v5459_v38, %v2583_v40 }
0x1b2a   :  { %v6834_v45 = vpop.eup %6833 }
0x1b2b   :  { %v2584_v47 = vmul.f32 %v6834_v45, %v2568_v7  ;;  %v7353_v48 = vadd.f32 %v5460_v43, %v2589_v44 }
0x1b2d   :  { %v2590_v35 = vmul.f32 %v5459_v38, %v2584_v47  ;;  %6016 = vmatprep.mubr.msk.f32.mxu0 %vm247_vm4, %v7353_v48 }
0x1b2f   :  { %v7357_v55 = vadd.f32 %v5460_v43, %v2590_v35 }
0x1b31   :  { %6017 = vmatmul.mubr.msk.f32.vlgmr.msra.gmra.mrb[24].mxu0 %vm247_vm4, %v7357_v55 }
0x1b32   :  { %6429 = vmatpush3.bf16.msra.mxu0 %v6426_v22  ;;  %6046 = vmatprep.mubr.msk.f32.mxu0 %vm247_vm4, %v7362_v50  ;;  %v7425_v22 = vld [vmem:[%s7749_s2] sm:$0xff] }
0x1b33   :  { %6431 = vmatprep.subr.bf16.mxu0 %v6430_v49 }
0x1b36   :  { %6433 = vmatpush3.bf16.msra.mxu0 %v6430_v49 }
0x1b39   :  { %6047 = vmatmul.mubr.msk.f32.vlgmr.msra.gmra.mrb[26].mxu0 %vm247_vm4, %v7371_v51 }
0x1c04   :  { %v6018_v57 = vpop.f32.mrb[24].mxu0 }
0x1c05   :  { %v2684_v63 = vadd.f32 %v6018_v57, %v5461_v56  ;;  %v2678_v59 = vpop.f32.mrb[25].mxu0 }
0x1c06   :  { %v2679_v60 = vadd.f32 %v5461_v56, %v2678_v59 }
0x1c07   :  { %v2688_v61 = vmax.f32 %v2684_v63, 0.0 }
0x1c08   :  { %v2687_v28 = vmax.f32 %v2679_v60, 0.0 }
0x1c0a   :  { %6035 = vmatprep.mubr.msk.f32.mxu1 %vm151_vm3, %v2687_v28 }
0x1c0b   :  { %6036 = vmatmul.mubr.msk.f32.vlgmr.msra.gmra.mrb[24].mxu1 %vm151_vm3, %v2688_v61 }
0x1c0c   :  { %v6048_v2 = vpop.f32.mrb[26].mxu0 }
0x1c0d   :  { %v7383_v10 = vadd.f32 %v6048_v2, %v5469_v12  ;;  %v2913_v3 = vpop.f32.mrb[27].mxu0 }
0x1c0e   :  { %v7385_v4 = vadd.f32 %v5469_v12, %v2913_v3 }
0x1c10   :  { %6053 = vmatprep.mubr.msk.f32.mxu0 %vm335_vm5, %v7385_v4  ;;  %v7391_v5 = vpack.i.bf16 %v7383_v10, %v7385_v4 }
0x1c12   :  { %6680 = vrot.lane.b32.xlu0 %v7391_v5, %s6948_s21  ;;  %6675 = vrot.lane.b32.xlu1 %v7391_v5, %s6947_s20 }
0x1c16   :  { %3124 = vrot.lane.b32.xlu1 %v7385_v4, %s6946_s19 }
0x1c1a   :  { %3126 = vrot.lane.b32.xlu1 %v7383_v10, %s6946_s19 }
0x1c84   :  { %v6681_v6 = vpop.permute.xlu0 %6680  ;;  %v6676_v1 = vpop.permute.xlu1 %6675 }
0x1c85   :  { %v6683_v7 = vunpack.i.h.bf16 %v6681_v6  ;;  %v6682_v9 = vunpack.i.l.bf16 %v6681_v6  ;;  %v6678_v42 = vunpack.i.h.bf16 %v6676_v1  ;;  %v6677_v11 = vunpack.i.l.bf16 %v6676_v1 }
0x1c87   :  { %v6434_v14 = vpack.c.bf16 %v6678_v42, %v6677_v11  ;;  %v6444_v8 = vpack.c.bf16 %v6683_v7, %v6682_v9 }
0x1c88   :  { %v3125_v0 = vpop.permute.xlu1 %3124 }
0x1c89   :  { %6436 = vmatprep.subr.msk.bf16.mxu0 %vm7054_vm6, %v6434_v14 }
0x1c8a   :  { %6439 = vmatpush3.bf16.xpose.msk.msra.mxu0 %vm7054_vm6, %v6434_v14 }
0x1c8b   :  { %6446 = vmatprep.subr.msk.bf16.mxu0 %vm7054_vm6, %v6444_v8 }
0x1c8c   :  { %v3127_v15 = vpop.permute.xlu1 %3126 }
0x1c91   :  { %6054 = vmatmul.mubr.msk.f32.vlgmr.msra.gmra.mrb[28].mxu0 %vm335_vm5, %v7383_v10 }
0x1c92   :  { %6449 = vmatpush3.bf16.xpose.msk.msra.mxu0 %vm7054_vm6, %v6444_v8  ;;  %6067 = vmatprep.mubr.msk.f32.mxu0 %vm335_vm5, %v3125_v0 }
0x1c99   :  { %6068 = vmatmul.mubr.msk.f32.vlgmr.msra.gmra.mrb[30].mxu0 %vm335_vm5, %v3127_v15 }
0x1cde   :  { %v7413_v16 = vpop.f32.mrb[24].mxu1 }
0x1cdf   :  { %v7415_v17 = vpop.f32.mrb[25].mxu1 }
0x1d64   :  { %v6055_v18 = vpop.f32.mrb[28].mxu0 }
0x1d65   :  { %v3012_v20 = vmul.f32 0.35355338, %v6055_v18  ;;  %v3002_v21 = vpop.f32.mrb[29].mxu0 }
0x1d66   :  { %v3011_v23 = vmul.f32 0.35355338, %v3002_v21 }
0x1d67   :  { %v3014_v24 = vadd.f32 %v3012_v20, %v7420_v19 }
0x1d68   :  { %v3013_v25 = vadd.f32 %v3011_v23, %v7425_v22 }
0x1d69   :  { %v3018_v26 = vsel %vm50_vm0, %v3014_v24, -inf }
0x1d6a   :  { %3019 = vmax.xlane.f32.xlu1 %v3018_v26  ;;  %v3015_v27 = vsel %vm50_vm0, %v3013_v25, -inf }
0x1d6b   :  { %3016 = vmax.xlane.f32.xlu0 %v3015_v27 }
0x1d6c   :  { %v6069_v62 = vpop.f32.mrb[30].mxu0 }
0x1d6d   :  { %v3206_v30 = vpop.f32.mrb[31].mxu0  ;;  %v3216_v39 = vmul.f32 0.35355338, %v6069_v62 }
0x1d6e   :  { %v3215_v31 = vmul.f32 0.35355338, %v3206_v30 }
0x1d6f   :  { %v3218_v41 = vadd.f32 %v3216_v39, %v7420_v19 }
0x1d70   :  { %v3217_v32 = vadd.f32 %v3215_v31, %v7425_v22 }
0x1d71   :  { %v3222_v34 = vsel %vm50_vm0, %v3218_v41, -inf }
0x1d72   :  { %v3219_v33 = vsel %vm50_vm0, %v3217_v32, -inf }
0x1d73   :  { %3220 = vmax.xlane.f32.xlu0 %v3219_v33 }
0x1d77   :  { %3223 = vmax.xlane.f32.xlu0 %v3222_v34 }
0x1d7b   :  { %6685 = vrot.lane.b32.xlu1 %v7391_v5, %s6949_s26 }
0x1df7   :  { %v3020_v29 = vpop.xlane.xlu1 %3019 }
0x1df8   :  { %v3022_v37 = vsub.f32 %v3014_v24, %v3020_v29  ;;  %v3017_v13 = vpop.xlane.xlu0 %3016 }
0x1df9   :  { %v3021_v38 = vsub.f32 %v3013_v25, %v3017_v13 }
0x1dfa   :  { %v3025_v40 = vmul.f32 1.442695, %v3022_v37 }
0x1dfb   :  { %v3023_v43 = vmul.f32 1.442695, %v3021_v38  ;;  %v6686_v44 = vpop.permute.xlu1 %6685 }
0x1dfc   :  { %6835 = vpow2.f32 %v3025_v40  ;;  %v6688_v45 = vunpack.i.h.bf16 %v6686_v44  ;;  %v6687_v47 = vunpack.i.l.bf16 %v6686_v44 }
0x1dfd   :  { %6837 = vpow2.f32 %v3023_v43 }
0x1dfe   :  { %v6440_v58 = vpack.c.bf16 %v6688_v45, %v6687_v47 }
0x1e00   :  { %6441 = vmatprep.subr.bf16.mxu1 %v6440_v58  ;;  %v3221_v36 = vpop.xlane.xlu0 %3220 }
0x1e01   :  { %6443 = vmatpush3.bf16.msra.mxu1 %v6440_v58  ;;  %v3225_v60 = vsub.f32 %v3217_v32, %v3221_v36 }
0x1e03   :  { %v3227_v28 = vmul.f32 1.442695, %v3225_v60 }
0x1e04   :  { %v3224_v35 = vpop.xlane.xlu0 %3223 }
0x1e05   :  { %v3226_v49 = vsub.f32 %v3218_v41, %v3224_v35 }
0x1e06   :  { %v6836_v52 = vpop.eup %6835 }
0x1e07   :  { %v6838_v53 = vpop.eup %6837  ;;  %v3229_v54 = vmul.f32 1.442695, %v3226_v49  ;;  %v3030_v56 = vsel %vm50_vm0, %v6836_v52, 0.0 }
0x1e08   :  { %3031 = vadd.xlane.f32.xlu0 %v3030_v56  ;;  %v3027_v57 = vsel %vm50_vm0, %v6838_v53, 0.0 }
0x1e09   :  { %6839 = vpow2.f32 %v3229_v54  ;;  %3028 = vadd.xlane.f32.xlu1 %v3027_v57 }
0x1e0a   :  { %6841 = vpow2.f32 %v3227_v28 }
0x1e13   :  { %v6840_v63 = vpop.eup %6839 }
0x1e14   :  { %v3234_v59 = vsel %vm50_vm0, %v6840_v63, 0.0  ;;  %v6842_v61 = vpop.eup %6841 }
0x1e15   :  { %3235 = vadd.xlane.f32.xlu0 %v3234_v59  ;;  %v3231_v12 = vsel %vm50_vm0, %v6842_v61, 0.0 }
0x1e1a   :  { %6695 = vrot.lane.b32.xlu1 %v7391_v5, %s6950_s27 }
0x1e2b   :  { %6690 = vrot.lane.b32.xlu0 %v7391_v5, %s6951_s28 }
0x1e2f   :  { %3330 = vrot.lane.b32.xlu0 %v7383_v10, %s6952_s29 }
0x1e3e   :  { %3232 = vadd.xlane.f32.xlu1 %v3231_v12 }
0x1e4f   :  { %3328 = vrot.lane.b32.xlu1 %v7385_v4, %s6952_s29 }
0x1e95   :  { %v3032_v2 = vpop.xlane.xlu0 %3031 }
0x1e96   :  { %6843 = vrcp.f32 %v3032_v2  ;;  %v3029_v3 = vpop.xlane.xlu1 %3028 }
0x1e97   :  { %6845 = vrcp.f32 %v3029_v3 }
0x1e9a   :  { %v6696_v11 = vpop.permute.xlu1 %6695 }
0x1e9b   :  { %v6698_v8 = vunpack.i.h.bf16 %v6696_v11  ;;  %v6697_v0 = vunpack.i.l.bf16 %v6696_v11 }
0x1e9d   :  { %v6454_v21 = vpack.c.bf16 %v6698_v8, %v6697_v0 }
0x1ea0   :  { %v6844_v6 = vpop.eup %6843 }
0x1ea1   :  { %v6846_v1 = vpop.eup %6845  ;;  %v3036_v42 = vmul.f32 %v6844_v6, %v6836_v52 }
0x1ea2   :  { %v3236_v7 = vpop.xlane.xlu0 %3235  ;;  %v3035_v9 = vmul.f32 %v6846_v1, %v6838_v53 }
0x1ea3   :  { %6847 = vrcp.f32 %v3236_v7 }
0x1ea4   :  { %6060 = vmatprep.mubr.msk.f32.mxu1 %vm50_vm0, %v3035_v9 }
0x1ea5   :  { %6061 = vmatmul.mubr.msk.f32.vlgmr.msra.gmra.mrb[26].mxu1 %vm50_vm0, %v3036_v42 }
0x1ea6   :  { %v6691_v14 = vpop.permute.xlu0 %6690 }
0x1ea7   :  { %v6693_v15 = vunpack.i.h.bf16 %v6691_v14  ;;  %v6692_v18 = vunpack.i.l.bf16 %v6691_v14 }
0x1ea9   :  { %v6450_v20 = vpack.c.bf16 %v6693_v15, %v6692_v18 }
0x1eaa   :  { %v3331_v30 = vpop.permute.xlu0 %3330 }
0x1eab   :  { %6451 = vmatprep.subr.bf16.mxu1 %v6450_v20 }
0x1eac   :  { %6453 = vmatpush3.bf16.msra.mxu1 %v6450_v20 }
0x1ead   :  { %6456 = vmatprep.subr.msk.bf16.mxu1 %vm7054_vm6, %v6454_v21  ;;  %v6848_v24 = vpop.eup %6847 }
0x1eae   :  { %v3240_v27 = vmul.f32 %v6848_v24, %v6840_v63 }
0x1ecb   :  { %v3233_v23 = vpop.xlane.xlu1 %3232 }
0x1ecc   :  { %6849 = vrcp.f32 %v3233_v23 }
0x1ecf   :  { %v3329_v62 = vpop.permute.xlu1 %3328 }
0x1ed6   :  { %v6850_v25 = vpop.eup %6849 }
0x1ed7   :  { %v3239_v26 = vmul.f32 %v6850_v25, %v6842_v61 }
0x1ed9   :  { %6074 = vmatprep.mubr.msk.f32.mxu1 %vm50_vm0, %v3239_v26 }
0x1eda   :  { %6075 = vmatmul.mubr.msk.f32.vlgmr.msra.gmra.mrb[28].mxu1 %vm50_vm0, %v3240_v27 }
0x1edb   :  { %6459 = vmatpush3.bf16.xpose.msk.msra.mxu1 %vm7054_vm6, %v6454_v21  ;;  %6081 = vmatprep.mubr.msk.f32.mxu1 %vm335_vm5, %v3329_v62 }
0x1ee2   :  { %6082 = vmatmul.mubr.msk.f32.vlgmr.msra.gmra.mrb[30].mxu1 %vm335_vm5, %v3331_v30 }
0x1f78   :  { %v7459_v39 = vpop.f32.mrb[26].mxu1 }
0x1f79   :  { %v7461_v31 = vpop.f32.mrb[27].mxu1 }
0x1fad   :  { %v7463_v32 = vpop.f32.mrb[28].mxu1 }
0x1fae   :  { %v7465_v33 = vpop.f32.mrb[29].mxu1 }
0x1fb5   :  { %v6083_v41 = vpop.f32.mrb[30].mxu1 }
0x1fb6   :  { %v3420_v34 = vmul.f32 0.35355338, %v6083_v41  ;;  %v3410_v29 = vpop.f32.mrb[31].mxu1 }
0x1fb7   :  { %v3419_v37 = vmul.f32 0.35355338, %v3410_v29 }
0x1fb8   :  { %v3422_v13 = vadd.f32 %v3420_v34, %v7420_v19 }
0x1fb9   :  { %v3421_v38 = vadd.f32 %v3419_v37, %v7425_v22 }
0x1fba   :  { %v3426_v40 = vsel %vm50_vm0, %v3422_v13, -inf }
0x1fbb   :  { %3427 = vmax.xlane.f32.xlu0 %v3426_v40  ;;  %v3423_v43 = vsel %vm50_vm0, %v3421_v38, -inf }
0x1fbc   :  { %3424 = vmax.xlane.f32.xlu1 %v3423_v43 }
0x2048   :  { %v3428_v44 = vpop.xlane.xlu0 %3427 }
0x2049   :  { %v3430_v45 = vsub.f32 %v3422_v13, %v3428_v44  ;;  %v3425_v47 = vpop.xlane.xlu1 %3424 }
0x204a   :  { %v3429_v58 = vsub.f32 %v3421_v38, %v3425_v47  ;;  %v2833_v47 = vld [vmem:[#allocation2 + $0x1b8] sm:$0xff] }
0x204b   :  { %v3433_v36 = vmul.f32 1.442695, %v3430_v45 }
0x204c   :  { %v3431_v35 = vmul.f32 1.442695, %v3429_v58  ;;  %v2834_v58 = vld [vmem:[#allocation2 + $0x1c0] sm:$0xff] }
0x204d   :  { %6851 = vpow2.f32 %v3433_v36 }
0x204e   :  { %6853 = vpow2.f32 %v3431_v35  ;;  %v2835_v35 = vld [vmem:[#allocation2 + $0x1c8] sm:$0xff] }
0x2057   :  { %v6852_v49 = vpop.eup %6851 }
0x2058   :  { %v6854_v52 = vpop.eup %6853  ;;  %v3438_v53 = vsel %vm50_vm0, %v6852_v49, 0.0 }
0x2059   :  { %3439 = vadd.xlane.f32.xlu1 %v3438_v53  ;;  %v3435_v54 = vsel %vm50_vm0, %v6854_v52, 0.0 }
0x205a   :  { %3436 = vadd.xlane.f32.xlu0 %v3435_v54  ;;  %v5464_v54 = vld [vmem:[%s7752_s5 + $0xf] ss:$0 sm:$0xff] }
0x206a   :  { %6705 = vrot.lane.b32.xlu1 %v7391_v5, %s6953_s30 }
0x206e   :  { %3532 = vrot.lane.b32.xlu1 %v7385_v4, %s6954_s7 }
0x2070   :  { %6700 = vrot.lane.b32.xlu0 %v7391_v5, %s6955_s9 }
0x2074   :  { %3534 = vrot.lane.b32.xlu0 %v7383_v10, %s6954_s7 }
0x20e6   :  { %v3440_v56 = vpop.xlane.xlu1 %3439 }
0x20e7   :  { %6855 = vrcp.f32 %v3440_v56  ;;  %v3437_v57 = vpop.xlane.xlu0 %3436  ;;  %v2775_v56 = vadd.f32 %v5464_v54, %v7415_v17 }
0x20e8   :  { %6857 = vrcp.f32 %v3437_v57  ;;  %v2780_v57 = vadd.f32 %v7413_v16, %v5464_v54 }
0x20ea   :  { %v6706_v63 = vpop.permute.xlu1 %6705 }
0x20eb   :  { %v6701_v59 = vpop.permute.xlu0 %6700  ;;  %v6708_v60 = vunpack.i.h.bf16 %v6706_v63  ;;  %v6707_v28 = vunpack.i.l.bf16 %v6706_v63  ;;  %v2783_v63 = vadd.f32 %v2775_v56, %v7353_v48 }
0x20ec   :  { %v6703_v61 = vunpack.i.h.bf16 %v6701_v59  ;;  %v6702_v12 = vunpack.i.l.bf16 %v6701_v59  ;;  %v2784_v59 = vadd.f32 %v2780_v57, %v7357_v55  ;;  %v5501_v57 = vld [vmem:[%s7752_s5 + $0x14] ss:$0 sm:$0xff] }
0x20ed   :  { %v6464_v3 = vpack.c.bf16 %v6708_v60, %v6707_v28  ;;  %v2787_v60 = vsel %vm247_vm4, %v2783_v63, 0.0 }
0x20ee   :  { %v6460_v2 = vpack.c.bf16 %v6703_v61, %v6702_v12  ;;  %v3533_v7 = vpop.permute.xlu1 %3532  ;;  %v2790_v28 = vsel %vm247_vm4, %v2784_v59, 0.0 }
0x20ef   :  { %v3535_v9 = vpop.permute.xlu0 %3534 }
0x20f0   :  { %6461 = vmatprep.subr.bf16.mxu0 %v6460_v2 }
0x20f1   :  { %v6856_v4 = vpop.eup %6855  ;;  %6463 = vmatpush3.bf16.msra.mxu0 %v6460_v2 }
0x20f2   :  { %v6858_v6 = vpop.eup %6857  ;;  %6466 = vmatprep.subr.msk.bf16.mxu0 %vm7054_vm6, %v6464_v3  ;;  %v3444_v1 = vmul.f32 %v6856_v4, %v6852_v49  ;;  %v6478_v49 = vpack.c.bf16 %v2835_v35, %v2834_v58  ;;  %v3893_v58 = vld [vmem:[#allocation2 + $0x1d0] sm:$0xff] }
0x20f3   :  { %v3443_v10 = vmul.f32 %v6858_v6, %v6854_v52 }
0x20f5   :  { %6088 = vmatprep.mubr.msk.f32.mxu0 %vm50_vm0, %v3443_v10 }
0x20f6   :  { %6089 = vmatmul.mubr.msk.f32.vlgmr.msra.gmra.mrb[32].mxu0 %vm50_vm0, %v3444_v1 }
0x20f7   :  { %6095 = vmatprep.mubr.msk.f32.mxu0 %vm335_vm5, %v3533_v7 }
0x20fa   :  { %6469 = vmatpush3.bf16.xpose.msk.msra.mxu0 %vm7054_vm6, %v6464_v3 }
0x2101   :  { %6096 = vmatmul.mubr.msk.f32.vlgmr.msra.gmra.mrb[34].mxu0 %vm335_vm5, %v3535_v9 }
0x21c9   :  { %v6090_v42 = vpop.f32.mrb[32].mxu0 }
0x21ca   :  { %v3523_v11 = vpop.f32.mrb[33].mxu0 }
0x21d4   :  { %v6097_v14 = vpop.f32.mrb[34].mxu0 }
0x21d5   :  { %v3624_v8 = vmul.f32 0.35355338, %v6097_v14  ;;  %v3614_v0 = vpop.f32.mrb[35].mxu0 }
0x21d6   :  { %v3623_v15 = vmul.f32 0.35355338, %v3614_v0 }
0x21d7   :  { %v3626_v18 = vadd.f32 %v3624_v8, %v7420_v19 }
0x21d8   :  { %v3625_v20 = vadd.f32 %v3623_v15, %v7425_v22  ;;  %v5496_v15 = vld [vmem:[%s7752_s5 + $0x13] ss:$0 sm:$0xff] }
0x21d9   :  { %v3630_v21 = vsel %vm50_vm0, %v3626_v18, -inf }
0x21da   :  { %3631 = vmax.xlane.f32.xlu0 %v3630_v21  ;;  %v3627_v23 = vsel %vm50_vm0, %v3625_v20, -inf }
0x21db   :  { %3628 = vmax.xlane.f32.xlu1 %v3627_v23 }
0x2267   :  { %v3632_v24 = vpop.xlane.xlu0 %3631 }
0x2268   :  { %v3634_v25 = vsub.f32 %v3626_v18, %v3632_v24  ;;  %v3629_v26 = vpop.xlane.xlu1 %3628 }
0x2269   :  { %v3633_v27 = vsub.f32 %v3625_v20, %v3629_v26 }
0x226a   :  { %v3637_v62 = vmul.f32 1.442695, %v3634_v25 }
0x226b   :  { %v3635_v30 = vmul.f32 1.442695, %v3633_v27 }
0x226c   :  { %6859 = vpow2.f32 %v3637_v62 }
0x226d   :  { %6861 = vpow2.f32 %v3635_v30 }
0x2276   :  { %v6860_v41 = vpop.eup %6859 }
0x2277   :  { %v6862_v34 = vpop.eup %6861  ;;  %v3642_v19 = vsel %vm50_vm0, %v6860_v41, 0.0 }
0x2278   :  { %3643 = vadd.xlane.f32.xlu1 %v3642_v19  ;;  %v3639_v22 = vsel %vm50_vm0, %v6862_v34, 0.0 }
0x2279   :  { %3640 = vadd.xlane.f32.xlu0 %v3639_v22 }
0x2289   :  { %3738 = vrot.lane.b32.xlu1 %v7465_v33, %s6945_s8 }
0x228d   :  { %3740 = vrot.lane.b32.xlu1 %v7463_v32, %s6945_s8 }
0x228f   :  { %6710 = vrot.lane.b32.xlu0 %v7391_v5, %s6956_s10  ;;  %v2832_v5 = vld [vmem:[#allocation2 + $0x1b0] sm:$0xff] }
0x2290   :  { %v6474_v36 = vpack.c.bf16 %v2833_v47, %v2832_v5 }
0x2291   :  { %3748 = vrot.lane.b32.xlu1 %v6090_v42, %s6957_s11 }
0x2293   :  { %3746 = vrot.lane.b32.xlu0 %v3523_v11, %s6957_s11 }
0x2305   :  { %v3644_v29 = vpop.xlane.xlu1 %3643 }
0x2306   :  { %6863 = vrcp.f32 %v3644_v29  ;;  %v3641_v37 = vpop.xlane.xlu0 %3640 }
0x2307   :  { %6865 = vrcp.f32 %v3641_v37 }
0x2309   :  { %v3739_v61 = vpop.permute.xlu1 %3738 }
0x230a   :  { %v6711_v13 = vpop.permute.xlu0 %6710  ;;  %v3760_v4 = vsel %vm335_vm5, %v7461_v31, %v3739_v61 }
0x230b   :  { %v6713_v38 = vunpack.i.h.bf16 %v6711_v13  ;;  %v6712_v40 = vunpack.i.l.bf16 %v6711_v13 }
0x230d   :  { %v6470_v43 = vpack.c.bf16 %v6713_v38, %v6712_v40  ;;  %v3741_v12 = vpop.permute.xlu1 %3740 }
0x230e   :  { %v3747_v3 = vpop.permute.xlu0 %3746  ;;  %v3761_v16 = vsel %vm335_vm5, %v7459_v39, %v3741_v12 }
0x230f   :  { %6471 = vmatprep.subr.bf16.mxu1 %v6470_v43  ;;  %v3762_v48 = vsel %vm50_vm0, %v3760_v4, %v3747_v3 }
0x2310   :  { %v6864_v33 = vpop.eup %6863  ;;  %6473 = vmatpush3.bf16.msra.mxu1 %v6470_v43 }
0x2311   :  { %v6866_v44 = vpop.eup %6865  ;;  %v3648_v45 = vmul.f32 %v6864_v33, %v6860_v41  ;;  %6475 = vmatprep.subr.bf16.mxu1 %v6474_v36  ;;  %v3749_v2 = vpop.permute.xlu1 %3748  ;;  %v7536_v41 = vld [vmem:[%s7752_s5 + $0x10] ss:$0 sm:$0xff] }
0x2312   :  { %v3647_v32 = vmul.f32 %v6866_v44, %v6862_v34  ;;  %v3763_v6 = vsel %vm50_vm0, %v3761_v16, %v3749_v2 }
0x2314   :  { %6102 = vmatprep.mubr.msk.f32.mxu1 %vm50_vm0, %v3647_v32 }
0x2315   :  { %6103 = vmatmul.mubr.msk.f32.vlgmr.msra.gmra.mrb[32].mxu1 %vm50_vm0, %v3648_v45 }
0x2316   :  { %6477 = vmatpush3.bf16.msra.mxu1 %v6474_v36  ;;  %v3894_v36 = vld [vmem:[#allocation2 + $0x1d8] sm:$0xff] }
0x2317   :  { %6479 = vmatprep.subr.bf16.mxu1 %v6478_v49  ;;  %v6714_v35 = vpack.i.bf16 %v3894_v36, %v3893_v58  ;;  %v6482_v54 = vpack.c.bf16 %v3894_v36, %v3893_v58  ;;  %v7608_v58 = vld [vmem:[%s7748_s1] sm:$0xff] }
0x2319   :  { %6483 = vmatprep.subr.bf16.mxu0 %v6482_v54 }
0x231a   :  { %6481 = vmatpush3.bf16.msra.mxu1 %v6478_v49  ;;  %v3895_v49 = vld [vmem:[#allocation2 + $0x1e0] sm:$0xff]  ;;  %6485 = vmatpush3.bf16.msra.mxu0 %v6482_v54 }
0x23e8   :  { %v6104_v52 = vpop.f32.mrb[32].mxu1 }
0x23e9   :  { %3756 = vrot.lane.b32.xlu1 %v6104_v52, %s6958_s12  ;;  %v3727_v53 = vpop.f32.mrb[33].mxu1  ;;  %v3896_v52 = vld [vmem:[#allocation2 + $0x1e8] sm:$0xff] }
0x23ea   :  { %3754 = vrot.lane.b32.xlu0 %v3727_v53, %s6958_s12  ;;  %v6719_v53 = vpack.i.bf16 %v3896_v52, %v3895_v49  ;;  %v6486_v56 = vpack.c.bf16 %v3896_v52, %v3895_v49 }
0x23ec   :  { %6487 = vmatprep.subr.bf16.mxu0 %v6486_v56 }
0x23ed   :  { %6489 = vmatpush3.bf16.msra.mxu0 %v6486_v56 }
0x2409   :  { %2788 = vadd.xlane.f32.xlu0 %v2787_v60 }
0x240d   :  { %2791 = vadd.xlane.f32.xlu1 %v2790_v28 }
0x245b   :  { %v3757_v17 = vpop.permute.xlu1 %3756 }
0x245c   :  { %v3755_v55 = vpop.permute.xlu0 %3754  ;;  %v3765_v1 = vsel %vm1172_vm7, %v3763_v6, %v3757_v17 }
0x245d   :  { %v3764_v10 = vsel %vm1172_vm7, %v3762_v48, %v3755_v55 }
0x245e   :  { %6113 = vmatprep.mubr.msk.f32.mxu1 %vm247_vm4, %v3764_v10 }
0x245f   :  { %6114 = vmatmul.mubr.msk.f32.vlgmr.msra.gmra.mrb[34].mxu1 %vm247_vm4, %v3765_v1 }
0x2496   :  { %v2789_v7 = vpop.xlane.xlu0 %2788 }
0x2497   :  { %v2793_v9 = vmul.f32 0.03125, %v2789_v7 }
0x2499   :  { %v2795_v31 = vsub.f32 %v2783_v63, %v2793_v9 }
0x249a   :  { %v2792_v39 = vpop.xlane.xlu1 %2791 }
0x249b   :  { %v2797_v42 = vmul.f32 %v2795_v31, %v2795_v31  ;;  %v2794_v21 = vmul.f32 0.03125, %v2792_v39 }
0x249d   :  { %v2799_v11 = vsel %vm247_vm4, %v2797_v42, 0.0  ;;  %v2796_v26 = vsub.f32 %v2784_v59, %v2794_v21 }
0x249e   :  { %2800 = vadd.xlane.f32.xlu1 %v2799_v11 }
0x249f   :  { %v2798_v22 = vmul.f32 %v2796_v26, %v2796_v26 }
0x24a1   :  { %v2802_v37 = vsel %vm247_vm4, %v2798_v22, 0.0 }
0x252b   :  { %v2801_v14 = vpop.xlane.xlu1 %2800 }
0x252c   :  { %v2805_v8 = vmul.f32 0.03125, %v2801_v14  ;;  %v5499_v14 = vld [vmem:[%s7752_s5 + $0x16] ss:$0 sm:$0xff] }
0x252e   :  { %v2807_v0 = vadd.f32 1e-05, %v2805_v8 }
0x2530   :  { %6867 = vrsqrt.f32 %v2807_v0  ;;  %v5500_v0 = vld [vmem:[%s7752_s5 + $0x17] ss:$0 sm:$0xff] }
0x2532   :  { %v6115_v18 = vpop.f32.mrb[34].mxu1 }
0x2533   :  { %v3842_v20 = vpop.f32.mrb[35].mxu1  ;;  %v3848_v23 = vadd.f32 %v6115_v18, %v5496_v15 }
0x2534   :  { %v3843_v24 = vadd.f32 %v5496_v15, %v3842_v20 }
0x2535   :  { %v3852_v27 = vadd.f32 %v3848_v23, %v7371_v51 }
0x2536   :  { %v3851_v25 = vadd.f32 %v3843_v24, %v7362_v50  ;;  %v7542_v50 = vld [vmem:[%s7752_s5 + $0x11] ss:$0 sm:$0xff] }
0x2537   :  { %v3858_v19 = vsel %vm247_vm4, %v3852_v27, 0.0 }
0x2538   :  { %v3855_v62 = vsel %vm247_vm4, %v3851_v25, 0.0 }
0x2539   :  { %3856 = vadd.xlane.f32.xlu0 %v3855_v62 }
0x253a   :  { %v6868_v30 = vpop.eup %6867 }
0x253b   :  { %v2811_v34 = vmul.f32 %v6868_v30, %v2795_v31 }
0x253d   :  { %3859 = vadd.xlane.f32.xlu0 %v3858_v19  ;;  %v2817_v51 = vmul.f32 %v7536_v41, %v2811_v34 }
0x253f   :  { %v2823_v29 = vadd.f32 %v7542_v50, %v2817_v51 }
0x2541   :  { %2803 = vadd.xlane.f32.xlu0 %v2802_v37  ;;  %6135 = vmatprep.mubr.msk.f32.mxu1 %vm247_vm4, %v2823_v29 }
0x25c6   :  { %v3857_v13 = vpop.xlane.xlu0 %3856 }
0x25c7   :  { %v3861_v38 = vmul.f32 0.03125, %v3857_v13 }
0x25c9   :  { %v3863_v40 = vsub.f32 %v3851_v25, %v3861_v38 }
0x25ca   :  { %v3860_v43 = vpop.xlane.xlu0 %3859 }
0x25cb   :  { %v3862_v33 = vmul.f32 0.03125, %v3860_v43  ;;  %v3865_v44 = vmul.f32 %v3863_v40, %v3863_v40 }
0x25cd   :  { %v3864_v32 = vsub.f32 %v3852_v27, %v3862_v33  ;;  %v3867_v45 = vsel %vm247_vm4, %v3865_v44, 0.0 }
0x25ce   :  { %3868 = vadd.xlane.f32.xlu1 %v3867_v45  ;;  %v2804_v63 = vpop.xlane.xlu0 %2803 }
0x25cf   :  { %v3866_v5 = vmul.f32 %v3864_v32, %v3864_v32  ;;  %v2806_v59 = vmul.f32 0.03125, %v2804_v63 }
0x25d1   :  { %v3870_v47 = vsel %vm247_vm4, %v3866_v5, 0.0  ;;  %v2808_v60 = vadd.f32 1e-05, %v2806_v59  ;;  %v7602_v5 = vld [vmem:[%s7748_s1 + $0x8] sm:$0xff] }
0x25d2   :  { %3871 = vadd.xlane.f32.xlu0 %v3870_v47 }
0x25d3   :  { %6869 = vrsqrt.f32 %v2808_v60 }
0x25dd   :  { %v6870_v2 = vpop.eup %6869 }
0x25de   :  { %v2812_v55 = vmul.f32 %v6870_v2, %v2796_v26 }
0x25df   :  { %6715 = vrot.lane.b32.xlu1 %v6714_v35, %s6947_s20 }
0x25e0   :  { %v2818_v42 = vmul.f32 %v7536_v41, %v2812_v55 }
0x25e2   :  { %v2824_v39 = vadd.f32 %v7542_v50, %v2818_v42 }
0x25e3   :  { %4005 = vrot.lane.b32.xlu1 %v5501_v57, %s6947_s20 }
0x25e8   :  { %6720 = vrot.lane.b32.xlu0 %v6719_v53, %s6947_s20 }
0x265b   :  { %v3869_v28 = vpop.xlane.xlu1 %3868 }
0x265c   :  { %v3873_v61 = vmul.f32 0.03125, %v3869_v28 }
0x265e   :  { %v3875_v12 = vadd.f32 1e-05, %v3873_v61 }
0x265f   :  { %v6716_v3 = vpop.permute.xlu1 %6715  ;;  %v3872_v4 = vpop.xlane.xlu0 %3871 }
0x2660   :  { %6871 = vrsqrt.f32 %v3875_v12  ;;  %v6718_v17 = vunpack.i.h.bf16 %v6716_v3  ;;  %v6717_v16 = vunpack.i.l.bf16 %v6716_v3  ;;  %v3874_v48 = vmul.f32 0.03125, %v3872_v4 }
0x2662   :  { %v6490_v6 = vpack.c.bf16 %v6718_v17, %v6717_v16  ;;  %v3876_v10 = vadd.f32 1e-05, %v3874_v48 }
0x2663   :  { %v6721_v1 = vpop.permute.xlu0 %6720  ;;  %v4006_v25 = vpop.permute.xlu1 %4005 }
0x2664   :  { %6873 = vrsqrt.f32 %v3876_v10  ;;  %v6723_v7 = vunpack.i.h.bf16 %v6721_v1  ;;  %v6722_v9 = vunpack.i.l.bf16 %v6721_v1  ;;  %6491 = vmatprep.subr.bf16.mxu1 %v6490_v6 }
0x2665   :  { %6493 = vmatpush3.bf16.msra.mxu1 %v6490_v6 }
0x2666   :  { %v6494_v31 = vpack.c.bf16 %v6723_v7, %v6722_v9 }
0x2668   :  { %6495 = vmatprep.subr.bf16.mxu1 %v6494_v31 }
0x2669   :  { %6497 = vmatpush3.bf16.msra.mxu1 %v6494_v31 }
0x266a   :  { %v6872_v11 = vpop.eup %6871 }
0x266b   :  { %v3879_v8 = vmul.f32 %v6872_v11, %v3863_v40 }
0x266c   :  { %6136 = vmatmul.mubr.msk.f32.vlgmr.msra.gmra.mrb[36].mxu1 %vm247_vm4, %v2824_v39 }
0x266d   :  { %v3885_v15 = vmul.f32 %v5499_v14, %v3879_v8 }
0x266e   :  { %v6874_v18 = vpop.eup %6873 }
0x266f   :  { %v3880_v20 = vmul.f32 %v6874_v18, %v3864_v32  ;;  %v7565_v21 = vadd.f32 %v5500_v0, %v3885_v15 }
0x2671   :  { %v3886_v23 = vmul.f32 %v5499_v14, %v3880_v20  ;;  %6124 = vmatprep.mubr.msk.f32.mxu0 %vm247_vm4, %v7565_v21 }
0x2673   :  { %v7569_v24 = vadd.f32 %v5500_v0, %v3886_v23 }
0x2675   :  { %6125 = vmatmul.mubr.msk.f32.vlgmr.msra.gmra.mrb[36].mxu0 %vm247_vm4, %v7569_v24 }
0x273f   :  { %v6137_v26 = vpop.f32.mrb[36].mxu1 }
0x2740   :  { %v4086_v27 = vadd.f32 %v6137_v26, %v4006_v25  ;;  %v4080_v62 = vpop.f32.mrb[37].mxu1 }
0x2741   :  { %v4081_v30 = vadd.f32 %v4080_v62, %v4006_v25 }
0x2743   :  { %v7573_v41 = vpack.i.bf16 %v4086_v27, %v4081_v30  ;;  %v6498_v34 = vpack.c.bf16 %v4086_v27, %v4081_v30 }
0x2745   :  { %6725 = vrot.lane.b32.xlu1 %v7573_v41, %s6946_s19  ;;  %6500 = vmatprep.subr.msk.bf16.mxu0 %vm7054_vm6, %v6498_v34 }
0x2746   :  { %6503 = vmatpush3.bf16.xpose.msk.msra.mxu0 %vm7054_vm6, %v6498_v34 }
0x2748   :  { %v6126_v19 = vpop.f32.mrb[36].mxu0 }
0x2749   :  { %v7581_v22 = vadd.f32 %v6126_v19, %v5501_v57  ;;  %v3979_v50 = vpop.f32.mrb[37].mxu0 }
0x274a   :  { %v7583_v51 = vadd.f32 %v5501_v57, %v3979_v50 }
0x274b   :  { %4291 = vrot.lane.b32.xlu1 %v7581_v22, %s6946_s19 }
0x274c   :  { %4289 = vrot.lane.b32.xlu0 %v7583_v51, %s6946_s19  ;;  %6142 = vmatprep.mubr.msk.f32.mxu0 %vm335_vm5, %v7583_v51 }
0x274d   :  { %6143 = vmatmul.mubr.msk.f32.vlgmr.msra.gmra.mrb[38].mxu0 %vm335_vm5, %v7581_v22 }
0x27b7   :  { %v6726_v29 = vpop.permute.xlu1 %6725 }
0x27b8   :  { %v6728_v37 = vunpack.i.h.bf16 %v6726_v29  ;;  %v6727_v13 = vunpack.i.l.bf16 %v6726_v29 }
0x27ba   :  { %v6508_v38 = vpack.c.bf16 %v6728_v37, %v6727_v13 }
0x27bc   :  { %6510 = vmatprep.subr.msk.bf16.mxu0 %vm7054_vm6, %v6508_v38 }
0x27bd   :  { %6513 = vmatpush3.bf16.xpose.msk.msra.mxu0 %vm7054_vm6, %v6508_v38  ;;  %v4292_v43 = vpop.permute.xlu1 %4291 }
0x27be   :  { %v4290_v40 = vpop.permute.xlu0 %4289 }
0x27bf   :  { %6156 = vmatprep.mubr.msk.f32.mxu0 %vm335_vm5, %v4290_v40 }
0x27c4   :  { %6157 = vmatmul.mubr.msk.f32.vlgmr.msra.gmra.mrb[40].mxu0 %vm335_vm5, %v4292_v43 }
0x2820   :  { %v6144_v33 = vpop.f32.mrb[38].mxu0 }
0x2821   :  { %v4177_v44 = vmul.f32 0.35355338, %v6144_v33  ;;  %v4167_v32 = vpop.f32.mrb[39].mxu0 }
0x2822   :  { %v4176_v45 = vmul.f32 0.35355338, %v4167_v32 }
0x2823   :  { %v4179_v47 = vadd.f32 %v7602_v5, %v4177_v44 }
0x2824   :  { %v4178_v36 = vadd.f32 %v7608_v58, %v4176_v45 }
0x2825   :  { %v4183_v35 = vsel %vm50_vm0, %v4179_v47, -inf }
0x2826   :  { %4184 = vmax.xlane.f32.xlu1 %v4183_v35  ;;  %v4180_v49 = vsel %vm50_vm0, %v4178_v36, -inf }
0x2827   :  { %4181 = vmax.xlane.f32.xlu0 %v4180_v49 }
0x2837   :  { %6730 = vrot.lane.b32.xlu1 %v7573_v41, %s6947_s20 }
0x2897   :  { %v6158_v52 = vpop.f32.mrb[40].mxu0 }
0x2898   :  { %v4371_v53 = vpop.f32.mrb[41].mxu0  ;;  %v4381_v54 = vmul.f32 0.35355338, %v6158_v52 }
0x2899   :  { %v4380_v56 = vmul.f32 0.35355338, %v4371_v53 }
0x289a   :  { %v4383_v63 = vadd.f32 %v7602_v5, %v4381_v54 }
0x289b   :  { %v4382_v57 = vadd.f32 %v7608_v58, %v4380_v56 }
0x289c   :  { %v4387_v60 = vsel %vm50_vm0, %v4383_v63, -inf }
0x289d   :  { %v4384_v59 = vsel %vm50_vm0, %v4382_v57, -inf }
0x289e   :  { %4385 = vmax.xlane.f32.xlu0 %v4384_v59 }
0x28a2   :  { %4388 = vmax.xlane.f32.xlu0 %v4387_v60 }
0x28b3   :  { %v4185_v28 = vpop.xlane.xlu1 %4184 }
0x28b4   :  { %v4187_v61 = vsub.f32 %v4179_v47, %v4185_v28  ;;  %v4182_v12 = vpop.xlane.xlu0 %4181 }
0x28b5   :  { %v4186_v2 = vsub.f32 %v4178_v36, %v4182_v12 }
0x28b6   :  { %v4190_v3 = vmul.f32 1.442695, %v4187_v61 }
0x28b7   :  { %v4188_v4 = vmul.f32 1.442695, %v4186_v2  ;;  %v6731_v17 = vpop.permute.xlu1 %6730 }
0x28b8   :  { %6875 = vpow2.f32 %v4190_v3  ;;  %v6733_v16 = vunpack.i.h.bf16 %v6731_v17  ;;  %v6732_v48 = vunpack.i.l.bf16 %v6731_v17 }
0x28b9   :  { %6877 = vpow2.f32 %v4188_v4 }
0x28ba   :  { %v6504_v55 = vpack.c.bf16 %v6733_v16, %v6732_v48 }
0x28bc   :  { %6505 = vmatprep.subr.bf16.mxu1 %v6504_v55 }
0x28bd   :  { %6507 = vmatpush3.bf16.msra.mxu1 %v6504_v55 }
0x28c2   :  { %v6876_v6 = vpop.eup %6875 }
0x28c3   :  { %v6878_v10 = vpop.eup %6877  ;;  %v4195_v1 = vsel %vm50_vm0, %v6876_v6, 0.0 }
0x28c4   :  { %4196 = vadd.xlane.f32.xlu0 %v4195_v1  ;;  %v4192_v7 = vsel %vm50_vm0, %v6878_v10, 0.0 }
0x28c5   :  { %4193 = vadd.xlane.f32.xlu1 %v4192_v7 }
0x28d6   :  { %6740 = vrot.lane.b32.xlu1 %v7573_v41, %s6952_s29 }
0x292b   :  { %v4386_v9 = vpop.xlane.xlu0 %4385 }
0x292c   :  { %v4390_v31 = vsub.f32 %v4382_v57, %v4386_v9 }
0x292e   :  { %v4392_v42 = vmul.f32 1.442695, %v4390_v31 }
0x292f   :  { %v4389_v11 = vpop.xlane.xlu0 %4388 }
0x2930   :  { %6879 = vpow2.f32 %v4392_v42  ;;  %v4391_v39 = vsub.f32 %v4383_v63, %v4389_v11 }
0x2932   :  { %v4394_v14 = vmul.f32 1.442695, %v4391_v39 }
0x2934   :  { %6881 = vpow2.f32 %v4394_v14 }
0x293a   :  { %v6880_v8 = vpop.eup %6879 }
0x293b   :  { %v4396_v0 = vsel %vm50_vm0, %v6880_v8, 0.0 }
0x293c   :  { %4397 = vadd.xlane.f32.xlu1 %v4396_v0 }
0x293e   :  { %v6882_v15 = vpop.eup %6881 }
0x293f   :  { %v4399_v18 = vsel %vm50_vm0, %v6882_v15, 0.0 }
0x2940   :  { %4400 = vadd.xlane.f32.xlu0 %v4399_v18 }
0x294d   :  { %4493 = vrot.lane.b32.xlu1 %v7583_v51, %s6952_s29 }
0x2951   :  { %v4197_v20 = vpop.xlane.xlu0 %4196 }
0x2952   :  { %6883 = vrcp.f32 %v4197_v20  ;;  %v4194_v23 = vpop.xlane.xlu1 %4193 }
0x2953   :  { %6885 = vrcp.f32 %v4194_v23 }
0x2956   :  { %6735 = vrot.lane.b32.xlu0 %v7573_v41, %s6948_s21  ;;  %v6741_v30 = vpop.permute.xlu1 %6740 }
0x2957   :  { %v6743_v29 = vunpack.i.h.bf16 %v6741_v30  ;;  %v6742_v37 = vunpack.i.l.bf16 %v6741_v30 }
0x2959   :  { %v6518_v44 = vpack.c.bf16 %v6743_v29, %v6742_v37 }
0x295a   :  { %4495 = vrot.lane.b32.xlu0 %v7581_v22, %s6952_s29 }
0x295c   :  { %v6884_v25 = vpop.eup %6883 }
0x295d   :  { %v6886_v26 = vpop.eup %6885  ;;  %v4201_v62 = vmul.f32 %v6884_v25, %v6876_v6 }
0x295e   :  { %v4200_v27 = vmul.f32 %v6886_v26, %v6878_v10 }
0x2960   :  { %6149 = vmatprep.mubr.msk.f32.mxu1 %vm50_vm0, %v4200_v27 }
0x2961   :  { %6150 = vmatmul.mubr.msk.f32.vlgmr.msra.gmra.mrb[38].mxu1 %vm50_vm0, %v4201_v62 }
0x29c9   :  { %v4398_v34 = vpop.xlane.xlu1 %4397 }
0x29ca   :  { %6887 = vrcp.f32 %v4398_v34 }
0x29cd   :  { %v4401_v19 = vpop.xlane.xlu0 %4400  ;;  %v4494_v47 = vpop.permute.xlu1 %4493 }
0x29ce   :  { %6889 = vrcp.f32 %v4401_v19 }
0x29d1   :  { %v6736_v50 = vpop.permute.xlu0 %6735 }
0x29d2   :  { %v6738_v13 = vunpack.i.h.bf16 %v6736_v50  ;;  %v6737_v38 = vunpack.i.l.bf16 %v6736_v50 }
0x29d4   :  { %v6888_v40 = vpop.eup %6887  ;;  %v6514_v43 = vpack.c.bf16 %v6738_v13, %v6737_v38 }
0x29d5   :  { %v4404_v33 = vmul.f32 %v6888_v40, %v6880_v8  ;;  %v4496_v36 = vpop.permute.xlu0 %4495 }
0x29d6   :  { %6515 = vmatprep.subr.bf16.mxu1 %v6514_v43 }
0x29d7   :  { %6517 = vmatpush3.bf16.msra.mxu1 %v6514_v43  ;;  %6163 = vmatprep.mubr.msk.f32.mxu1 %vm50_vm0, %v4404_v33 }
0x29d8   :  { %v6890_v32 = vpop.eup %6889  ;;  %6520 = vmatprep.subr.msk.bf16.mxu1 %vm7054_vm6, %v6518_v44 }
0x29d9   :  { %v4405_v45 = vmul.f32 %v6890_v32, %v6882_v15 }
0x29db   :  { %6164 = vmatmul.mubr.msk.f32.vlgmr.msra.gmra.mrb[40].mxu1 %vm50_vm0, %v4405_v45 }
0x29dc   :  { %6170 = vmatprep.mubr.msk.f32.mxu1 %vm335_vm5, %v4494_v47 }
0x29e0   :  { %6523 = vmatpush3.bf16.xpose.msk.msra.mxu1 %vm7054_vm6, %v6518_v44 }
0x29e7   :  { %6171 = vmatmul.mubr.msk.f32.vlgmr.msra.gmra.mrb[42].mxu1 %vm335_vm5, %v4496_v36 }
0x2a34   :  { %v7641_v35 = vpop.f32.mrb[38].mxu1 }
0x2a35   :  { %v7643_v49 = vpop.f32.mrb[39].mxu1 }
0x2aae   :  { %v7645_v52 = vpop.f32.mrb[40].mxu1 }
0x2aaf   :  { %v7647_v53 = vpop.f32.mrb[41].mxu1 }
0x2aba   :  { %v6172_v54 = vpop.f32.mrb[42].mxu1 }
0x2abb   :  { %v4585_v56 = vmul.f32 0.35355338, %v6172_v54  ;;  %v4575_v57 = vpop.f32.mrb[43].mxu1 }
0x2abc   :  { %v4584_v63 = vmul.f32 0.35355338, %v4575_v57 }
0x2abd   :  { %v4587_v59 = vadd.f32 %v7602_v5, %v4585_v56 }
0x2abe   :  { %v4586_v60 = vadd.f32 %v7608_v58, %v4584_v63 }
0x2abf   :  { %v4591_v28 = vsel %vm50_vm0, %v4587_v59, -inf }
0x2ac0   :  { %4592 = vmax.xlane.f32.xlu0 %v4591_v28  ;;  %v4588_v61 = vsel %vm50_vm0, %v4586_v60, -inf  ;;  %v3900_v28 = vld [vmem:[#allocation2 + $0x200] sm:$0xff] }
0x2ac1   :  { %4589 = vmax.xlane.f32.xlu1 %v4588_v61 }
0x2b4d   :  { %v4593_v12 = vpop.xlane.xlu0 %4592 }
0x2b4e   :  { %v4595_v2 = vsub.f32 %v4587_v59, %v4593_v12  ;;  %v4590_v3 = vpop.xlane.xlu1 %4589  ;;  %v3901_v12 = vld [vmem:[#allocation2 + $0x208] sm:$0xff] }
0x2b4f   :  { %v4594_v4 = vsub.f32 %v4586_v60, %v4590_v3  ;;  %v3899_v60 = vld [vmem:[#allocation2 + $0x1f8] sm:$0xff] }
0x2b50   :  { %v4598_v17 = vmul.f32 1.442695, %v4595_v2  ;;  %v6542_v2 = vpack.c.bf16 %v3901_v12, %v3900_v28 }
0x2b51   :  { %v4596_v16 = vmul.f32 1.442695, %v4594_v4 }
0x2b52   :  { %6891 = vpow2.f32 %v4598_v17 }
0x2b53   :  { %6893 = vpow2.f32 %v4596_v16 }
0x2b5c   :  { %v6892_v48 = vpop.eup %6891 }
0x2b5d   :  { %v6894_v55 = vpop.eup %6893  ;;  %v4603_v6 = vsel %vm50_vm0, %v6892_v48, 0.0 }
0x2b5e   :  { %4604 = vadd.xlane.f32.xlu1 %v4603_v6  ;;  %v4600_v10 = vsel %vm50_vm0, %v6894_v55, 0.0 }
0x2b5f   :  { %4601 = vadd.xlane.f32.xlu0 %v4600_v10 }
0x2b6f   :  { %6750 = vrot.lane.b32.xlu1 %v7573_v41, %s6954_s7 }
0x2b73   :  { %4697 = vrot.lane.b32.xlu1 %v7583_v51, %s6954_s7 }
0x2b75   :  { %6745 = vrot.lane.b32.xlu0 %v7573_v41, %s6950_s27 }
0x2b79   :  { %4699 = vrot.lane.b32.xlu0 %v7581_v22, %s6954_s7 }
0x2beb   :  { %v4605_v1 = vpop.xlane.xlu1 %4604 }
0x2bec   :  { %6895 = vrcp.f32 %v4605_v1  ;;  %v4602_v7 = vpop.xlane.xlu0 %4601 }
0x2bed   :  { %6897 = vrcp.f32 %v4602_v7 }
0x2bef   :  { %v6751_v9 = vpop.permute.xlu1 %6750 }
0x2bf0   :  { %v6746_v31 = vpop.permute.xlu0 %6745  ;;  %v6753_v42 = vunpack.i.h.bf16 %v6751_v9  ;;  %v6752_v11 = vunpack.i.l.bf16 %v6751_v9 }
0x2bf1   :  { %v6748_v39 = vunpack.i.h.bf16 %v6746_v31  ;;  %v6747_v14 = vunpack.i.l.bf16 %v6746_v31 }
0x2bf2   :  { %v6528_v0 = vpack.c.bf16 %v6753_v42, %v6752_v11 }
0x2bf3   :  { %v6524_v8 = vpack.c.bf16 %v6748_v39, %v6747_v14  ;;  %v4698_v20 = vpop.permute.xlu1 %4697 }
0x2bf4   :  { %v4700_v23 = vpop.permute.xlu0 %4699 }
0x2bf5   :  { %6525 = vmatprep.subr.bf16.mxu0 %v6524_v8 }
0x2bf6   :  { %v6896_v51 = vpop.eup %6895  ;;  %6527 = vmatpush3.bf16.msra.mxu0 %v6524_v8 }
0x2bf7   :  { %v6898_v15 = vpop.eup %6897  ;;  %6530 = vmatprep.subr.msk.bf16.mxu0 %vm7054_vm6, %v6528_v0  ;;  %v4609_v18 = vmul.f32 %v6896_v51, %v6892_v48 }
0x2bf8   :  { %v4608_v22 = vmul.f32 %v6898_v15, %v6894_v55 }
0x2bfa   :  { %6177 = vmatprep.mubr.msk.f32.mxu0 %vm50_vm0, %v4608_v22 }
0x2bfb   :  { %6178 = vmatmul.mubr.msk.f32.vlgmr.msra.gmra.mrb[42].mxu0 %vm50_vm0, %v4609_v18 }
0x2bfc   :  { %6184 = vmatprep.mubr.msk.f32.mxu0 %vm335_vm5, %v4698_v20 }
0x2bff   :  { %6533 = vmatpush3.bf16.xpose.msk.msra.mxu0 %vm7054_vm6, %v6528_v0 }
0x2c06   :  { %6185 = vmatmul.mubr.msk.f32.vlgmr.msra.gmra.mrb[44].mxu0 %vm335_vm5, %v4700_v23 }
0x2cce   :  { %v6179_v25 = vpop.f32.mrb[42].mxu0 }
0x2ccf   :  { %v4688_v26 = vpop.f32.mrb[43].mxu0 }
0x2cd9   :  { %v6186_v27 = vpop.f32.mrb[44].mxu0 }
0x2cda   :  { %v4789_v62 = vmul.f32 0.35355338, %v6186_v27  ;;  %v4779_v30 = vpop.f32.mrb[45].mxu0 }
0x2cdb   :  { %v4788_v34 = vmul.f32 0.35355338, %v4779_v30 }
0x2cdc   :  { %v4791_v19 = vadd.f32 %v7602_v5, %v4789_v62 }
0x2cdd   :  { %v4790_v50 = vadd.f32 %v7608_v58, %v4788_v34 }
0x2cde   :  { %v4795_v29 = vsel %vm50_vm0, %v4791_v19, -inf }
0x2cdf   :  { %4796 = vmax.xlane.f32.xlu0 %v4795_v29  ;;  %v4792_v37 = vsel %vm50_vm0, %v4790_v50, -inf  ;;  %v5060_v29 = vld [vmem:[#allocation2 + $0x220] sm:$0xff] }
0x2ce0   :  { %4793 = vmax.xlane.f32.xlu1 %v4792_v37  ;;  %v5061_v37 = vld [vmem:[#allocation2 + $0x228] sm:$0xff] }
0x2d6c   :  { %v4797_v46 = vpop.xlane.xlu0 %4796 }
0x2d6d   :  { %v4799_v13 = vsub.f32 %v4791_v19, %v4797_v46  ;;  %v4794_v38 = vpop.xlane.xlu1 %4793  ;;  %v5059_v19 = vld [vmem:[#allocation2 + $0x218] sm:$0xff]  ;;  %v6550_v46 = vpack.c.bf16 %v5061_v37, %v5060_v29 }
0x2d6e   :  { %v4798_v40 = vsub.f32 %v4790_v50, %v4794_v38  ;;  %v5151_v38 = vld [vmem:[#allocation2 + $0x238] sm:$0xff] }
0x2d6f   :  { %v4802_v43 = vmul.f32 1.442695, %v4799_v13  ;;  %v5150_v13 = vld [vmem:[#allocation2 + $0x230] sm:$0xff] }
0x2d70   :  { %v4800_v33 = vmul.f32 1.442695, %v4798_v40  ;;  %v5152_v40 = vld [vmem:[#allocation2 + $0x240] sm:$0xff] }
0x2d71   :  { %6899 = vpow2.f32 %v4802_v43  ;;  %v6554_v43 = vpack.c.bf16 %v5151_v38, %v5150_v13 }
0x2d72   :  { %6901 = vpow2.f32 %v4800_v33  ;;  %v5153_v33 = vld [vmem:[#allocation2 + $0x248] sm:$0xff] }
0x2d7b   :  { %v6900_v44 = vpop.eup %6899 }
0x2d7c   :  { %v6902_v32 = vpop.eup %6901  ;;  %v4807_v5 = vsel %vm50_vm0, %v6900_v44, 0.0 }
0x2d7d   :  { %4808 = vadd.xlane.f32.xlu1 %v4807_v5  ;;  %v4804_v58 = vsel %vm50_vm0, %v6902_v32, 0.0  ;;  %v5155_v5 = vld [vmem:[#allocation2 + $0x258] sm:$0xff] }
0x2d7e   :  { %4805 = vadd.xlane.f32.xlu0 %v4804_v58 }
0x2d8e   :  { %4903 = vrot.lane.b32.xlu1 %v7647_v53, %s6945_s8 }
0x2d92   :  { %4905 = vrot.lane.b32.xlu1 %v7645_v52, %s6945_s8 }
0x2d94   :  { %6755 = vrot.lane.b32.xlu0 %v7573_v41, %s6953_s30  ;;  %v3898_v41 = vld [vmem:[#allocation2 + $0x1f0] sm:$0xff] }
0x2d95   :  { %v6538_v61 = vpack.c.bf16 %v3899_v60, %v3898_v41 }
0x2d96   :  { %4913 = vrot.lane.b32.xlu1 %v6179_v25, %s6957_s11 }
0x2d98   :  { %4911 = vrot.lane.b32.xlu0 %v4688_v26, %s6957_s11 }
0x2e0a   :  { %v4809_v45 = vpop.xlane.xlu1 %4808 }
0x2e0b   :  { %6903 = vrcp.f32 %v4809_v45  ;;  %v4806_v47 = vpop.xlane.xlu0 %4805 }
0x2e0c   :  { %6905 = vrcp.f32 %v4806_v47 }
0x2e0e   :  { %v4904_v17 = vpop.permute.xlu1 %4903 }
0x2e0f   :  { %v6756_v36 = vpop.permute.xlu0 %6755  ;;  %v4925_v6 = vsel %vm335_vm5, %v7643_v49, %v4904_v17  ;;  %v5530_v49 = vld [vmem:[%s7752_s5 + $0x15] ss:$0 sm:$0xff] }
0x2e10   :  { %v6758_v54 = vunpack.i.h.bf16 %v6756_v36  ;;  %v6757_v56 = vunpack.i.l.bf16 %v6756_v36 }
0x2e12   :  { %v6534_v57 = vpack.c.bf16 %v6758_v54, %v6757_v56  ;;  %v4906_v16 = vpop.permute.xlu1 %4905 }
0x2e13   :  { %v4912_v55 = vpop.permute.xlu0 %4911  ;;  %v4926_v1 = vsel %vm335_vm5, %v7641_v35, %v4906_v16  ;;  %v5535_v16 = vld [vmem:[%s7752_s5 + $0x1a] ss:$0 sm:$0xff] }
0x2e14   :  { %6535 = vmatprep.subr.bf16.mxu1 %v6534_v57  ;;  %v4927_v7 = vsel %vm50_vm0, %v4925_v6, %v4912_v55 }
0x2e15   :  { %v6904_v53 = vpop.eup %6903  ;;  %6537 = vmatpush3.bf16.msra.mxu1 %v6534_v57 }
0x2e16   :  { %v6906_v63 = vpop.eup %6905  ;;  %v4813_v59 = vmul.f32 %v6904_v53, %v6900_v44  ;;  %6539 = vmatprep.subr.bf16.mxu1 %v6538_v61  ;;  %v4914_v48 = vpop.permute.xlu1 %4913  ;;  %v6558_v44 = vpack.c.bf16 %v5153_v33, %v5152_v40 }
0x2e17   :  { %v4812_v52 = vmul.f32 %v6906_v63, %v6902_v32  ;;  %v4928_v31 = vsel %vm50_vm0, %v4926_v1, %v4914_v48  ;;  %v5154_v32 = vld [vmem:[#allocation2 + $0x250] sm:$0xff]  ;;  %v5533_v63 = vld [vmem:[%s7752_s5 + $0x18] ss:$0 sm:$0xff] }
0x2e18   :  { %v6562_v58 = vpack.c.bf16 %v5155_v5, %v5154_v32  ;;  %v5542_v5 = vld [vmem:[%s7752_s5 + $0x1d] ss:$0 sm:$0xff] }
0x2e19   :  { %6191 = vmatprep.mubr.msk.f32.mxu1 %vm50_vm0, %v4812_v52 }
0x2e1a   :  { %6192 = vmatmul.mubr.msk.f32.vlgmr.msra.gmra.mrb[44].mxu1 %vm50_vm0, %v4813_v59  ;;  %v5534_v59 = vld [vmem:[%s7752_s5 + $0x19] ss:$0 sm:$0xff] }
0x2e1b   :  { %6541 = vmatpush3.bf16.msra.mxu1 %v6538_v61 }
0x2e1c   :  { %6543 = vmatprep.subr.bf16.mxu1 %v6542_v2 }
0x2e1f   :  { %6545 = vmatpush3.bf16.msra.mxu1 %v6542_v2 }
0x2e20   :  { %6555 = vmatprep.subr.bf16.mxu1 %v6554_v43 }
0x2eed   :  { %v6193_v3 = vpop.f32.mrb[44].mxu1 }
0x2eee   :  { %4921 = vrot.lane.b32.xlu1 %v6193_v3, %s6958_s12  ;;  %v4892_v4 = vpop.f32.mrb[45].mxu1  ;;  %v5156_v3 = vld [vmem:[#allocation2 + $0x260] sm:$0xff] }
0x2eef   :  { %4919 = vrot.lane.b32.xlu0 %v4892_v4, %s6958_s12  ;;  %v5157_v4 = vld [vmem:[#allocation2 + $0x268] sm:$0xff] }
0x2ef0   :  { %v6566_v17 = vpack.c.bf16 %v5157_v4, %v5156_v3 }
0x2f60   :  { %v4922_v10 = vpop.permute.xlu1 %4921 }
0x2f61   :  { %v4920_v9 = vpop.permute.xlu0 %4919  ;;  %v4930_v11 = vsel %vm1172_vm7, %v4928_v31, %v4922_v10 }
0x2f62   :  { %v4929_v42 = vsel %vm1172_vm7, %v4927_v7, %v4920_v9  ;;  %v5538_v9 = vld [vmem:[%s7752_s5 + $0x1b] ss:$0 sm:$0xff] }
0x2f63   :  { %6202 = vmatprep.mubr.msk.f32.mxu1 %vm247_vm4, %v4929_v42 }
0x2f64   :  { %6203 = vmatmul.mubr.msk.f32.vlgmr.msra.gmra.mrb[46].mxu1 %vm247_vm4, %v4930_v11 }
0x2f65   :  { %6557 = vmatpush3.bf16.msra.mxu1 %v6554_v43  ;;  %v5541_v43 = vld [vmem:[%s7752_s5 + $0x1c] ss:$0 sm:$0xff] }
0x2f66   :  { %6559 = vmatprep.subr.bf16.mxu1 %v6558_v44 }
0x2f69   :  { %6561 = vmatpush3.bf16.msra.mxu1 %v6558_v44 }
0x2f6a   :  { %6563 = vmatprep.subr.bf16.mxu1 %v6562_v58 }
0x2f6d   :  { %6565 = vmatpush3.bf16.msra.mxu1 %v6562_v58 }
0x2f6e   :  { %6567 = vmatprep.subr.bf16.mxu1 %v6566_v17 }
0x2f71   :  { %6569 = vmatpush3.bf16.msra.mxu1 %v6566_v17 }
0x3037   :  { %v6204_v39 = vpop.f32.mrb[46].mxu1 }
0x3038   :  { %v5013_v14 = vadd.f32 %v6204_v39, %v5530_v49  ;;  %v5007_v35 = vpop.f32.mrb[47].mxu1 }
0x3039   :  { %v5008_v8 = vadd.f32 %v5530_v49, %v5007_v35 }
0x303a   :  { %v5017_v0 = vadd.f32 %v5013_v14, %v7569_v24 }
0x303b   :  { %v5016_v51 = vadd.f32 %v5008_v8, %v7565_v21  ;;  %v5058_v21 = vld [vmem:[#allocation2 + $0x210] sm:$0xff] }
0x303c   :  { %v5023_v15 = vsel %vm247_vm4, %v5017_v0, 0.0  ;;  %v6546_v50 = vpack.c.bf16 %v5059_v19, %v5058_v21  ;;  %v5289_v21 = vld [vmem:[#allocation2 + $0x288] sm:$0xff] }
0x303d   :  { %5024 = vadd.xlane.f32.xlu1 %v5023_v15  ;;  %v5020_v22 = vsel %vm247_vm4, %v5016_v51, 0.0 }
0x303e   :  { %5021 = vadd.xlane.f32.xlu0 %v5020_v22  ;;  %6547 = vmatprep.subr.bf16.mxu0 %v6546_v50 }
0x303f   :  { %6549 = vmatpush3.bf16.msra.mxu0 %v6546_v50 }
0x3040   :  { %6551 = vmatprep.subr.bf16.mxu0 %v6550_v46 }
0x3043   :  { %6553 = vmatpush3.bf16.msra.mxu0 %v6550_v46 }
0x30ca   :  { %v5025_v18 = vpop.xlane.xlu1 %5024 }
0x30cb   :  { %v5027_v20 = vmul.f32 0.03125, %v5025_v18  ;;  %v5022_v23 = vpop.xlane.xlu0 %5021 }
0x30cc   :  { %v5026_v25 = vmul.f32 0.03125, %v5022_v23 }
0x30cd   :  { %v5029_v26 = vsub.f32 %v5017_v0, %v5027_v20 }
0x30ce   :  { %v5028_v27 = vsub.f32 %v5016_v51, %v5026_v25 }
0x30cf   :  { %v5031_v34 = vmul.f32 %v5029_v26, %v5029_v26 }
0x30d0   :  { %v5030_v62 = vmul.f32 %v5028_v27, %v5028_v27 }
0x30d1   :  { %v5035_v24 = vsel %vm247_vm4, %v5031_v34, 0.0 }
0x30d2   :  { %v5032_v30 = vsel %vm247_vm4, %v5030_v62, 0.0  ;;  %v5286_v62 = vld [vmem:[#allocation2 + $0x270] sm:$0xff] }
0x30d3   :  { %5033 = vadd.xlane.f32.xlu0 %v5032_v30  ;;  %v5287_v30 = vld [vmem:[#allocation2 + $0x278] sm:$0xff] }
0x30d4   :  { %v6570_v34 = vpack.c.bf16 %v5287_v30, %v5286_v62 }
0x30d6   :  { %6571 = vmatprep.subr.bf16.mxu0 %v6570_v34 }
0x30d7   :  { %5036 = vadd.xlane.f32.xlu0 %v5035_v24  ;;  %v5288_v24 = vld [vmem:[#allocation2 + $0x280] sm:$0xff] }
0x30d8   :  { %v6574_v19 = vpack.c.bf16 %v5289_v21, %v5288_v24 }
0x3160   :  { %v5034_v45 = vpop.xlane.xlu0 %5033 }
0x3161   :  { %v5038_v47 = vmul.f32 0.03125, %v5034_v45 }
0x3163   :  { %v5040_v36 = vadd.f32 1e-05, %v5038_v47 }
0x3164   :  { %v5037_v54 = vpop.xlane.xlu0 %5036 }
0x3165   :  { %6907 = vrsqrt.f32 %v5040_v36  ;;  %v5039_v56 = vmul.f32 0.03125, %v5037_v54  ;;  %v5543_v54 = vld [vmem:[%s7752_s5 + $0x1e] ss:$0 sm:$0xff] }
0x3167   :  { %v5041_v57 = vadd.f32 1e-05, %v5039_v56 }
0x3169   :  { %6909 = vrsqrt.f32 %v5041_v57 }
0x316f   :  { %v6908_v53 = vpop.eup %6907 }
0x3170   :  { %v5044_v52 = vmul.f32 %v6908_v53, %v5028_v27 }
0x3172   :  { %v5050_v41 = vmul.f32 %v5533_v63, %v5044_v52 }
0x3173   :  { %v6910_v60 = vpop.eup %6909 }
0x3174   :  { %v5045_v28 = vmul.f32 %v6910_v60, %v5029_v26  ;;  %v5056_v61 = vadd.f32 %v5534_v59, %v5050_v41 }
0x3176   :  { %v5051_v12 = vmul.f32 %v5533_v63, %v5045_v28  ;;  %6213 = vmatprep.mubr.msk.f32.mxu0 %vm247_vm4, %v5056_v61 }
0x3178   :  { %v5057_v2 = vadd.f32 %v5534_v59, %v5051_v12 }
0x317a   :  { %6214 = vmatmul.mubr.msk.f32.vlgmr.msra.gmra.mrb[46].mxu0 %vm247_vm4, %v5057_v2 }
0x317b   :  { %6573 = vmatpush3.bf16.msra.mxu0 %v6570_v34 }
0x317c   :  { %6575 = vmatprep.subr.bf16.mxu0 %v6574_v19 }
0x317f   :  { %6577 = vmatpush3.bf16.msra.mxu0 %v6574_v19 }
0x324d   :  { %v6215_v48 = vpop.f32.mrb[46].mxu0 }
0x324e   :  { %v5145_v55 = vadd.f32 %v6215_v48, %v5535_v16  ;;  %v5139_v6 = vpop.f32.mrb[47].mxu0 }
0x324f   :  { %v5140_v10 = vadd.f32 %v5535_v16, %v5139_v6 }
0x3250   :  { %v5149_v7 = vmax.f32 %v5145_v55, 0.0 }
0x3251   :  { %v5148_v1 = vmax.f32 %v5140_v10, 0.0 }
0x3253   :  { %6232 = vmatprep.mubr.msk.f32.mxu1 %vm151_vm3, %v5148_v1 }
0x3254   :  { %6233 = vmatmul.mubr.msk.f32.vlgmr.msra.gmra.mrb[48].mxu1 %vm151_vm3, %v5149_v7 }
0x3327   :  { %v6234_v31 = vpop.f32.mrb[48].mxu1 }
0x3328   :  { %v5241_v42 = vadd.f32 %v6234_v31, %v5538_v9  ;;  %v5235_v11 = vpop.f32.mrb[49].mxu1 }
0x3329   :  { %v5236_v49 = vadd.f32 %v5538_v9, %v5235_v11 }
0x332a   :  { %v5245_v39 = vadd.f32 %v5241_v42, %v5057_v2 }
0x332b   :  { %v5244_v14 = vadd.f32 %v5236_v49, %v5056_v61 }
0x332c   :  { %v5251_v35 = vsel %vm247_vm4, %v5245_v39, 0.0 }
0x332d   :  { %5252 = vadd.xlane.f32.xlu0 %v5251_v35  ;;  %v5248_v8 = vsel %vm247_vm4, %v5244_v14, 0.0 }
0x332e   :  { %5249 = vadd.xlane.f32.xlu1 %v5248_v8 }
0x33ba   :  { %v5253_v0 = vpop.xlane.xlu0 %5252 }
0x33bb   :  { %v5255_v51 = vmul.f32 0.03125, %v5253_v0  ;;  %v5250_v15 = vpop.xlane.xlu1 %5249 }
0x33bc   :  { %v5254_v22 = vmul.f32 0.03125, %v5250_v15 }
0x33bd   :  { %v5257_v18 = vsub.f32 %v5245_v39, %v5255_v51 }
0x33be   :  { %v5256_v20 = vsub.f32 %v5244_v14, %v5254_v22 }
0x33bf   :  { %v5259_v23 = vmul.f32 %v5257_v18, %v5257_v18 }
0x33c0   :  { %v5258_v25 = vmul.f32 %v5256_v20, %v5256_v20 }
0x33c1   :  { %v5263_v26 = vsel %vm247_vm4, %v5259_v23, 0.0 }
0x33c2   :  { %5264 = vadd.xlane.f32.xlu0 %v5263_v26  ;;  %v5260_v27 = vsel %vm247_vm4, %v5258_v25, 0.0 }
0x33c3   :  { %5261 = vadd.xlane.f32.xlu1 %v5260_v27 }
0x344f   :  { %v5265_v50 = vpop.xlane.xlu0 %5264 }
0x3450   :  { %v5267_v29 = vmul.f32 0.03125, %v5265_v50  ;;  %v5262_v37 = vpop.xlane.xlu1 %5261 }
0x3451   :  { %v5266_v46 = vmul.f32 0.03125, %v5262_v37 }
0x3452   :  { %v5269_v13 = vadd.f32 1e-05, %v5267_v29 }
0x3453   :  { %v5268_v38 = vadd.f32 1e-05, %v5266_v46 }
0x3454   :  { %6911 = vrsqrt.f32 %v5269_v13 }
0x3455   :  { %6913 = vrsqrt.f32 %v5268_v38 }
0x345e   :  { %v6912_v40 = vpop.eup %6911 }
0x345f   :  { %v6914_v33 = vpop.eup %6913  ;;  %v5273_v44 = vmul.f32 %v6912_v40, %v5257_v18 }
0x3460   :  { %v5272_v32 = vmul.f32 %v6914_v33, %v5256_v20 }
0x3461   :  { %v5279_v58 = vmul.f32 %v5541_v43, %v5273_v44 }
0x3462   :  { %v5278_v45 = vmul.f32 %v5541_v43, %v5272_v32 }
0x3463   :  { %v5285_v36 = vadd.f32 %v5542_v5, %v5279_v58 }
0x3464   :  { %v5284_v47 = vadd.f32 %v5542_v5, %v5278_v45 }
0x3466   :  { %6243 = vmatprep.mubr.msk.f32.mxu0 %vm247_vm4, %v5284_v47 }
0x3467   :  { %6244 = vmatmul.mubr.msk.f32.vlgmr.msra.gmra.mrb[48].mxu0 %vm247_vm4, %v5285_v36 }
0x353a   :  { %v6245_v56 = vpop.f32.mrb[48].mxu0 }
0x353b   :  { %v5373_v57 = vadd.f32 %v6245_v56, %v5543_v54  ;;  %v5367_v53 = vpop.f32.mrb[49].mxu0 }
0x353c   :  { %v5368_v63 = vadd.f32 %v5543_v54, %v5367_v53 }
0x353d   :  { %5377 = vst.msk [vmem:[%s7753_s6 + $0x8] sm:$0xff] %vm247_vm4, %v5373_v57 }
0x353e   :  { %5376 = vst.msk [vmem:[%s7753_s6] sm:$0xff] %vm247_vm4, %v5368_v63 }
0x353f   :  { %5382 = vsyncpa [#allocation3], 1 }

</bundles_post_ra>
